<compile_context>
chip_gen: v7x
topology: tpu7x:2x2x1
jax: 0.10.0
libtpu: 0.0.40
codegen_flags: <defaults>
</compile_context>

<pallas_src>
import jax
import jax.numpy as jnp
from jax.experimental import pallas as pl
from jax.experimental.pallas import tpu as pltpu

_VMEM_LIMIT = 48 * 1024 * 1024   # leave headroom below v7x's 64 MiB physical


# ----------------------------------------------------------------------------
# Kernel 1: pad + im2col(value concat) + [conv3x3->BN->ReLU]*mask
#                                      + [conv1x1->BN->ReLU], split (a, b).
# The 1x1 conv is pre-lifted into the centre-tap rows of w_ref's second half,
# so a single MXU matmul produces both paths.
# ----------------------------------------------------------------------------
def _make_conv_fused_kernel(KH, KW, pad):
    def kernel(cat_ref, mask_ref, w_ref, bias_ref,
               a_out_ref, b_out_ref, pad_ref):
        _, H, W, c = a_out_ref.shape
        Cout = 2 * c
        Hp, Wp, Ccat = pad_ref.shape
        HW = H * W

        # Zero only the thin halo border (cheap, safe under any grid sharding).
        if pad > 0:
            zr = jnp.zeros((pad, Wp, Ccat), pad_ref.dtype)
            zc = jnp.zeros((Hp, pad, Ccat), pad_ref.dtype)
            pad_ref[0:pad] = zr
            pad_ref[H + pad:Hp] = zr
            pad_ref[:, 0:pad] = zc
            pad_ref[:, W + pad:Wp] = zc

        # Single wide interior write (concat already done in the wrapper).
        pad_ref[pad:pad + H, pad:pad + W, :] = cat_ref[0]

        # im2col as a value-level lane concat (no narrow per-tap VMEM stores).
        taps = []
        for kh in range(KH):
            for kw in range(KW):
                taps.append(pad_ref[kh:kh + H, kw:kw + W, :].reshape(HW, Ccat))
        col = jnp.concatenate(taps, axis=-1)                 # (HW, KH*KW*Ccat)

        # One MXU matmul for BOTH conv paths (BN scale pre-folded).
        y = jnp.dot(col, w_ref[...], preferred_element_type=jnp.float32)
        y = jnp.maximum(y + bias_ref[...], 0.0)              # bias + ReLU

        m = mask_ref[0].reshape(HW, 1)
        out = y[:, :Cout] * m + y[:, Cout:]                  # (HW, Cout) f32

        a_out_ref[0] = out[:, :c].reshape(H, W, c).astype(a_out_ref.dtype)
        b_out_ref[0] = out[:, c:].reshape(H, W, c).astype(b_out_ref.dtype)

    return kernel


def fused_conv_call(cat_in, mask, w_cat, b_cat, kernel_size, pad, out_ch):
    N, H, W, Ccat = cat_in.shape
    c = out_ch // 2

    def full(a):
        return pl.BlockSpec(a.shape, lambda n: (0,) * a.ndim)

    kern = _make_conv_fused_kernel(kernel_size, kernel_size, pad)
    return pl.pallas_call(
        kern,
        out_shape=(jax.ShapeDtypeStruct((N, H, W, c), jnp.bfloat16),
                   jax.ShapeDtypeStruct((N, H, W, c), jnp.bfloat16)),
        grid=(N,),
        in_specs=[
            pl.BlockSpec((1, H, W, Ccat), lambda n: (n, 0, 0, 0)),
            pl.BlockSpec((1, H, W, 1), lambda n: (n, 0, 0, 0)),
            full(w_cat), full(b_cat),
        ],
        out_specs=(pl.BlockSpec((1, H, W, c), lambda n: (n, 0, 0, 0)),
                   pl.BlockSpec((1, H, W, c), lambda n: (n, 0, 0, 0))),
        scratch_shapes=[
            pltpu.VMEM((H + 2 * pad, W + 2 * pad, Ccat), jnp.bfloat16),
        ],
        compiler_params=pltpu.CompilerParams(
            dimension_semantics=("parallel",),
            vmem_limit_bytes=_VMEM_LIMIT),
    )(cat_in, mask, w_cat, b_cat)


# ----------------------------------------------------------------------------
# Kernel 2: ConvGRU_Up, whole time loop.  grid=(T,) iterates sequentially on
# one TensorCore; hidden state h lives in a VMEM scratch across grid steps.
# conv(cat(x, h)) split into conv_x(x) + conv_h(h); 1x1 convs fused into the
# 3x3 matmuls (centre-tap lifted weights) -> exactly 3 matmuls per step.
# ----------------------------------------------------------------------------
def gru_kernel(x_ref, a_ref, mask_ref, r0_ref,
               wx_ref, whg_ref, whc_ref, bg_ref, bc_ref,
               o_ref, rout_ref,
               h_ref, padx_ref, padh_ref):
    t = pl.program_id(0)
    _, H, W, c = x_ref.shape
    c2 = 2 * c
    HW = H * W

    @pl.when(t == 0)
    def _():
        h_ref[...] = r0_ref[0]
        # Zero pad scratches once; halo stays zero for the whole serial loop.
        padx_ref[...] = jnp.zeros_like(padx_ref)
        padh_ref[...] = jnp.zeros_like(padh_ref)

    x_bf = x_ref[0]                                   # (H, W, c) bf16
    h = h_ref[...]                                    # (H, W, c) f32
    h2d = h.reshape(HW, c)
    m = mask_ref[0].reshape(HW, 1)                    # f32

    # Interior writes of the padded slabs (one per tensor, not per tap).
    padx_ref[1:1 + H, 1:1 + W, :] = x_bf
    padh_ref[1:1 + H, 1:1 + W, :] = h.astype(jnp.bfloat16)

    def im2col(pref):
        taps = []
        for kh in range(3):
            for kw in range(3):
                taps.append(pref[kh:kh + H, kw:kw + W, :].reshape(HW, c))
        return jnp.concatenate(taps, axis=-1)          # (HW, 9c) bf16

    colx = im2col(padx_ref)
    colh = im2col(padh_ref)

    # x-side: gate3x3(2c) | gate1x1(2c) | cand3x3(c) | cand1x1(c)  -> (HW, 6c)
    gx_all = jnp.dot(colx, wx_ref[...], preferred_element_type=jnp.float32)
    # h-side gate: gate3x3(2c) | gate1x1(2c)                       -> (HW, 4c)
    gh_all = jnp.dot(colh, whg_ref[...], preferred_element_type=jnp.float32)

    gates = jax.nn.sigmoid(gx_all[:, :2 * c2] + gh_all + bg_ref[...])  # (HW,4c)
    r = gates[:, :c] * m + gates[:, c2:c2 + c]
    z = gates[:, c:c2] * m + gates[:, c2 + c:2 * c2]

    # candidate on cat([x, r*h]): x-side already in gx_all, rebuild only the
    # h-side slab with r*h (reusing the padh buffer, halo stays zero).
    rh = r * h2d                                              # (HW, c) f32
    padh_ref[1:1 + H, 1:1 + W, :] = rh.astype(jnp.bfloat16).reshape(H, W, c)
    colrh = im2col(padh_ref)

    # (r*h)-side candidate: cand3x3(c) | cand1x1(c)            -> (HW, 2c)
    ch_all = jnp.dot(colrh, whc_ref[...], preferred_element_type=jnp.float32)
    cand = jnp.tanh(gx_all[:, 2 * c2:] + ch_all + bc_ref[...])
    ccm = cand[:, :c] * m + cand[:, c:]

    h_new = (1.0 - z) * h2d + z * ccm                          # (HW, c) f32
    h_ref[...] = h_new.reshape(H, W, c)

    # Full output block = concat([a, h_new]) in bf16 (halved writeback bytes).
    o_full = jnp.concatenate(
        [a_ref[0].reshape(HW, c), h_new.astype(jnp.bfloat16)], axis=1)
    o_ref[0] = o_full.reshape(H, W, c2)

    # Resident output block: residency guaranteed by the constant out-spec;
    # write only on the last step (T axis is "arbitrary", never core-split).
    @pl.when(t == pl.num_programs(0) - 1)
    def _():
        rout_ref[0] = h_new.reshape(H, W, c)


def gru_call(b_seq, a_seq, mask, r0, gp):
    T, H, W, c = b_seq.shape
    c2 = 2 * c

    def full(a):
        return pl.BlockSpec(a.shape, lambda t: (0,) * a.ndim)

    o, r_out = pl.pallas_call(
        gru_kernel,
        out_shape=(jax.ShapeDtypeStruct((T, H, W, c2), jnp.bfloat16),
                   jax.ShapeDtypeStruct((1, H, W, c), jnp.float32)),
        grid=(T,),
        in_specs=[
            pl.BlockSpec((1, H, W, c), lambda t: (t, 0, 0, 0)),
            pl.BlockSpec((1, H, W, c), lambda t: (t, 0, 0, 0)),
            pl.BlockSpec((1, H, W, 1), lambda t: (t, 0, 0, 0)),
            full(r0),
            full(gp["wx"]), full(gp["whg"]), full(gp["whc"]),
            full(gp["bg"]), full(gp["bc"]),
        ],
        out_specs=(pl.BlockSpec((1, H, W, c2), lambda t: (t, 0, 0, 0)),
                   pl.BlockSpec((1, H, W, c), lambda t: (0, 0, 0, 0))),
        scratch_shapes=[
            pltpu.VMEM((H, W, c), jnp.float32),              # hidden state h
            pltpu.VMEM((H + 2, W + 2, c), jnp.bfloat16),     # padded x
            pltpu.VMEM((H + 2, W + 2, c), jnp.bfloat16),     # padded h / r*h
        ],
        compiler_params=pltpu.CompilerParams(
            dimension_semantics=("arbitrary",),
            vmem_limit_bytes=_VMEM_LIMIT),
    )(b_seq, a_seq, mask, r0,
      gp["wx"], gp["whg"], gp["whc"], gp["bg"], gp["bc"])
    return o, r_out


# ----------------------------------------------------------------------------
# Glue: bilinear resize matching PyTorch align_corners=False semantics.
# ----------------------------------------------------------------------------
def _bilinear_resize_nhwc(x, hout, wout):
    n, hin, win, cch = x.shape

    def grid1d(out_size, in_size):
        scale = in_size / out_size
        o = jnp.arange(out_size, dtype=jnp.float32)
        src = jnp.maximum((o + 0.5) * scale - 0.5, 0.0)
        i0 = jnp.minimum(jnp.floor(src).astype(jnp.int32), in_size - 1)
        i1 = jnp.minimum(i0 + 1, in_size - 1)
        w = src - i0.astype(jnp.float32)
        return i0, i1, w

    h0, h1, wh = grid1d(hout, hin)
    w0, w1, ww = grid1d(wout, win)
    rows = (x[:, h0] * (1.0 - wh)[None, :, None, None]
            + x[:, h1] * wh[None, :, None, None])
    out = (rows[:, :, w0] * (1.0 - ww)[None, None, :, None]
           + rows[:, :, w1] * ww[None, None, :, None])
    return out


# ----------------------------------------------------------------------------
# UpsamplingBlock forward (time-series branch, x.ndim == 5).
# ----------------------------------------------------------------------------
def upsampling_block_forward(x, f, s, r, inc_mask, params):
    B, T, _, H, W = s.shape
    assert B == 1, "reference inc_mask broadcasting requires B == 1"
    out_ch = params["out_channels"]
    c = out_ch // 2

    def to_nhwc(a):
        Bs, Ts, C, h, w = a.shape
        return jnp.transpose(a.reshape(Bs * Ts, C, h, w), (0, 2, 3, 1))

    x_n, f_n, s_n = to_nhwc(x), to_nhwc(f), to_nhwc(s)

    # Upsample x by 2 (bilinear, align_corners=False), crop to skip spatial size.
    x_up = _bilinear_resize_nhwc(
        x_n, 2 * x_n.shape[1], 2 * x_n.shape[2])[:, :H, :W, :]

    # Pre-concat the conv input once in the wrapper (one wide interior write
    # in kernel 1 instead of three lane-offset masked writes).
    cat_in = jnp.concatenate([x_up, f_n, s_n], axis=-1).astype(jnp.bfloat16)

    # inc_mask (T,1,Hm,Wm) -> (T,H,W,1), bilinear align_corners=False.
    m = jnp.transpose(inc_mask, (0, 2, 3, 1))
    m = _bilinear_resize_nhwc(m, H, W)

    a_seq, b_seq = fused_conv_call(cat_in, m, params["w_cat"], params["b_cat"],
                                   params["kernel_size"], params["padding"],
                                   out_ch)                 # (B*T,H,W,c) bf16 x2

    if r is None:
        r0 = jnp.zeros((1, H, W, c), jnp.float32)
    else:
        r0 = jnp.transpose(r, (0, 2, 3, 1)).astype(jnp.float32)

    o, r_out = gru_call(b_seq, a_seq, m, r0, params)   # (T,H,W,2c) bf16, f32

    x_out = jnp.transpose(o.astype(jnp.float32),
                          (0, 3, 1, 2)).reshape(B, T, out_ch, H, W)
    r_out = jnp.transpose(r_out, (0, 3, 1, 2))          # (B, c, H, W)
    return x_out, r_out


# ----------------------------------------------------------------------------
# Deterministic synthetic parameters + ahead-of-time kernel-form preparation.
# ----------------------------------------------------------------------------
def init_params(key, in_channels, skip_channels, src_channels, out_channels,
                kernel_size=3, padding=1):
    ccat = in_channels + skip_channels + src_channels
    c = out_channels // 2
    ks = jax.random.split(key, 16)

    def w(k, shape, fan_in):
        return jax.random.normal(k, shape, jnp.float32) / jnp.sqrt(float(fan_in))

    eps = 1e-5
    inv = 1.0 / jnp.sqrt(1.0 + eps)  # running_var = 1, running_mean = 0
    g3 = 1.0 + 0.1 * jax.random.normal(ks[8], (1, out_channels), jnp.float32)
    be3 = 0.1 * jax.random.normal(ks[9], (1, out_channels), jnp.float32)
    g1 = 1.0 + 0.1 * jax.random.normal(ks[10], (1, out_channels), jnp.float32)
    be1 = 0.1 * jax.random.normal(ks[11], (1, out_channels), jnp.float32)

    return dict(
        kernel_size=kernel_size, padding=padding,
        w3=w(ks[0], (kernel_size, kernel_size, ccat, out_channels),
             ccat * kernel_size * kernel_size),
        s3=g3 * inv, b3=be3,
        w1=w(ks[1], (ccat, out_channels), ccat),
        s1=g1 * inv, b1=be1,
        w_ih=w(ks[2], (3, 3, 2 * c, 2 * c), 2 * c * 9),
        b_ih=0.1 * jax.random.normal(ks[3], (1, 2 * c), jnp.float32),
        w_ih1=w(ks[4], (2 * c, 2 * c), 2 * c),
        b_ih1=0.1 * jax.random.normal(ks[5], (1, 2 * c), jnp.float32),
        w_hh=w(ks[6], (3, 3, 2 * c, c), 2 * c * 9),
        b_hh=0.1 * jax.random.normal(ks[7], (1, c), jnp.float32),
        w_hh1=w(ks[12], (2 * c, c), 2 * c),
        b_hh1=0.1 * jax.random.normal(ks[13], (1, c), jnp.float32),
    )


def prepare_params(p):
    """Fold BN into conv weights, lift ALL 1x1 convs into the centre-tap rows
    of the corresponding 3x3 im2col weight matrices, concat along N so each
    stage is a single matmul; cast matmul weights to bf16 (biases stay f32)."""
    K, pad = p["kernel_size"], p["padding"]
    assert 2 * pad == K - 1, "fused conv kernel assumes 'same' convolution"

    # ---- kernel 1 weights -------------------------------------------------
    w3 = p["w3"] * p["s3"]                           # fold BN scale (eval mode)
    _, _, Ccat, Cout = w3.shape
    w3_2d = w3.reshape(K * K * Ccat, Cout)
    w1 = p["w1"] * p["s1"]                           # (Ccat, Cout), BN folded
    center = (pad * K + pad) * Ccat                  # centre-tap row offset
    w1_lift = jnp.zeros((K * K * Ccat, Cout), jnp.float32)
    w1_lift = w1_lift.at[center:center + Ccat].set(w1)
    w_cat = jnp.concatenate([w3_2d, w1_lift], axis=1).astype(jnp.bfloat16)
    b_cat = jnp.concatenate([p["b3"], p["b1"]], axis=1)        # (1, 2*Cout) f32

    # ---- GRU weights (x / h split, 1x1 lifted into centre tap) ------------
    c = Cout // 2
    w_ih, w_hh = p["w_ih"], p["w_hh"]                # (3,3,2c,2c) / (3,3,2c,c)
    ctr = (1 * 3 + 1) * c                            # centre tap row offset

    def lift1(w1x):                                  # (c, n) -> (9c, n)
        out = jnp.zeros((9 * c, w1x.shape[1]), jnp.float32)
        return out.at[ctr:ctr + c].set(w1x)

    # x-side: [gate3x3 (2c) | gate1x1 (2c) | cand3x3 (c) | cand1x1 (c)]
    wx = jnp.concatenate(
        [w_ih[:, :, :c, :].reshape(9 * c, 2 * c),
         lift1(p["w_ih1"][:c, :]),
         w_hh[:, :, :c, :].reshape(9 * c, c),
         lift1(p["w_hh1"][:c, :])], axis=1).astype(jnp.bfloat16)   # (9c, 6c)

    # h-side gate: [gate3x3 (2c) | gate1x1 (2c)]
    whg = jnp.concatenate(
        [w_ih[:, :, c:, :].reshape(9 * c, 2 * c),
         lift1(p["w_ih1"][c:, :])], axis=1).astype(jnp.bfloat16)   # (9c, 4c)

    # (r*h)-side candidate: [cand3x3 (c) | cand1x1 (c)]
    whc = jnp.concatenate(
        [w_hh[:, :, c:, :].reshape(9 * c, c),
         lift1(p["w_hh1"][c:, :])], axis=1).astype(jnp.bfloat16)   # (9c, 2c)

    bg = jnp.concatenate([p["b_ih"], p["b_ih1"]], axis=1)          # (1, 4c)
    bc = jnp.concatenate([p["b_hh"], p["b_hh1"]], axis=1)          # (1, 2c)

    return dict(
        kernel_size=K, padding=pad, out_channels=Cout,
        w_cat=w_cat, b_cat=b_cat,
        wx=wx, whg=whg, whc=whc, bg=bg, bc=bc)


if __name__ == "__main__":
    key = jax.random.PRNGKey(0)
    k_in, k_par = jax.random.split(key)

    B, T = 1, 2
    in_channels, skip_channels, src_channels, out_channels = 4, 4, 4, 8
    H, W = 16, 16
    Hs, Ws = H // 2, W // 2

    kx, kf, ksrc, km = jax.random.split(k_in, 4)
    x = jax.random.normal(kx, (B, T, in_channels, Hs, Ws), jnp.float32)
    f = jax.random.normal(kf, (B, T, skip_channels, H, W), jnp.float32)
    s = jax.random.normal(ksrc, (B, T, src_channels, H, W), jnp.float32)
    inc_mask = jax.nn.sigmoid(
        jax.random.normal(km, (T, 1, Hs, Ws), jnp.float32))

    raw = init_params(k_par, in_channels, skip_channels, src_channels,
                      out_channels, kernel_size=3, padding=1)
    params = prepare_params(raw)

    x_out, r_out = upsampling_block_forward(x, f, s, None, inc_mask, params)
    jax.block_until_ready((x_out, r_out))

    assert x_out.shape == (B, T, out_channels, H, W)
    assert r_out.shape == (B, out_channels // 2, H, W)
    print("KERNEL_OK")
</pallas_src>

<mosaic_0001>
module attributes {stable_mosaic.version = 11 : i64} {
  func.func @kernel(%arg0: i32, %arg1: memref<1x16x16x12xbf16, #tpu.memory_space<vmem>>, %arg2: memref<1x16x16x1xf32, #tpu.memory_space<vmem>>, %arg3: memref<108x16xbf16, #tpu.memory_space<vmem>>, %arg4: memref<1x16xf32, #tpu.memory_space<vmem>>, %arg5: memref<1x16x16x4xbf16, #tpu.memory_space<vmem>>, %arg6: memref<1x16x16x4xbf16, #tpu.memory_space<vmem>>, %arg7: memref<18x18x12xbf16, #tpu.memory_space<vmem>>) attributes {dimension_semantics = [#tpu.dimension_semantics<parallel>], iteration_bounds = array<i64: 2>, scalar_prefetch = 0 : i64, scratch_operands = 1 : i64, tpu.core_type = #tpu.core_type<tc>, window_params = [{transform_indices = @transform_0, window_bounds = array<i64: 1, 16, 16, 12>}, {transform_indices = @transform_1, window_bounds = array<i64: 1, 16, 16, 1>}, {pipeline_mode = #tpu.pipeline_mode<synchronous>, transform_indices = @transform_2, window_bounds = array<i64: 108, 16>}, {pipeline_mode = #tpu.pipeline_mode<synchronous>, transform_indices = @transform_3, window_bounds = array<i64: 1, 16>}, {transform_indices = @transform_4, window_bounds = array<i64: 1, 16, 16, 4>}, {transform_indices = @transform_5, window_bounds = array<i64: 1, 16, 16, 4>}]} {
    %cst = arith.constant 0.000000e+00 : bf16
    %0 = vector.broadcast %cst : bf16 to vector<1x18x12xbf16>
    %cst_0 = arith.constant 0.000000e+00 : bf16
    %1 = vector.broadcast %cst_0 : bf16 to vector<18x1x12xbf16>
    %c0 = arith.constant 0 : index
    %c0_1 = arith.constant 0 : index
    %c0_2 = arith.constant 0 : index
    %2 = vector.load %arg7[%c0, %c0_1, %c0_2] : memref<18x18x12xbf16, #tpu.memory_space<vmem>>, vector<1x18x12xbf16>
    tpu.vector_store %arg7[%c0, %c0_1, %c0_2], %0 {strides = array<i32>} : memref<18x18x12xbf16, #tpu.memory_space<vmem>>, vector<1x18x12xbf16>,
    %c17 = arith.constant 17 : index
    %c0_3 = arith.constant 0 : index
    %c0_4 = arith.constant 0 : index
    %3 = vector.load %arg7[%c17, %c0_3, %c0_4] : memref<18x18x12xbf16, #tpu.memory_space<vmem>>, vector<1x18x12xbf16>
    tpu.vector_store %arg7[%c17, %c0_3, %c0_4], %0 {strides = array<i32>} : memref<18x18x12xbf16, #tpu.memory_space<vmem>>, vector<1x18x12xbf16>,
    %c0_5 = arith.constant 0 : index
    %c0_6 = arith.constant 0 : index
    %c0_7 = arith.constant 0 : index
    %4 = vector.load %arg7[%c0_5, %c0_6, %c0_7] : memref<18x18x12xbf16, #tpu.memory_space<vmem>>, vector<18x1x12xbf16>
    tpu.vector_store %arg7[%c0_5, %c0_6, %c0_7], %1 {strides = array<i32>} : memref<18x18x12xbf16, #tpu.memory_space<vmem>>, vector<18x1x12xbf16>,
    %c0_8 = arith.constant 0 : index
    %c17_9 = arith.constant 17 : index
    %c0_10 = arith.constant 0 : index
    %5 = vector.load %arg7[%c0_8, %c17_9, %c0_10] : memref<18x18x12xbf16, #tpu.memory_space<vmem>>, vector<18x1x12xbf16>
    tpu.vector_store %arg7[%c0_8, %c17_9, %c0_10], %1 {strides = array<i32>} : memref<18x18x12xbf16, #tpu.memory_space<vmem>>, vector<18x1x12xbf16>,
    %c0_11 = arith.constant 0 : index
    %c0_12 = arith.constant 0 : index
    %c0_13 = arith.constant 0 : index
    %c0_14 = arith.constant 0 : index
    %6 = vector.load %arg1[%c0_11, %c0_12, %c0_13, %c0_14] : memref<1x16x16x12xbf16, #tpu.memory_space<vmem>>, vector<1x16x16x12xbf16>
    %7 = vector.shape_cast %6 : vector<1x16x16x12xbf16> to vector<16x16x12xbf16>
    %c1 = arith.constant 1 : index
    %c1_15 = arith.constant 1 : index
    %c0_16 = arith.constant 0 : index
    %8 = vector.load %arg7[%c1, %c1_15, %c0_16] : memref<18x18x12xbf16, #tpu.memory_space<vmem>>, vector<16x16x12xbf16>
    tpu.vector_store %arg7[%c1, %c1_15, %c0_16], %7 {strides = array<i32>} : memref<18x18x12xbf16, #tpu.memory_space<vmem>>, vector<16x16x12xbf16>,
    %c0_17 = arith.constant 0 : index
    %c0_18 = arith.constant 0 : index
    %c0_19 = arith.constant 0 : index
    %9 = vector.load %arg7[%c0_17, %c0_18, %c0_19] : memref<18x18x12xbf16, #tpu.memory_space<vmem>>, vector<16x16x12xbf16>
    %10 = vector.shape_cast %9 : vector<16x16x12xbf16> to vector<256x12xbf16>
    %c0_20 = arith.constant 0 : index
    %c1_21 = arith.constant 1 : index
    %c0_22 = arith.constant 0 : index
    %11 = vector.load %arg7[%c0_20, %c1_21, %c0_22] : memref<18x18x12xbf16, #tpu.memory_space<vmem>>, vector<16x16x12xbf16>
    %12 = vector.shape_cast %11 : vector<16x16x12xbf16> to vector<256x12xbf16>
    %c0_23 = arith.constant 0 : index
    %c2 = arith.constant 2 : index
    %c0_24 = arith.constant 0 : index
    %13 = vector.load %arg7[%c0_23, %c2, %c0_24] : memref<18x18x12xbf16, #tpu.memory_space<vmem>>, vector<16x16x12xbf16>
    %14 = vector.shape_cast %13 : vector<16x16x12xbf16> to vector<256x12xbf16>
    %c1_25 = arith.constant 1 : index
    %c0_26 = arith.constant 0 : index
    %c0_27 = arith.constant 0 : index
    %15 = vector.load %arg7[%c1_25, %c0_26, %c0_27] : memref<18x18x12xbf16, #tpu.memory_space<vmem>>, vector<16x16x12xbf16>
    %16 = vector.shape_cast %15 : vector<16x16x12xbf16> to vector<256x12xbf16>
    %c1_28 = arith.constant 1 : index
    %c1_29 = arith.constant 1 : index
    %c0_30 = arith.constant 0 : index
    %17 = vector.load %arg7[%c1_28, %c1_29, %c0_30] : memref<18x18x12xbf16, #tpu.memory_space<vmem>>, vector<16x16x12xbf16>
    %18 = vector.shape_cast %17 : vector<16x16x12xbf16> to vector<256x12xbf16>
    %c1_31 = arith.constant 1 : index
    %c2_32 = arith.constant 2 : index
    %c0_33 = arith.constant 0 : index
    %19 = vector.load %arg7[%c1_31, %c2_32, %c0_33] : memref<18x18x12xbf16, #tpu.memory_space<vmem>>, vector<16x16x12xbf16>
    %20 = vector.shape_cast %19 : vector<16x16x12xbf16> to vector<256x12xbf16>
    %c2_34 = arith.constant 2 : index
    %c0_35 = arith.constant 0 : index
    %c0_36 = arith.constant 0 : index
    %21 = vector.load %arg7[%c2_34, %c0_35, %c0_36] : memref<18x18x12xbf16, #tpu.memory_space<vmem>>, vector<16x16x12xbf16>
    %22 = vector.shape_cast %21 : vector<16x16x12xbf16> to vector<256x12xbf16>
    %c2_37 = arith.constant 2 : index
    %c1_38 = arith.constant 1 : index
    %c0_39 = arith.constant 0 : index
    %23 = vector.load %arg7[%c2_37, %c1_38, %c0_39] : memref<18x18x12xbf16, #tpu.memory_space<vmem>>, vector<16x16x12xbf16>
    %24 = vector.shape_cast %23 : vector<16x16x12xbf16> to vector<256x12xbf16>
    %c2_40 = arith.constant 2 : index
    %c2_41 = arith.constant 2 : index
    %c0_42 = arith.constant 0 : index
    %25 = vector.load %arg7[%c2_40, %c2_41, %c0_42] : memref<18x18x12xbf16, #tpu.memory_space<vmem>>, vector<16x16x12xbf16>
    %26 = vector.shape_cast %25 : vector<16x16x12xbf16> to vector<256x12xbf16>
    %27 = tpu.concatenate %10, %12, %14, %16, %18, %20, %22, %24, %26 in 1 : vector<256x12xbf16>, vector<256x12xbf16>, vector<256x12xbf16>, vector<256x12xbf16>, vector<256x12xbf16>, vector<256x12xbf16>, vector<256x12xbf16>, vector<256x12xbf16>, vector<256x12xbf16> -> vector<256x108xbf16>
    %c0_43 = arith.constant 0 : index
    %c0_44 = arith.constant 0 : index
    %28 = vector.load %arg3[%c0_43, %c0_44] : memref<108x16xbf16, #tpu.memory_space<vmem>>, vector<108x16xbf16>
    %cst_45 = arith.constant dense<0.000000e+00> : vector<256x16xf32>
    %29 = tpu.matmul %27, %28, %cst_45 {dimension_numbers = #tpu.dot_dimension_numbers<[1], [0], [0], [1], [0, 0, 1, 1], [], []>} : vector<256x108xbf16>, vector<108x16xbf16>, vector<256x16xf32> -> vector<256x16xf32>
    %c0_46 = arith.constant 0 : index
    %c0_47 = arith.constant 0 : index
    %30 = vector.load %arg4[%c0_46, %c0_47] : memref<1x16xf32, #tpu.memory_space<vmem>>, vector<1x16xf32>
    %31 = vector.broadcast %30 : vector<1x16xf32> to vector<256x16xf32>
    %32 = arith.addf %29, %31 : vector<256x16xf32>
    %cst_48 = arith.constant 0.000000e+00 : f32
    %33 = vector.broadcast %cst_48 : f32 to vector<256x16xf32>
    %34 = arith.maximumf %32, %33 : vector<256x16xf32>
    %c0_49 = arith.constant 0 : index
    %c0_50 = arith.constant 0 : index
    %c0_51 = arith.constant 0 : index
    %c0_52 = arith.constant 0 : index
    %35 = vector.load %arg2[%c0_49, %c0_50, %c0_51, %c0_52] : memref<1x16x16x1xf32, #tpu.memory_space<vmem>>, vector<1x16x16x1xf32>
    %36 = vector.shape_cast %35 : vector<1x16x16x1xf32> to vector<16x16x1xf32>
    %37 = vector.shape_cast %36 : vector<16x16x1xf32> to vector<256x1xf32>
    %38 = vector.extract_strided_slice %34 {offsets = [0, 0], sizes = [256, 8], strides = [1, 1]} : vector<256x16xf32> to vector<256x8xf32>
    %39 = vector.broadcast %37 : vector<256x1xf32> to vector<256x8xf32>
    %40 = arith.mulf %38, %39 : vector<256x8xf32>
    %41 = vector.extract_strided_slice %34 {offsets = [0, 8], sizes = [256, 8], strides = [1, 1]} : vector<256x16xf32> to vector<256x8xf32>
    %42 = arith.addf %40, %41 : vector<256x8xf32>
    %43 = vector.extract_strided_slice %42 {offsets = [0, 0], sizes = [256, 4], strides = [1, 1]} : vector<256x8xf32> to vector<256x4xf32>
    %44 = vector.shape_cast %43 : vector<256x4xf32> to vector<16x16x4xf32>
    %45 = arith.truncf %44 : vector<16x16x4xf32> to vector<16x16x4xbf16>
    %c0_53 = arith.constant 0 : index
    %c0_54 = arith.constant 0 : index
    %c0_55 = arith.constant 0 : index
    %c0_56 = arith.constant 0 : index
    %46 = vector.load %arg5[%c0_53, %c0_54, %c0_55, %c0_56] : memref<1x16x16x4xbf16, #tpu.memory_space<vmem>>, vector<1x16x16x4xbf16>
    %47 = vector.shape_cast %46 : vector<1x16x16x4xbf16> to vector<16x16x4xbf16>
    %48 = vector.shape_cast %45 : vector<16x16x4xbf16> to vector<1x16x16x4xbf16>
    tpu.vector_store %arg5[%c0_53, %c0_54, %c0_55, %c0_56], %48 {strides = array<i32>} : memref<1x16x16x4xbf16, #tpu.memory_space<vmem>>, vector<1x16x16x4xbf16>,
    %49 = vector.extract_strided_slice %42 {offsets = [0, 4], sizes = [256, 4], strides = [1, 1]} : vector<256x8xf32> to vector<256x4xf32>
    %50 = vector.shape_cast %49 : vector<256x4xf32> to vector<16x16x4xf32>
    %51 = arith.truncf %50 : vector<16x16x4xf32> to vector<16x16x4xbf16>
    %c0_57 = arith.constant 0 : index
    %c0_58 = arith.constant 0 : index
    %c0_59 = arith.constant 0 : index
    %c0_60 = arith.constant 0 : index
    %52 = vector.load %arg6[%c0_57, %c0_58, %c0_59, %c0_60] : memref<1x16x16x4xbf16, #tpu.memory_space<vmem>>, vector<1x16x16x4xbf16>
    %53 = vector.shape_cast %52 : vector<1x16x16x4xbf16> to vector<16x16x4xbf16>
    %54 = vector.shape_cast %51 : vector<16x16x4xbf16> to vector<1x16x16x4xbf16>
    tpu.vector_store %arg6[%c0_57, %c0_58, %c0_59, %c0_60], %54 {strides = array<i32>} : memref<1x16x16x4xbf16, #tpu.memory_space<vmem>>, vector<1x16x16x4xbf16>,
    return
  }
  func.func @transform_0(%arg0: i32) -> (i32, i32, i32, i32) {
    %c0_i32 = arith.constant 0 : i32
    %c0_i32_0 = arith.constant 0 : i32
    %c0_i32_1 = arith.constant 0 : i32
    %c0_i32_2 = arith.constant 0 : i32
    return %arg0, %c0_i32, %c0_i32_0, %c0_i32_1 : i32, i32, i32, i32
  }
  func.func @transform_1(%arg0: i32) -> (i32, i32, i32, i32) {
    %c0_i32 = arith.constant 0 : i32
    %c0_i32_0 = arith.constant 0 : i32
    %c0_i32_1 = arith.constant 0 : i32
    %c0_i32_2 = arith.constant 0 : i32
    return %arg0, %c0_i32, %c0_i32_0, %c0_i32_1 : i32, i32, i32, i32
  }
  func.func @transform_2(%arg0: i32) -> (i32, i32) {
    %c0_i32 = arith.constant 0 : i32
    %c0_i32_0 = arith.constant 0 : i32
    %c0_i32_1 = arith.constant 0 : i32
    return %c0_i32, %c0_i32_0 : i32, i32
  }
  func.func @transform_3(%arg0: i32) -> (i32, i32) {
    %c0_i32 = arith.constant 0 : i32
    %c0_i32_0 = arith.constant 0 : i32
    %c0_i32_1 = arith.constant 0 : i32
    return %c0_i32, %c0_i32_0 : i32, i32
  }
  func.func @transform_4(%arg0: i32) -> (i32, i32, i32, i32) {
    %c0_i32 = arith.constant 0 : i32
    %c0_i32_0 = arith.constant 0 : i32
    %c0_i32_1 = arith.constant 0 : i32
    %c0_i32_2 = arith.constant 0 : i32
    return %arg0, %c0_i32, %c0_i32_0, %c0_i32_1 : i32, i32, i32, i32
  }
  func.func @transform_5(%arg0: i32) -> (i32, i32, i32, i32) {
    %c0_i32 = arith.constant 0 : i32
    %c0_i32_0 = arith.constant 0 : i32
    %c0_i32_1 = arith.constant 0 : i32
    %c0_i32_2 = arith.constant 0 : i32
    return %arg0, %c0_i32, %c0_i32_0, %c0_i32_1 : i32, i32, i32, i32
  }
}

</mosaic_0001>

<bundles_post_ra>
// kernel: tpu_custom_call.1
= control target key start
LH: loop header
LB: loop body
LE: loop exit
PB: predicated region body
PF: predicated region fallthrough
CT: control target
= control target key end

     0   :  { %s5295_s18 = smov 0   ;;  %s7859_s0 = inlined_call_operand.vmem [shape: bf16[2,16,16,12], index: 0, kind: input, shape index: {}]   ;;  %s7860_s1 = inlined_call_operand.vmem [shape: f32[2,16,16,1], index: 1, kind: input, shape index: {}]   ;;  %s7861_s2 = inlined_call_operand.vmem [shape: bf16[108,16], index: 2, kind: input, shape index: {}]   ;;  %s7862_s3 = inlined_call_operand.vmem [shape: f32[1,16], index: 3, kind: input, shape index: {}]   ;;  %s7863_s4 = inlined_call_operand.vmem [shape: bf16[2,16,16,4], index: 4, kind: output, shape index: {0}]   ;;  %s7864_s5 = inlined_call_operand.vmem [shape: bf16[2,16,16,4], index: 5, kind: output, shape index: {1}]  }
   0x1 LB: > { %s4762_s19 = sadd.s32 4294967295, %s5252_s18   ;;  %p4766_p0 = scmp.ge.s32.totalorder %s5252_s18, 1  ;;  %s5252_s18 = sphi %s5295_s18, %s16_s18  }
   0x2   : > { %p200_p1 = scmp.lt.s32.totalorder %s5252_s18, 3 }
   0x4   : > { %p201_p2 = pnand %p4766_p0, %p200_p1 }
   0x6   : > { %204 = sbr.rel (%p201_p2) target bundleno = 1004 (0x3ec), region = 36 }
   0xd   : > { %vm259_vm0 = vcmask 93184   ;;  %vm262_vm1 = vcmask 90112   ;;  %vm269_vm2 = vsmask.f32 256  ;;  %v5254_v0 = vmov 0   ;;  %p238_p3 = scmp.lt.s32.totalorder %s4762_s19, 1 }
   0xe   : > { %260 = vst.msk [vmem:[#allocation2] sm:$0xf] %vm259_vm0, %v5254_v0  ;;  %261 = vst.msk [vmem:[#allocation2 + $0x4] sm:$0xf] %vm259_vm0, %v5254_v0  ;;  %vm325_vm4 = vsmask.f32 7938  ;;  %5166 = vset.pattern.permute.xlu1 %v5254_v0  ;;  %5165 = vset.pattern.permute.xlu0 %v5254_v0 }
   0xf   : > { %263 = vst.msk [vmem:[#allocation2 + $0x8] sm:$0x1] %vm262_vm1, %v5254_v0  ;;  %vm5306_vm3 = vmand %vm262_vm1, %vm269_vm2  ;;  %v7893_v2 = vmov 0  ;;  %v274_v3 = vld [vmem:[#allocation2 + $0xc] sm:$0x1]  ;;  %s7983_s19 = smov (!%p238_p3, %s4762_s19), 1 }
  0x10   : > { %265 = vst.msk [vmem:[#allocation2 + $0xcc] sm:$0xf] %vm259_vm0, %v5254_v0  ;;  %266 = vst.msk [vmem:[#allocation2 + $0xd0] sm:$0xf] %vm259_vm0, %v5254_v0  ;;  %v275_v4 = vsel %vm5306_vm3, 0, %v274_v3  ;;  %s5328_s20 = sshll.u32 %s7983_s19, 7 }
  0x11   : > { %267 = vst.msk [vmem:[#allocation2 + $0xd4] sm:$0x1] %vm262_vm1, %v5254_v0  ;;  %vm5313_vm5 = vmand %vm262_vm1, %vm325_vm4  ;;  %v330_v5 = vld [vmem:[#allocation2 + $0x14] sm:$0x1]  ;;  %v277_v7 = vld [vmem:[#allocation2 + $0x18] sm:$0x1]  ;;  %s5338_s23 = scalar_lea.vmem %s7859_s0, %s5328_s20  ;;  %s7526_s7 = scalar_lea.vmem %s7863_s4, %s5328_s20 }
  0x12   : > { %v7894_v2 = vsel %vm5313_vm5, 4294967295, %v7893_v2  ;;  %276 = vst [vmem:[#allocation2 + $0xc] sm:$0x1] %v275_v4  ;;  %v331_v6 = vsel %vm5313_vm5, 0, %v330_v5  ;;  %v333_v8 = vld [vmem:[#allocation2 + $0x20] sm:$0x1]  ;;  %vm5364_vm12 = vmand %vm259_vm0, %vm325_vm4  ;;  %s7780_s11 = scalar_lea.vmem %s7864_s5, %s5328_s20 }
  0x13   : > { %7895 = vst [vmem:[#allocation3_spill] sm:$0xff] %v7894_v2  ;;  %332 = vst [vmem:[#allocation2 + $0x14] sm:$0x1] %v331_v6  ;;  %v278_v9 = vsel %vm5306_vm3, 0, %v277_v7  ;;  %v334_v10 = vsel %vm5313_vm5, 0, %v333_v8  ;;  %vm1349_vm6 = vcmask 1042432  }
  0x14   : > { %v280_v11 = vld [vmem:[#allocation2 + $0x24] sm:$0x1]  ;;  %v336_v12 = vld [vmem:[#allocation2 + $0x2c] sm:$0x1]  ;;  %279 = vst [vmem:[#allocation2 + $0x18] sm:$0x1] %v278_v9 }
  0x15   : > { %335 = vst [vmem:[#allocation2 + $0x20] sm:$0x1] %v334_v10  ;;  %v281_v13 = vsel %vm5306_vm3, 0, %v280_v11  ;;  %v337_v14 = vsel %vm5313_vm5, 0, %v336_v12  ;;  %v283_v15 = vld [vmem:[#allocation2 + $0x30] sm:$0x1] }
  0x16   : > { %vm1350_vm7 = vcmask 1046532   ;;  %282 = vst [vmem:[#allocation2 + $0x24] sm:$0x1] %v281_v13  ;;  %338 = vst [vmem:[#allocation2 + $0x2c] sm:$0x1] %v337_v14  ;;  %v284_v16 = vsel %vm5306_vm3, 0, %v283_v15 }
  0x17   : > { %v327_v17 = vld [vmem:[#allocation2 + $0x8] sm:$0x1]  ;;  %v851_v18 = vld [vmem:[#allocation2 + $0x4] sm:$0xf]  ;;  %v1285_v19 = vld [vmem:[#allocation2] sm:$0xe] }
  0x18   : > { %285 = vst [vmem:[#allocation2 + $0x30] sm:$0x1] %v284_v16  ;;  %v339_v20 = vld [vmem:[#allocation2 + $0x38] sm:$0x1]  ;;  %v328_v21 = vsel %vm5313_vm5, 0, %v327_v17  ;;  %v4775_v22 = vrot.slane %v1285_v19, 9  ;;  %vm5346_vm8 = vmor %vm1349_vm6, %vm1350_vm7 }
  0x19   : > { %v1354_v23 = vrot.slane %v851_v18, 5  ;;  %v271_v24 = vld [vmem:[#allocation2] sm:$0x1]  ;;  %v911_v25 = vshll.u32 %v851_v18, 16  ;;  %329 = vst [vmem:[#allocation2 + $0x8] sm:$0x1] %v328_v21 }
  0x1a   : > { %v272_v27 = vsel %vm5306_vm3, 0, %v271_v24  ;;  %v915_v28 = vshrl.u32 %v851_v18, 16  ;;  %v381_v29 = vld [vmem:[%s5338_s23] sm:$0xf]  ;;  %v382_v30 = vld [vmem:[%s5338_s23 + $0x4] sm:$0xf] }
  0x1b   : > { %273 = vst [vmem:[#allocation2] sm:$0x1] %v272_v27  ;;  %vm898_vm9 = vsmask.f32 3328  ;;  %vm899_vm10 = vsmask.f32 7440  ;;  %v1355_v37 = vsel %vm5346_vm8, %v4775_v22, %v1354_v23 }
  0x1c   : > { %v5354_v31 = vrot.slane %v911_v25, 5  ;;  %vm413_vm11 = vsmask.f32 4368  ;;  %v416_v32 = vshrl.u32 %v381_v29, 16  ;;  %v917_v33 = vrot.slane %v915_v28, 4  ;;  %vm5396_vm14 = vmor %vm898_vm9, %vm899_vm10  ;;  %s5255_s24 = smov 24  }
  0x1d   : > { %v419_v34 = vshll.u32 %v381_v29, 16  ;;  %v424_v35 = vshrl.u32 %v382_v30, 16  ;;  %v427_v36 = vshll.u32 %v382_v30, 16  ;;  %v383_v39 = vld [vmem:[%s5338_s23 + $0x8] sm:$0xf]  ;;  %v340_v41 = vsel %vm5313_vm5, 0, %v339_v20  ;;  %vm5371_vm13 = vmor %vm269_vm2, %vm413_vm11 }
  0x1e   : > { %v418_v38 = vrot.slane %v416_v32, 7  ;;  %v384_v40 = vld [vmem:[%s5338_s23 + $0xc] sm:$0xf]  ;;  %v7898_v42 = vmov 0  ;;  %v1356_v43 = vrot.slane %v1354_v23, 4  ;;  %v918_v44 = vor.u32 %v917_v33, %v5354_v31  ;;  %s5256_s25 = smov 12  }
  0x1f   : > { %v7899_v42 = vsel %vm5364_vm12, 4294967295, %v7898_v42  ;;  %v426_v45 = vrot.slane %v424_v35, 7  ;;  %v738_v46 = vld [vmem:[#allocation2 + $0xc] sm:$0xf]  ;;  %v433_v47 = vshrl.u32 %v383_v39, 16  ;;  %v7901_v48 = vmov 0 }
  0x20   : > { %7900 = vst [vmem:[#allocation4_spill] sm:$0xff] %v7899_v42  ;;  %341 = vst [vmem:[#allocation2 + $0x38] sm:$0x1] %v340_v41  ;;  %v7902_v48 = vsel %vm5371_vm13, 4294967295, %v7901_v48  ;;  %v421_v49 = vor.u32 %v419_v34, %v418_v38  ;;  %v422_v50 = vrot.slane %v418_v38, 4  ;;  %v436_v52 = vshll.u32 %v383_v39, 16 }
  0x21   : > { %7903 = vst [vmem:[#allocation5_spill] sm:$0xff] %v7902_v48  ;;  %v742_v51 = vld [vmem:[#allocation2 + $0x14] sm:$0x1]  ;;  %v441_v53 = vshrl.u32 %v384_v40, 16  ;;  %v429_v54 = vor.u32 %v427_v36, %v426_v45  ;;  %v431_v55 = vrot.slane %v426_v45, 4  ;;  %v435_v56 = vrot.slane %v433_v47, 7 }
  0x22   : > { %v444_v57 = vshll.u32 %v384_v40, 16  ;;  %v385_v58 = vld [vmem:[%s5338_s23 + $0x10] sm:$0xf]  ;;  %v882_v59 = vld [vmem:[#allocation2 + $0x8] sm:$0x1]  ;;  %v919_v60 = vrot.slane %v918_v44, 4  ;;  %v739_v61 = vsel %vm5364_vm12, %v421_v49, %v738_v46 }
  0x23   : > { %v443_v62 = vrot.slane %v441_v53, 7  ;;  %v450_v63 = vshrl.u32 %v385_v58, 16  ;;  %v921_v0 = vshll.u32 %v882_v59, 16  ;;  %v1357_v3 = vrot.slane %v882_v59, 5  ;;  %v850_v4 = vld [vmem:[#allocation2] sm:$0xf] }
  0x24   : > { %v430_v5 = vsel %vm5371_vm13, %v422_v50, %v429_v54  ;;  %740 = vst [vmem:[#allocation2 + $0xc] sm:$0xf] %v739_v61  ;;  %v743_v6 = vsel %vm5306_vm3, %v431_v55, %v742_v51  ;;  %v745_v7 = vld [vmem:[#allocation2 + $0x18] sm:$0xf]  ;;  %v902_v8 = vshrl.u32 %v850_v4, 16  ;;  %v905_v9 = vshll.u32 %v850_v4, 16 }
  0x25   : > { %741 = vst.msk [vmem:[#allocation2 + $0x10] sm:$0xf] %vm259_vm0, %v430_v5  ;;  %744 = vst [vmem:[#allocation2 + $0x14] sm:$0x1] %v743_v6  ;;  %v438_v10 = vor.u32 %v436_v52, %v435_v56  ;;  %v439_v11 = vrot.slane %v435_v56, 4  ;;  %v1358_v13 = vsel %vm5346_vm8, %v1356_v43, %v1357_v3  ;;  %v923_v14 = vrot.slane %v921_v0, 5 }
  0x26   : > { %v749_v12 = vld [vmem:[#allocation2 + $0x20] sm:$0x1]  ;;  %v446_v15 = vor.u32 %v444_v57, %v443_v62  ;;  %v448_v16 = vrot.slane %v443_v62, 4  ;;  %v386_v17 = vld [vmem:[%s5338_s23 + $0x14] sm:$0xf]  ;;  %v4855_v18 = vcombine.low %v1355_v37, %v1358_v13  ;;  %v904_v19 = vrot.slane %v902_v8, 4 }
  0x27   : > { %v907_v20 = vrot.slane %v905_v9, 5  ;;  %v746_v21 = vsel %vm5364_vm12, %v438_v10, %v745_v7  ;;  %v5389_v22 = vld [vmem:[%s5338_s23 + $0x18] sm:$0xf]  ;;  %v5392_v23 = vld [vmem:[%s5338_s23 + $0x1c] sm:$0xf]  ;;  %v5404_v28 = vrot.slane %v450_v63, 7  ;;  %v924_v39 = vsel %vm5396_vm14, %v919_v60, %v923_v14 }
  0x28   : > { %v447_v25 = vsel %vm5371_vm13, %v439_v11, %v446_v15  ;;  %747 = vst [vmem:[#allocation2 + $0x18] sm:$0xf] %v746_v21  ;;  %v750_v27 = vsel %vm5306_vm3, %v448_v16, %v749_v12  ;;  %2873 = vrot.lane.b32.xlu0 %v4855_v18, %s5255_s24  ;;  %v453_v30 = vshll.u32 %v385_v58, 16  ;;  %v458_v32 = vshrl.u32 %v386_v17, 16  ;;  %v752_v54 = vld [vmem:[#allocation2 + $0x24] sm:$0xf] }
  0x29   : > { %v908_v29 = vor.u32 %v907_v20, %v904_v19  ;;  %748 = vst.msk [vmem:[#allocation2 + $0x1c] sm:$0xf] %vm259_vm0, %v447_v25  ;;  %751 = vst [vmem:[#allocation2 + $0x20] sm:$0x1] %v750_v27  ;;  %v461_v33 = vshll.u32 %v386_v17, 16  ;;  %v456_v34 = vrot.slane %v5404_v28, 4 }
  0x2a   : > { %v467_v35 = vshrl.u32 %v5389_v22, 16  ;;  %v470_v36 = vshll.u32 %v5389_v22, 16  ;;  %v475_v37 = vshrl.u32 %v5392_v23, 16  ;;  %v460_v43 = vrot.slane %v458_v32, 7  ;;  %v756_v27 = vld [vmem:[#allocation2 + $0x2c] sm:$0x1] }
  0x2b   : > { %v909_v38 = vrot.slane %v908_v29, 4  ;;  %v1286_v40 = vld [vmem:[#allocation2 + $0xc] sm:$0xe]  ;;  %v455_v49 = vor.u32 %v453_v30, %v5404_v28  ;;  %s5257_s26 = smov 36   ;;  %s5258_s27 = smov 48   ;;  %vm3417_vm15 = vcmask 97280  }
  0x2c   : > { %v852_v41 = vld [vmem:[#allocation2 + $0xc] sm:$0xf]  ;;  %v853_v44 = vld [vmem:[#allocation2 + $0x10] sm:$0xf]  ;;  %v883_v45 = vld [vmem:[#allocation2 + $0x14] sm:$0x1]  ;;  %v463_v5 = vor.u32 %v461_v33, %v460_v43 }
  0x2d   : > { %v4776_v46 = vrot.slane %v1286_v40, 9  ;;  %v926_v47 = vshrl.u32 %v852_v41, 16  ;;  %v914_v50 = vsel %vm5396_vm14, %v909_v38, %v5354_v31  ;;  %v945_v51 = vshll.u32 %v883_v45, 16  ;;  %s5259_s28 = smov 60   ;;  %s5260_s6 = smov 72  }
  0x2e   : > { %v1361_v52 = vrot.slane %v853_v44, 5  ;;  %v1364_v53 = vrot.slane %v883_v45, 5  ;;  %v4839_v55 = vcombine.low %v914_v50, %v924_v39  ;;  %v929_v57 = vshll.u32 %v852_v41, 16  ;;  %s5261_s9 = smov 84   ;;  %s5262_s10 = smov 96  }
  0x2f   : > { %v928_v56 = vrot.slane %v926_v47, 4  ;;  %v935_v58 = vshll.u32 %v853_v44, 16  ;;  %v854_v61 = vld [vmem:[#allocation2 + $0x18] sm:$0xf]  ;;  %v939_v62 = vshrl.u32 %v853_v44, 16  ;;  %v947_v63 = vrot.slane %v945_v51, 5 }
  0x30   : > { %v1362_v59 = vsel %vm5346_vm8, %v4776_v46, %v1361_v52  ;;  %v1363_v60 = vrot.slane %v1361_v52, 4  ;;  %2793 = vrot.lane.b32.xlu0 %v4839_v55, %s5256_s25  ;;  %v855_v0 = vld [vmem:[#allocation2 + $0x1c] sm:$0xf]  ;;  %v884_v31 = vld [vmem:[#allocation2 + $0x20] sm:$0x1]  ;;  %v950_v3 = vshrl.u32 %v854_v61, 16  ;;  %v753_v6 = vsel %vm5364_vm12, %v455_v49, %v752_v54 }
  0x31   : > { %v953_v4 = vshll.u32 %v854_v61, 16  ;;  %v959_v8 = vshll.u32 %v855_v0, 16  ;;  %v963_v9 = vshrl.u32 %v855_v0, 16  ;;  %v969_v10 = vshll.u32 %v884_v31, 16  ;;  %754 = vst [vmem:[#allocation2 + $0x24] sm:$0xf] %v753_v6 }
  0x32   : > { %v1365_v7 = vsel %vm5346_vm8, %v1363_v60, %v1364_v53  ;;  %v952_v12 = vrot.slane %v950_v3, 4  ;;  %v931_v14 = vrot.slane %v929_v57, 5  ;;  %v937_v18 = vrot.slane %v935_v58, 5  ;;  %v759_v46 = vld [vmem:[#allocation2 + $0x30] sm:$0xf]  ;;  %s5263_s29 = smov 120  }
  0x33   : > { %v4856_v11 = vcombine.low %v1362_v59, %v1365_v7  ;;  %v955_v13 = vrot.slane %v953_v4, 5  ;;  %v961_v15 = vrot.slane %v959_v8, 5  ;;  %v965_v16 = vrot.slane %v963_v9, 4  ;;  %v286_v47 = vld [vmem:[#allocation2 + $0x3c] sm:$0x1]  ;;  %s5264_s8 = smov 124  }
  0x34   : > { %v971_v17 = vrot.slane %v969_v10, 5  ;;  %v932_v20 = vor.u32 %v931_v14, %v928_v56  ;;  %v941_v21 = vrot.slane %v939_v62, 4  ;;  %v464_v25 = vsel %vm5371_vm13, %v456_v34, %v463_v5  ;;  %v342_v51 = vld [vmem:[#allocation2 + $0x44] sm:$0x1]  ;;  %v389_v54 = vld [vmem:[%s5338_s23 + $0x20] sm:$0xf] }
  0x35   : > { %2875 = vrot.lane.b32.xlu1 %v4856_v11, %s5255_s24  ;;  %v956_v19 = vor.u32 %v955_v13, %v952_v12  ;;  %v966_v28 = vor.u32 %v965_v16, %v961_v15  ;;  %v465_v29 = vrot.slane %v460_v43, 4  ;;  %755 = vst.msk [vmem:[#allocation2 + $0x28] sm:$0xf] %vm259_vm0, %v464_v25  ;;  %v469_v30 = vrot.slane %v467_v35, 7  ;;  %v763_v43 = vld [vmem:[#allocation2 + $0x38] sm:$0x1] }
  0x36   : > { %v477_v32 = vrot.slane %v475_v37, 7  ;;  %v933_v38 = vrot.slane %v932_v20, 4  ;;  %v942_v39 = vor.u32 %v941_v21, %v937_v18  ;;  %v478_v40 = vshll.u32 %v5392_v23, 16  ;;  %v390_v59 = vld [vmem:[%s5338_s23 + $0x24] sm:$0xf] }
  0x37   : > { %v957_v33 = vrot.slane %v956_v19, 4  ;;  %v967_v41 = vrot.slane %v966_v28, 4  ;;  %v757_v44 = vsel %vm5306_vm3, %v465_v29, %v756_v27  ;;  %v472_v45 = vor.u32 %v470_v36, %v469_v30  ;;  %v289_v31 = vld [vmem:[#allocation2 + $0x48] sm:$0x1]  ;;  %v345_v3 = vld [vmem:[#allocation2 + $0x50] sm:$0x1] }
  0x38   : > { %v473_v34 = vrot.slane %v469_v30, 4  ;;  %v938_v37 = vsel %vm5396_vm14, %v933_v38, %v937_v18  ;;  %v943_v23 = vrot.slane %v942_v39, 4  ;;  %758 = vst [vmem:[#allocation2 + $0x2c] sm:$0x1] %v757_v44  ;;  %v856_v49 = vld [vmem:[#allocation2 + $0x24] sm:$0xf]  ;;  %v480_v50 = vor.u32 %v478_v40, %v477_v32 }
  0x39   : > { %v962_v35 = vsel %vm5396_vm14, %v957_v33, %v961_v15  ;;  %v972_v22 = vsel %vm5396_vm14, %v967_v41, %v971_v17  ;;  %v974_v36 = vshrl.u32 %v856_v49, 16  ;;  %v977_v52 = vshll.u32 %v856_v49, 16  ;;  %v391_v12 = vld [vmem:[%s5338_s23 + $0x28] sm:$0xf] }
  0x3a   : > { %v482_v53 = vrot.slane %v477_v32, 4  ;;  %v4841_v55 = vcombine.low %v962_v35, %v972_v22  ;;  %v948_v56 = vsel %vm5396_vm14, %v943_v23, %v947_v63  ;;  %v481_v57 = vsel %vm5371_vm13, %v473_v34, %v480_v50  ;;  %v392_v35 = vld [vmem:[%s5338_s23 + $0x2c] sm:$0xf] }
  0x3b   : > { %v760_v58 = vsel %vm5364_vm12, %v472_v45, %v759_v46  ;;  %v4840_v60 = vcombine.low %v938_v37, %v948_v56  ;;  %v976_v61 = vrot.slane %v974_v36, 4  ;;  %v979_v62 = vrot.slane %v977_v52, 5  ;;  %762 = vst.msk [vmem:[#allocation2 + $0x34] sm:$0xf] %vm259_vm0, %v481_v57 }
  0x3c   : > { %761 = vst [vmem:[#allocation2 + $0x30] sm:$0xf] %v760_v58  ;;  %v764_v0 = vsel %vm5306_vm3, %v482_v53, %v763_v43  ;;  %2797 = vrot.lane.b32.xlu1 %v4841_v55, %s5256_s25  ;;  %v857_v63 = vld [vmem:[#allocation2 + $0x28] sm:$0xf]  ;;  %v287_v4 = vsel %vm5306_vm3, 0, %v286_v47  ;;  %v343_v5 = vsel %vm5313_vm5, 0, %v342_v51 }
  0x3d   : > { %765 = vst [vmem:[#allocation2 + $0x38] sm:$0x1] %v764_v0  ;;  %v484_v6 = vshrl.u32 %v389_v54, 16  ;;  %v487_v7 = vshll.u32 %v389_v54, 16  ;;  %2795 = vrot.lane.b32.xlu0 %v4840_v60, %s5256_s25  ;;  %v980_v8 = vor.u32 %v979_v62, %v976_v61  ;;  %v983_v9 = vshll.u32 %v857_v63, 16 }
  0x3e   : > { %v987_v10 = vshrl.u32 %v857_v63, 16  ;;  %288 = vst [vmem:[#allocation2 + $0x3c] sm:$0x1] %v287_v4  ;;  %344 = vst [vmem:[#allocation2 + $0x44] sm:$0x1] %v343_v5  ;;  %v492_v11 = vshrl.u32 %v390_v59, 16 }
  0x3f   : > { %v486_v13 = vrot.slane %v484_v6, 7  ;;  %v495_v14 = vshll.u32 %v390_v59, 16  ;;  %v290_v15 = vsel %vm5306_vm3, 0, %v289_v31  ;;  %v346_v16 = vsel %vm5313_vm5, 0, %v345_v3  ;;  %v885_v17 = vld [vmem:[#allocation2 + $0x2c] sm:$0x1] }
  0x40   : > { %v981_v18 = vrot.slane %v980_v8, 4  ;;  %v985_v19 = vrot.slane %v983_v9, 5  ;;  %v989_v20 = vrot.slane %v987_v10, 4  ;;  %v494_v21 = vrot.slane %v492_v11, 7  ;;  %291 = vst [vmem:[#allocation2 + $0x48] sm:$0x1] %v290_v15 }
  0x41   : > { %347 = vst [vmem:[#allocation2 + $0x50] sm:$0x1] %v346_v16  ;;  %v993_v25 = vshll.u32 %v885_v17, 16  ;;  %v490_v27 = vrot.slane %v486_v13, 4  ;;  %v501_v28 = vshrl.u32 %v391_v12, 16  ;;  %v489_v41 = vor.u32 %v487_v7, %v486_v13 }
  0x42   : > { %v990_v29 = vor.u32 %v989_v20, %v985_v19  ;;  %v497_v30 = vor.u32 %v495_v14, %v494_v21  ;;  %v499_v32 = vrot.slane %v494_v21, 4  ;;  %v986_v33 = vsel %vm5396_vm14, %v981_v18, %v985_v19  ;;  %v5464_v40 = vld [vmem:[#allocation2 + $0x34] sm:$0xf]  ;;  %v348_v59 = vld [vmem:[#allocation2 + $0x5c] sm:$0x1] }
  0x43   : > { %v995_v38 = vrot.slane %v993_v25, 5  ;;  %v858_v39 = vld [vmem:[#allocation2 + $0x30] sm:$0xf]  ;;  %v5466_v44 = vrot.slane %v501_v28, 7  ;;  %v1007_v47 = vshll.u32 %v5464_v40, 16  ;;  %v1011_v37 = vshrl.u32 %v5464_v40, 16 }
  0x44   : > { %v991_v45 = vrot.slane %v990_v29, 4  ;;  %v886_v34 = vld [vmem:[#allocation2 + $0x38] sm:$0x1]  ;;  %v998_v46 = vshrl.u32 %v858_v39, 16  ;;  %v1001_v43 = vshll.u32 %v858_v39, 16  ;;  %v498_v49 = vsel %vm5371_vm13, %v490_v27, %v497_v30 }
  0x45   : > { %v1017_v23 = vshll.u32 %v886_v34, 16  ;;  %v766_v50 = vld [vmem:[#allocation2 + $0x3c] sm:$0xf]  ;;  %v770_v51 = vld [vmem:[#allocation2 + $0x44] sm:$0x1]  ;;  %v1009_v53 = vrot.slane %v1007_v47, 5 }
  0x46   : > { %v996_v22 = vsel %vm5396_vm14, %v991_v45, %v995_v38  ;;  %v1000_v36 = vrot.slane %v998_v46, 4  ;;  %v1003_v52 = vrot.slane %v1001_v43, 5  ;;  %769 = vst.msk [vmem:[#allocation2 + $0x40] sm:$0xf] %vm259_vm0, %v498_v49  ;;  %v292_v54 = vld [vmem:[#allocation2 + $0x54] sm:$0x1]  ;;  %v767_v58 = vsel %vm5364_vm12, %v489_v41, %v766_v50 }
  0x47   : > { %v4842_v55 = vcombine.low %v986_v33, %v996_v22  ;;  %v1013_v56 = vrot.slane %v1011_v37, 4  ;;  %v1019_v57 = vrot.slane %v1017_v23, 5  ;;  %v393_v60 = vld [vmem:[%s5338_s23 + $0x30] sm:$0xf]  ;;  %768 = vst [vmem:[#allocation2 + $0x3c] sm:$0xf] %v767_v58  ;;  %v771_v62 = vsel %vm5306_vm3, %v499_v32, %v770_v51 }
  0x48   : > { %v1004_v61 = vor.u32 %v1003_v52, %v1000_v36  ;;  %v504_v0 = vshll.u32 %v391_v12, 16  ;;  %v507_v31 = vrot.slane %v5466_v44, 4  ;;  %v394_v3 = vld [vmem:[%s5338_s23 + $0x34] sm:$0xf]  ;;  %772 = vst [vmem:[#allocation2 + $0x44] sm:$0x1] %v771_v62 }
  0x49   : > { %2799 = vrot.lane.b32.xlu1 %v4842_v55, %s5256_s25  ;;  %v1014_v63 = vor.u32 %v1013_v56, %v1009_v53  ;;  %v509_v4 = vshrl.u32 %v392_v35, 16  ;;  %v512_v5 = vshll.u32 %v392_v35, 16  ;;  %v773_v6 = vld [vmem:[#allocation2 + $0x48] sm:$0xf]  ;;  %v293_v7 = vsel %vm5306_vm3, 0, %v292_v54 }
  0x4a   : > { %v1005_v8 = vrot.slane %v1004_v61, 4  ;;  %v506_v9 = vor.u32 %v504_v0, %v5466_v44  ;;  %294 = vst [vmem:[#allocation2 + $0x54] sm:$0x1] %v293_v7  ;;  %v349_v10 = vsel %vm5313_vm5, 0, %v348_v59  ;;  %v518_v11 = vshrl.u32 %v393_v60, 16 }
  0x4b   : > { %v1015_v12 = vrot.slane %v1014_v63, 4  ;;  %v511_v13 = vrot.slane %v509_v4, 7  ;;  %350 = vst [vmem:[#allocation2 + $0x5c] sm:$0x1] %v349_v10  ;;  %v521_v14 = vshll.u32 %v393_v60, 16  ;;  %v526_v15 = vshrl.u32 %v394_v3, 16 }
  0x4c   : > { %v1010_v16 = vsel %vm5396_vm14, %v1005_v8, %v1009_v53  ;;  %v774_v17 = vsel %vm5364_vm12, %v506_v9, %v773_v6  ;;  %v777_v18 = vld [vmem:[#allocation2 + $0x50] sm:$0x1]  ;;  %v520_v19 = vrot.slane %v518_v11, 7  ;;  %v529_v20 = vshll.u32 %v394_v3, 16  ;;  %v295_v30 = vld [vmem:[#allocation2 + $0x60] sm:$0x1] }
  0x4d   : > { %v1020_v21 = vsel %vm5396_vm14, %v1015_v12, %v1019_v57  ;;  %v5495_v25 = vld [vmem:[#allocation2 + $0x40] sm:$0xf]  ;;  %v514_v27 = vor.u32 %v512_v5, %v511_v13  ;;  %v516_v28 = vrot.slane %v511_v13, 4  ;;  %775 = vst [vmem:[#allocation2 + $0x48] sm:$0xf] %v774_v17  ;;  %v528_v29 = vrot.slane %v526_v15, 7 }
  0x4e   : > { %v4843_v32 = vcombine.low %v1010_v16, %v1020_v21  ;;  %v1031_v33 = vshll.u32 %v5495_v25, 16  ;;  %v1035_v38 = vshrl.u32 %v5495_v25, 16  ;;  %v523_v39 = vor.u32 %v521_v14, %v520_v19  ;;  %v351_v41 = vld [vmem:[#allocation2 + $0x68] sm:$0x1]  ;;  %v395_v44 = vld [vmem:[%s5338_s23 + $0x38] sm:$0xf] }
  0x4f   : > { %v860_v45 = vld [vmem:[#allocation2 + $0x3c] sm:$0xf]  ;;  %v515_v34 = vsel %vm5371_vm13, %v507_v31, %v514_v27  ;;  %v778_v46 = vsel %vm5306_vm3, %v516_v28, %v777_v18  ;;  %v524_v43 = vrot.slane %v520_v19, 4  ;;  %v531_v47 = vor.u32 %v529_v20, %v528_v29  ;;  %v5506_v37 = vld [vmem:[#allocation2 + $0x44] sm:$0x1] }
  0x50   : > { %v396_v35 = vld [vmem:[%s5338_s23 + $0x3c] sm:$0xf]  ;;  %2801 = vrot.lane.b32.xlu0 %v4843_v32, %s5256_s25  ;;  %v1022_v23 = vshrl.u32 %v860_v45, 16  ;;  %v1025_v49 = vshll.u32 %v860_v45, 16  ;;  %v1033_v50 = vrot.slane %v1031_v33, 5  ;;  %v1037_v51 = vrot.slane %v1035_v38, 4 }
  0x51   : > { %776 = vst.msk [vmem:[#allocation2 + $0x4c] sm:$0xf] %vm259_vm0, %v515_v34  ;;  %779 = vst [vmem:[#allocation2 + $0x50] sm:$0x1] %v778_v46  ;;  %v1041_v22 = vshll.u32 %v5506_v37, 16  ;;  %v532_v36 = vsel %vm5371_vm13, %v524_v43, %v531_v47  ;;  %v533_v52 = vrot.slane %v528_v29, 4 }
  0x52   : > { %v780_v53 = vld [vmem:[#allocation2 + $0x54] sm:$0xf]  ;;  %v296_v54 = vsel %vm5306_vm3, 0, %v295_v30  ;;  %v1024_v55 = vrot.slane %v1022_v23, 4  ;;  %v1027_v56 = vrot.slane %v1025_v49, 5  ;;  %v1038_v57 = vor.u32 %v1037_v51, %v1033_v50 }
  0x53   : > { %v781_v58 = vsel %vm5364_vm12, %v523_v39, %v780_v53  ;;  %783 = vst.msk [vmem:[#allocation2 + $0x58] sm:$0xf] %vm259_vm0, %v532_v36  ;;  %v784_v59 = vld [vmem:[#allocation2 + $0x5c] sm:$0x1]  ;;  %297 = vst [vmem:[#allocation2 + $0x60] sm:$0x1] %v296_v54 }
  0x54   : > { %v1043_v60 = vrot.slane %v1041_v22, 5  ;;  %782 = vst [vmem:[#allocation2 + $0x54] sm:$0xf] %v781_v58  ;;  %v785_v61 = vsel %vm5306_vm3, %v533_v52, %v784_v59  ;;  %v352_v62 = vsel %vm5313_vm5, 0, %v351_v41  ;;  %v535_v0 = vshrl.u32 %v395_v44, 16 }
  0x55   : > { %v298_v31 = vld [vmem:[#allocation2 + $0x6c] sm:$0x1]  ;;  %v1028_v3 = vor.u32 %v1027_v56, %v1024_v55  ;;  %v1039_v63 = vrot.slane %v1038_v57, 4  ;;  %v862_v4 = vld [vmem:[#allocation2 + $0x48] sm:$0xf]  ;;  %v538_v5 = vshll.u32 %v395_v44, 16 }
  0x56   : > { %786 = vst [vmem:[#allocation2 + $0x5c] sm:$0x1] %v785_v61  ;;  %353 = vst [vmem:[#allocation2 + $0x68] sm:$0x1] %v352_v62  ;;  %v543_v6 = vshrl.u32 %v396_v35, 16  ;;  %v1046_v7 = vshrl.u32 %v862_v4, 16 }
  0x57   : > { %v1049_v8 = vshll.u32 %v862_v4, 16  ;;  %v537_v9 = vrot.slane %v535_v0, 7  ;;  %v546_v10 = vshll.u32 %v396_v35, 16  ;;  %v1029_v11 = vrot.slane %v1028_v3, 4  ;;  %v354_v43 = vld [vmem:[#allocation2 + $0x74] sm:$0x1] }
  0x58   : > { %v1044_v12 = vsel %vm5396_vm14, %v1039_v63, %v1043_v60  ;;  %v545_v13 = vrot.slane %v543_v6, 7  ;;  %v299_v14 = vsel %vm5306_vm3, 0, %v298_v31  ;;  %v5525_v15 = vld [vmem:[#allocation2 + $0x4c] sm:$0xf]  ;;  %v5527_v16 = vld [vmem:[#allocation2 + $0x50] sm:$0x1] }
  0x59   : > { %v1048_v17 = vrot.slane %v1046_v7, 4  ;;  %v1051_v18 = vrot.slane %v1049_v8, 5  ;;  %v540_v19 = vor.u32 %v538_v5, %v537_v9  ;;  %300 = vst [vmem:[#allocation2 + $0x6c] sm:$0x1] %v299_v14  ;;  %v1034_v20 = vsel %vm5396_vm14, %v1029_v11, %v1033_v50  ;;  %v397_v53 = vld [vmem:[%s5338_s23 + $0x40] sm:$0xf] }
  0x5a   : > { %v1055_v21 = vshll.u32 %v5525_v15, 16  ;;  %v1059_v27 = vshrl.u32 %v5525_v15, 16  ;;  %v1065_v28 = vshll.u32 %v5527_v16, 16  ;;  %v4844_v29 = vcombine.low %v1034_v20, %v1044_v12  ;;  %v5534_v32 = vld [vmem:[#allocation2 + $0x58] sm:$0xf] }
  0x5b   : > { %v1052_v30 = vor.u32 %v1051_v18, %v1048_v17  ;;  %v541_v33 = vrot.slane %v537_v9, 4  ;;  %v548_v38 = vor.u32 %v546_v10, %v545_v13  ;;  %v787_v39 = vld [vmem:[#allocation2 + $0x60] sm:$0xf]  ;;  %v864_v34 = vld [vmem:[#allocation2 + $0x54] sm:$0xf]  ;;  %v1079_v46 = vshll.u32 %v5534_v32, 16 }
  0x5c   : > { %v1057_v41 = vrot.slane %v1055_v21, 5  ;;  %v1061_v44 = vrot.slane %v1059_v27, 4  ;;  %v1067_v45 = vrot.slane %v1065_v28, 5  ;;  %2803 = vrot.lane.b32.xlu1 %v4844_v29, %s5256_s25  ;;  %v1070_v23 = vshrl.u32 %v864_v34, 16  ;;  %v398_v54 = vld [vmem:[%s5338_s23 + $0x44] sm:$0xf] }
  0x5d   : > { %v1053_v47 = vrot.slane %v1052_v30, 4  ;;  %v5538_v35 = vld [vmem:[#allocation2 + $0x5c] sm:$0x1]  ;;  %v1073_v49 = vshll.u32 %v864_v34, 16  ;;  %v1083_v50 = vshrl.u32 %v5534_v32, 16  ;;  %v1081_v22 = vrot.slane %v1079_v46, 5 }
  0x5e   : > { %v1062_v51 = vor.u32 %v1061_v44, %v1057_v41  ;;  %v1089_v36 = vshll.u32 %v5538_v35, 16  ;;  %v549_v52 = vsel %vm5371_vm13, %v541_v33, %v548_v38  ;;  %v1072_v56 = vrot.slane %v1070_v23, 4  ;;  %v791_v59 = vld [vmem:[#allocation2 + $0x68] sm:$0x1]  ;;  %v301_v5 = vld [vmem:[#allocation2 + $0x78] sm:$0x1] }
  0x5f   : > { %v1058_v55 = vsel %vm5396_vm14, %v1053_v47, %v1057_v41  ;;  %v1075_v57 = vrot.slane %v1073_v49, 5  ;;  %v1085_v58 = vrot.slane %v1083_v50, 4  ;;  %790 = vst.msk [vmem:[#allocation2 + $0x64] sm:$0xf] %vm259_vm0, %v549_v52  ;;  %v550_v62 = vrot.slane %v545_v13, 4 }
  0x60   : > { %v1063_v60 = vrot.slane %v1062_v51, 4  ;;  %v1091_v61 = vrot.slane %v1089_v36, 5  ;;  %v788_v0 = vsel %vm5364_vm12, %v540_v19, %v787_v39  ;;  %v355_v63 = vsel %vm5313_vm5, 0, %v354_v43  ;;  %v357_v6 = vld [vmem:[#allocation2 + $0x80] sm:$0x1] }
  0x61   : > { %v1076_v31 = vor.u32 %v1075_v57, %v1072_v56  ;;  %v1086_v3 = vor.u32 %v1085_v58, %v1081_v22  ;;  %789 = vst [vmem:[#allocation2 + $0x60] sm:$0xf] %v788_v0  ;;  %v552_v4 = vshrl.u32 %v397_v53, 16  ;;  %v792_v8 = vsel %vm5306_vm3, %v550_v62, %v791_v59  ;;  %356 = vst [vmem:[#allocation2 + $0x74] sm:$0x1] %v355_v63 }
  0x62   : > { %v1068_v7 = vsel %vm5396_vm14, %v1063_v60, %v1067_v45  ;;  %v555_v9 = vshll.u32 %v397_v53, 16  ;;  %v560_v10 = vshrl.u32 %v398_v54, 16  ;;  %793 = vst [vmem:[#allocation2 + $0x68] sm:$0x1] %v792_v8  ;;  %v399_v17 = vld [vmem:[%s5338_s23 + $0x48] sm:$0xf] }
  0x63   : > { %v4845_v11 = vcombine.low %v1058_v55, %v1068_v7  ;;  %v1077_v12 = vrot.slane %v1076_v31, 4  ;;  %v1087_v13 = vrot.slane %v1086_v3, 4  ;;  %v554_v14 = vrot.slane %v552_v4, 7  ;;  %v794_v20 = vld [vmem:[#allocation2 + $0x6c] sm:$0xf] }
  0x64   : > { %v562_v18 = vrot.slane %v560_v10, 7  ;;  %v563_v19 = vshll.u32 %v398_v54, 16  ;;  %v302_v21 = vsel %vm5306_vm3, 0, %v301_v5  ;;  %v358_v27 = vsel %vm5313_vm5, 0, %v357_v6  ;;  %v400_v38 = vld [vmem:[%s5338_s23 + $0x4c] sm:$0xf] }
  0x65   : > { %2805 = vrot.lane.b32.xlu0 %v4845_v11, %s5256_s25  ;;  %v1082_v28 = vsel %vm5396_vm14, %v1077_v12, %v1081_v22  ;;  %v1092_v29 = vsel %vm5396_vm14, %v1087_v13, %v1091_v61  ;;  %v557_v30 = vor.u32 %v555_v9, %v554_v14  ;;  %v558_v33 = vrot.slane %v554_v14, 4  ;;  %303 = vst [vmem:[#allocation2 + $0x78] sm:$0x1] %v302_v21  ;;  %v304_v49 = vld [vmem:[#allocation2 + $0x84] sm:$0x1] }
  0x66   : > { %359 = vst [vmem:[#allocation2 + $0x80] sm:$0x1] %v358_v27  ;;  %v4846_v39 = vcombine.low %v1082_v28, %v1092_v29  ;;  %v5568_v41 = vld [vmem:[#allocation2 + $0x64] sm:$0xf]  ;;  %v565_v44 = vor.u32 %v563_v19, %v562_v18  ;;  %v567_v45 = vrot.slane %v562_v18, 4  ;;  %v569_v34 = vshrl.u32 %v399_v17, 16 }
  0x67   : > { %v1103_v46 = vshll.u32 %v5568_v41, 16  ;;  %v1107_v43 = vshrl.u32 %v5568_v41, 16  ;;  %v795_v47 = vsel %vm5364_vm12, %v557_v30, %v794_v20  ;;  %v572_v23 = vshll.u32 %v399_v17, 16  ;;  %v360_v58 = vld [vmem:[#allocation2 + $0x8c] sm:$0x1] }
  0x68   : > { %2807 = vrot.lane.b32.xlu1 %v4846_v39, %s5256_s25  ;;  %v866_v50 = vld [vmem:[#allocation2 + $0x60] sm:$0xf]  ;;  %v566_v51 = vsel %vm5371_vm13, %v558_v33, %v565_v44  ;;  %796 = vst [vmem:[#allocation2 + $0x6c] sm:$0xf] %v795_v47  ;;  %v571_v22 = vrot.slane %v569_v34, 7  ;;  %v577_v36 = vshrl.u32 %v400_v38, 16 }
  0x69   : > { %v580_v52 = vshll.u32 %v400_v38, 16  ;;  %v1094_v53 = vshrl.u32 %v866_v50, 16  ;;  %v1097_v54 = vshll.u32 %v866_v50, 16  ;;  %v1105_v55 = vrot.slane %v1103_v46, 5  ;;  %797 = vst.msk [vmem:[#allocation2 + $0x70] sm:$0xf] %vm259_vm0, %v566_v51 }
  0x6a   : > { %v1109_v56 = vrot.slane %v1107_v43, 4  ;;  %v798_v57 = vld [vmem:[#allocation2 + $0x74] sm:$0x1]  ;;  %v5578_v59 = vld [vmem:[#allocation2 + $0x68] sm:$0x1]  ;;  %v574_v61 = vor.u32 %v572_v23, %v571_v22  ;;  %v575_v62 = vrot.slane %v571_v22, 4 }
  0x6b   : > { %v799_v60 = vsel %vm5306_vm3, %v567_v45, %v798_v57  ;;  %v579_v0 = vrot.slane %v577_v36, 7  ;;  %v401_v31 = vld [vmem:[%s5338_s23 + $0x50] sm:$0xf]  ;;  %v1096_v3 = vrot.slane %v1094_v53, 4  ;;  %v1099_v63 = vrot.slane %v1097_v54, 5 }
  0x6c   : > { %v1110_v4 = vor.u32 %v1109_v56, %v1105_v55  ;;  %v1113_v5 = vshll.u32 %v5578_v59, 16  ;;  %800 = vst [vmem:[#allocation2 + $0x74] sm:$0x1] %v799_v60  ;;  %v402_v6 = vld [vmem:[%s5338_s23 + $0x54] sm:$0xf]  ;;  %v305_v11 = vsel %vm5306_vm3, 0, %v304_v49 }
  0x6d   : > { %v582_v7 = vor.u32 %v580_v52, %v579_v0  ;;  %v584_v8 = vrot.slane %v579_v0, 4  ;;  %v801_v9 = vld [vmem:[#allocation2 + $0x78] sm:$0xf]  ;;  %v805_v10 = vld [vmem:[#allocation2 + $0x80] sm:$0x1]  ;;  %v1100_v12 = vor.u32 %v1099_v63, %v1096_v3  ;;  %v361_v20 = vsel %vm5313_vm5, 0, %v360_v58 }
  0x6e   : > { %v1111_v13 = vrot.slane %v1110_v4, 4  ;;  %v1115_v14 = vrot.slane %v1113_v5, 5  ;;  %v802_v17 = vsel %vm5364_vm12, %v574_v61, %v801_v9  ;;  %306 = vst [vmem:[#allocation2 + $0x84] sm:$0x1] %v305_v11  ;;  %v586_v21 = vshrl.u32 %v401_v31, 16 }
  0x6f   : > { %v583_v18 = vsel %vm5371_vm13, %v575_v62, %v582_v7  ;;  %803 = vst [vmem:[#allocation2 + $0x78] sm:$0xf] %v802_v17  ;;  %v806_v19 = vsel %vm5306_vm3, %v584_v8, %v805_v10  ;;  %v1101_v27 = vrot.slane %v1100_v12, 4  ;;  %v868_v29 = vld [vmem:[#allocation2 + $0x6c] sm:$0xf]  ;;  %v589_v30 = vshll.u32 %v401_v31, 16 }
  0x70   : > { %v1116_v28 = vsel %vm5396_vm14, %v1111_v13, %v1115_v14  ;;  %804 = vst.msk [vmem:[#allocation2 + $0x7c] sm:$0xf] %vm259_vm0, %v583_v18  ;;  %807 = vst [vmem:[#allocation2 + $0x80] sm:$0x1] %v806_v19  ;;  %v594_v33 = vshrl.u32 %v402_v6, 16  ;;  %v1118_v39 = vshrl.u32 %v868_v29, 16 }
  0x71   : > { %362 = vst [vmem:[#allocation2 + $0x8c] sm:$0x1] %v361_v20  ;;  %v5598_v38 = vld [vmem:[#allocation2 + $0x70] sm:$0xf]  ;;  %v1121_v44 = vshll.u32 %v868_v29, 16  ;;  %v588_v45 = vrot.slane %v586_v21, 7  ;;  %v1106_v46 = vsel %vm5396_vm14, %v1101_v27, %v1105_v55 }
  0x72   : > { %v597_v34 = vshll.u32 %v402_v6, 16  ;;  %v1127_v43 = vshll.u32 %v5598_v38, 16  ;;  %v1131_v47 = vshrl.u32 %v5598_v38, 16  ;;  %v596_v23 = vrot.slane %v594_v33, 7  ;;  %v307_v49 = vld [vmem:[#allocation2 + $0x90] sm:$0x1] }
  0x73   : > { %v4847_v50 = vcombine.low %v1106_v46, %v1116_v28  ;;  %v5604_v51 = vld [vmem:[#allocation2 + $0x74] sm:$0x1]  ;;  %v1120_v22 = vrot.slane %v1118_v39, 4  ;;  %v1123_v36 = vrot.slane %v1121_v44, 5  ;;  %v591_v52 = vor.u32 %v589_v30, %v588_v45  ;;  %v363_v53 = vld [vmem:[#allocation2 + $0x98] sm:$0x1] }
  0x74   : > { %v1129_v54 = vrot.slane %v1127_v43, 5  ;;  %v1133_v56 = vrot.slane %v1131_v47, 4  ;;  %v1137_v57 = vshll.u32 %v5604_v51, 16  ;;  %v592_v58 = vrot.slane %v588_v45, 4  ;;  %v403_v6 = vld [vmem:[%s5338_s23 + $0x58] sm:$0xf] }
  0x75   : > { %2809 = vrot.lane.b32.xlu0 %v4847_v50, %s5256_s25  ;;  %v1124_v55 = vor.u32 %v1123_v36, %v1120_v22  ;;  %v599_v60 = vor.u32 %v597_v34, %v596_v23  ;;  %v601_v61 = vrot.slane %v596_v23, 4  ;;  %v808_v62 = vld [vmem:[#allocation2 + $0x84] sm:$0xf]  ;;  %v308_v0 = vsel %vm5306_vm3, 0, %v307_v49  ;;  %v404_v12 = vld [vmem:[%s5338_s23 + $0x5c] sm:$0xf] }
  0x76   : > { %v1134_v31 = vor.u32 %v1133_v56, %v1129_v54  ;;  %v1139_v3 = vrot.slane %v1137_v57, 5  ;;  %v870_v63 = vld [vmem:[#allocation2 + $0x78] sm:$0xf]  ;;  %v809_v4 = vsel %vm5364_vm12, %v591_v52, %v808_v62  ;;  %309 = vst [vmem:[#allocation2 + $0x90] sm:$0x1] %v308_v0  ;;  %v364_v5 = vsel %vm5313_vm5, 0, %v363_v53 }
  0x77   : > { %v1125_v7 = vrot.slane %v1124_v55, 4  ;;  %v5615_v8 = vld [vmem:[#allocation2 + $0x7c] sm:$0xf]  ;;  %v5617_v9 = vld [vmem:[#allocation2 + $0x80] sm:$0x1]  ;;  %v1142_v10 = vshrl.u32 %v870_v63, 16  ;;  %v600_v11 = vsel %vm5371_vm13, %v592_v58, %v599_v60 }
  0x78   : > { %810 = vst [vmem:[#allocation2 + $0x84] sm:$0xf] %v809_v4  ;;  %365 = vst [vmem:[#allocation2 + $0x98] sm:$0x1] %v364_v5  ;;  %v1135_v13 = vrot.slane %v1134_v31, 4  ;;  %v1145_v14 = vshll.u32 %v870_v63, 16 }
  0x79   : > { %v1151_v17 = vshll.u32 %v5615_v8, 16  ;;  %v1155_v18 = vshrl.u32 %v5615_v8, 16  ;;  %811 = vst.msk [vmem:[#allocation2 + $0x88] sm:$0xf] %vm259_vm0, %v600_v11  ;;  %v812_v19 = vld [vmem:[#allocation2 + $0x8c] sm:$0x1]  ;;  %v1130_v20 = vsel %vm5396_vm14, %v1125_v7, %v1129_v54 }
  0x7a   : > { %v1144_v21 = vrot.slane %v1142_v10, 4  ;;  %v1161_v27 = vshll.u32 %v5617_v9, 16  ;;  %v813_v28 = vsel %vm5306_vm3, %v601_v61, %v812_v19  ;;  %v310_v29 = vld [vmem:[#allocation2 + $0x9c] sm:$0x1]  ;;  %v366_v30 = vld [vmem:[#allocation2 + $0xa4] sm:$0x1]  ;;  %v1140_v33 = vsel %vm5396_vm14, %v1135_v13, %v1139_v3 }
  0x7b   : > { %v1147_v39 = vrot.slane %v1145_v14, 5  ;;  %v1153_v44 = vrot.slane %v1151_v17, 5  ;;  %v1157_v45 = vrot.slane %v1155_v18, 4  ;;  %814 = vst [vmem:[#allocation2 + $0x8c] sm:$0x1] %v813_v28  ;;  %v4848_v46 = vcombine.low %v1130_v20, %v1140_v33 }
  0x7c   : > { %v405_v34 = vld [vmem:[%s5338_s23 + $0x60] sm:$0xf]  ;;  %v1163_v43 = vrot.slane %v1161_v27, 5  ;;  %v603_v47 = vshrl.u32 %v403_v6, 16  ;;  %v606_v23 = vshll.u32 %v403_v6, 16  ;;  %v611_v22 = vshrl.u32 %v404_v12, 16 }
  0x7d   : > { %v1148_v49 = vor.u32 %v1147_v39, %v1144_v21  ;;  %v1158_v50 = vor.u32 %v1157_v45, %v1153_v44  ;;  %v614_v36 = vshll.u32 %v404_v12, 16  ;;  %2811 = vrot.lane.b32.xlu1 %v4848_v46, %s5256_s25  ;;  %v311_v53 = vsel %vm5306_vm3, 0, %v310_v29  ;;  %v815_v10 = vld [vmem:[#allocation2 + $0x90] sm:$0xf]  ;;  %v406_v11 = vld [vmem:[%s5338_s23 + $0x64] sm:$0xf] }
  0x7e   : > { %v605_v52 = vrot.slane %v603_v47, 7  ;;  %v367_v54 = vsel %vm5313_vm5, 0, %v366_v30  ;;  %v620_v56 = vshrl.u32 %v405_v34, 16  ;;  %v613_v60 = vrot.slane %v611_v22, 7  ;;  %312 = vst [vmem:[#allocation2 + $0x9c] sm:$0x1] %v311_v53 }
  0x7f   : > { %v1149_v57 = vrot.slane %v1148_v49, 4  ;;  %v1159_v58 = vrot.slane %v1158_v50, 4  ;;  %v872_v55 = vld [vmem:[#allocation2 + $0x84] sm:$0xf]  ;;  %368 = vst [vmem:[#allocation2 + $0xa4] sm:$0x1] %v367_v54 }
  0x80   : > { %v623_v61 = vshll.u32 %v405_v34, 16  ;;  %v5638_v62 = vld [vmem:[#allocation2 + $0x88] sm:$0xf]  ;;  %v1166_v0 = vshrl.u32 %v872_v55, 16  ;;  %v1169_v31 = vshll.u32 %v872_v55, 16  ;;  %v608_v3 = vor.u32 %v606_v23, %v605_v52 }
  0x81   : > { %v609_v63 = vrot.slane %v605_v52, 4  ;;  %v1154_v4 = vsel %vm5396_vm14, %v1149_v57, %v1153_v44  ;;  %v1164_v5 = vsel %vm5396_vm14, %v1159_v58, %v1163_v43  ;;  %v1175_v6 = vshll.u32 %v5638_v62, 16  ;;  %v819_v19 = vld [vmem:[#allocation2 + $0x98] sm:$0x1]  ;;  %v313_v44 = vld [vmem:[#allocation2 + $0xa8] sm:$0x1] }
  0x82   : > { %v1179_v7 = vshrl.u32 %v5638_v62, 16  ;;  %v4849_v12 = vcombine.low %v1154_v4, %v1164_v5  ;;  %v5647_v13 = vld [vmem:[#allocation2 + $0x8c] sm:$0x1]  ;;  %v1168_v14 = vrot.slane %v1166_v0, 4  ;;  %v1171_v17 = vrot.slane %v1169_v31, 5 }
  0x83   : > { %v616_v18 = vor.u32 %v614_v36, %v613_v60  ;;  %v1177_v20 = vrot.slane %v1175_v6, 5  ;;  %v1185_v27 = vshll.u32 %v5647_v13, 16  ;;  %v618_v28 = vrot.slane %v613_v60, 4  ;;  %v369_v45 = vld [vmem:[#allocation2 + $0xb0] sm:$0x1] }
  0x84   : > { %v1181_v21 = vrot.slane %v1179_v7, 4  ;;  %2813 = vrot.lane.b32.xlu0 %v4849_v12, %s5256_s25  ;;  %v1172_v29 = vor.u32 %v1171_v17, %v1168_v14  ;;  %v816_v33 = vsel %vm5364_vm12, %v608_v3, %v815_v10  ;;  %v622_v39 = vrot.slane %v620_v56, 7  ;;  %v407_v23 = vld [vmem:[%s5338_s23 + $0x68] sm:$0xf]  ;;  %v408_v49 = vld [vmem:[%s5338_s23 + $0x6c] sm:$0xf] }
  0x85   : > { %v617_v30 = vsel %vm5371_vm13, %v609_v63, %v616_v18  ;;  %v1187_v46 = vrot.slane %v1185_v27, 5  ;;  %817 = vst [vmem:[#allocation2 + $0x90] sm:$0xf] %v816_v33  ;;  %v820_v43 = vsel %vm5306_vm3, %v618_v28, %v819_v19  ;;  %v628_v47 = vshrl.u32 %v406_v11, 16  ;;  %v822_v53 = vld [vmem:[#allocation2 + $0x9c] sm:$0xf] }
  0x86   : > { %v1182_v34 = vor.u32 %v1181_v21, %v1177_v20  ;;  %818 = vst.msk [vmem:[#allocation2 + $0x94] sm:$0xf] %vm259_vm0, %v617_v30  ;;  %v1173_v50 = vrot.slane %v1172_v29, 4  ;;  %821 = vst [vmem:[#allocation2 + $0x98] sm:$0x1] %v820_v43  ;;  %v625_v22 = vor.u32 %v623_v61, %v622_v39  ;;  %v626_v36 = vrot.slane %v622_v39, 4 }
  0x87   : > { %v631_v52 = vshll.u32 %v406_v11, 16  ;;  %v630_v56 = vrot.slane %v628_v47, 7  ;;  %v314_v57 = vsel %vm5306_vm3, 0, %v313_v44  ;;  %v370_v58 = vsel %vm5313_vm5, 0, %v369_v45  ;;  %v316_v55 = vld [vmem:[#allocation2 + $0xb4] sm:$0x1] }
  0x88   : > { %v1183_v54 = vrot.slane %v1182_v34, 4  ;;  %v1178_v60 = vsel %vm5396_vm14, %v1173_v50, %v1177_v20  ;;  %v823_v0 = vsel %vm5364_vm12, %v625_v22, %v822_v53  ;;  %v826_v61 = vld [vmem:[#allocation2 + $0xa4] sm:$0x1]  ;;  %315 = vst [vmem:[#allocation2 + $0xa8] sm:$0x1] %v314_v57  ;;  %v637_v31 = vshrl.u32 %v407_v23, 16 }
  0x89   : > { %371 = vst [vmem:[#allocation2 + $0xb0] sm:$0x1] %v370_v58  ;;  %v640_v3 = vshll.u32 %v407_v23, 16  ;;  %v372_v63 = vld [vmem:[#allocation2 + $0xbc] sm:$0x1]  ;;  %v633_v5 = vor.u32 %v631_v52, %v630_v56  ;;  %v635_v6 = vrot.slane %v630_v56, 4 }
  0x8a   : > { %v1188_v4 = vsel %vm5396_vm14, %v1183_v54, %v1187_v46  ;;  %824 = vst [vmem:[#allocation2 + $0x9c] sm:$0xf] %v823_v0  ;;  %v645_v7 = vshrl.u32 %v408_v49, 16  ;;  %v409_v10 = vld [vmem:[%s5338_s23 + $0x70] sm:$0xf]  ;;  %v639_v12 = vrot.slane %v637_v31, 7 }
  0x8b   : > { %v4850_v11 = vcombine.low %v1178_v60, %v1188_v4  ;;  %v648_v14 = vshll.u32 %v408_v49, 16  ;;  %v317_v17 = vsel %vm5306_vm3, 0, %v316_v55  ;;  %v634_v18 = vsel %vm5371_vm13, %v626_v36, %v633_v5  ;;  %v410_v49 = vld [vmem:[%s5338_s23 + $0x74] sm:$0xf] }
  0x8c   : > { %v827_v19 = vsel %vm5306_vm3, %v635_v6, %v826_v61  ;;  %v647_v20 = vrot.slane %v645_v7, 7  ;;  %318 = vst [vmem:[#allocation2 + $0xb4] sm:$0x1] %v317_v17  ;;  %v373_v21 = vsel %vm5313_vm5, 0, %v372_v63  ;;  %v874_v27 = vld [vmem:[#allocation2 + $0x90] sm:$0xf]  ;;  %v642_v29 = vor.u32 %v640_v3, %v639_v12 }
  0x8d   : > { %2815 = vrot.lane.b32.xlu1 %v4850_v11, %s5256_s25  ;;  %v5680_v28 = vld [vmem:[#allocation2 + $0x94] sm:$0xf]  ;;  %825 = vst.msk [vmem:[#allocation2 + $0xa0] sm:$0xf] %vm259_vm0, %v634_v18  ;;  %828 = vst [vmem:[#allocation2 + $0xa4] sm:$0x1] %v827_v19 }
  0x8e   : > { %v643_v30 = vrot.slane %v639_v12, 4  ;;  %374 = vst [vmem:[#allocation2 + $0xbc] sm:$0x1] %v373_v21  ;;  %v654_v33 = vshrl.u32 %v409_v10, 16  ;;  %v5683_v39 = vld [vmem:[#allocation2 + $0x98] sm:$0x1]  ;;  %v650_v47 = vor.u32 %v648_v14, %v647_v20 }
  0x8f   : > { %v1190_v44 = vshrl.u32 %v874_v27, 16  ;;  %v1193_v45 = vshll.u32 %v874_v27, 16  ;;  %v1199_v34 = vshll.u32 %v5680_v28, 16  ;;  %v1203_v46 = vshrl.u32 %v5680_v28, 16  ;;  %v829_v54 = vld [vmem:[#allocation2 + $0xa8] sm:$0xf] }
  0x90   : > { %v1209_v43 = vshll.u32 %v5683_v39, 16  ;;  %v652_v23 = vrot.slane %v647_v20, 4  ;;  %v5689_v50 = vrot.slane %v654_v33, 7  ;;  %v651_v58 = vsel %vm5371_vm13, %v643_v30, %v650_v47  ;;  %v833_v60 = vld [vmem:[#allocation2 + $0xb0] sm:$0x1] }
  0x91   : > { %v1192_v22 = vrot.slane %v1190_v44, 4  ;;  %v1195_v36 = vrot.slane %v1193_v45, 5  ;;  %v1201_v52 = vrot.slane %v1199_v34, 5  ;;  %v1205_v53 = vrot.slane %v1203_v46, 4  ;;  %v876_v57 = vld [vmem:[#allocation2 + $0x9c] sm:$0xf] }
  0x92   : > { %v1211_v56 = vrot.slane %v1209_v43, 5  ;;  %v830_v55 = vsel %vm5364_vm12, %v642_v29, %v829_v54  ;;  %v657_v0 = vshll.u32 %v409_v10, 16  ;;  %v1214_v3 = vshrl.u32 %v876_v57, 16  ;;  %832 = vst.msk [vmem:[#allocation2 + $0xac] sm:$0xf] %vm259_vm0, %v651_v58 }
  0x93   : > { %v1196_v61 = vor.u32 %v1195_v36, %v1192_v22  ;;  %v1206_v31 = vor.u32 %v1205_v53, %v1201_v52  ;;  %v1217_v63 = vshll.u32 %v876_v57, 16  ;;  %831 = vst [vmem:[#allocation2 + $0xa8] sm:$0xf] %v830_v55  ;;  %v834_v4 = vsel %vm5306_vm3, %v652_v23, %v833_v60  ;;  %v836_v21 = vld [vmem:[#allocation2 + $0xb4] sm:$0xf] }
  0x94   : > { %v660_v5 = vrot.slane %v5689_v50, 4  ;;  %v662_v6 = vshrl.u32 %v410_v49, 16  ;;  %v5699_v12 = vld [vmem:[#allocation2 + $0xa0] sm:$0xf]  ;;  %v5701_v14 = vld [vmem:[#allocation2 + $0xa4] sm:$0x1]  ;;  %v659_v10 = vor.u32 %v657_v0, %v5689_v50 }
  0x95   : > { %v1197_v7 = vrot.slane %v1196_v61, 4  ;;  %v1207_v11 = vrot.slane %v1206_v31, 4  ;;  %835 = vst [vmem:[#allocation2 + $0xb0] sm:$0x1] %v834_v4  ;;  %v1216_v17 = vrot.slane %v1214_v3, 4  ;;  %v1219_v18 = vrot.slane %v1217_v63, 5 }
  0x96   : > { %v1223_v19 = vshll.u32 %v5699_v12, 16  ;;  %v1227_v20 = vshrl.u32 %v5699_v12, 16  ;;  %v1233_v30 = vshll.u32 %v5701_v14, 16  ;;  %v664_v33 = vrot.slane %v662_v6, 7  ;;  %v1287_v44 = vld [vmem:[#allocation2 + $0x18] sm:$0xe] }
  0x97   : > { %v1202_v27 = vsel %vm5396_vm14, %v1197_v7, %v1201_v52  ;;  %v1212_v29 = vsel %vm5396_vm14, %v1207_v11, %v1211_v56  ;;  %v1220_v34 = vor.u32 %v1219_v18, %v1216_v17  ;;  %v665_v23 = vshll.u32 %v410_v49, 16  ;;  %v840_v36 = vld [vmem:[#allocation2 + $0xbc] sm:$0x1] }
  0x98   : > { %v4851_v45 = vcombine.low %v1202_v27, %v1212_v29  ;;  %v1225_v46 = vrot.slane %v1223_v19, 5  ;;  %v1229_v43 = vrot.slane %v1227_v20, 4  ;;  %v1235_v47 = vrot.slane %v1233_v30, 5  ;;  %v5207_v19 = vld [vmem:[#allocation2 + $0x1c] sm:$0xf] }
  0x99   : > { %v669_v50 = vrot.slane %v664_v33, 4  ;;  %v837_v22 = vsel %vm5364_vm12, %v659_v10, %v836_v21  ;;  %v1221_v52 = vrot.slane %v1220_v34, 4  ;;  %v5714_v56 = vld [vmem:[#allocation2 + $0xac] sm:$0xf]  ;;  %v4777_v57 = vrot.slane %v1287_v44, 9 }
  0x9a   : > { %2817 = vrot.lane.b32.xlu0 %v4851_v45, %s5256_s25  ;;  %v1230_v53 = vor.u32 %v1229_v43, %v1225_v46  ;;  %v878_v54 = vld [vmem:[#allocation2 + $0xa8] sm:$0xf]  ;;  %838 = vst [vmem:[#allocation2 + $0xb4] sm:$0xf] %v837_v22  ;;  %v1247_v60 = vshll.u32 %v5714_v56, 16  ;;  %v1251_v49 = vshrl.u32 %v5714_v56, 16  ;;  %v667_v3 = vor.u32 %v665_v23, %v664_v33 }
  0x9b   : > { %v1238_v58 = vshrl.u32 %v878_v54, 16  ;;  %v1241_v55 = vshll.u32 %v878_v54, 16  ;;  %v1226_v0 = vsel %vm5396_vm14, %v1221_v52, %v1225_v46  ;;  %v841_v63 = vsel %vm5306_vm3, %v669_v50, %v840_v36  ;;  %v5208_v30 = vld [vmem:[#allocation2 + $0x20] sm:$0x1] }
  0x9c   : > { %v1231_v61 = vrot.slane %v1230_v53, 4  ;;  %v5720_v31 = vld [vmem:[#allocation2 + $0xb0] sm:$0x1]  ;;  %v1249_v7 = vrot.slane %v1247_v60, 5  ;;  %v1253_v11 = vrot.slane %v1251_v49, 4  ;;  %v668_v18 = vsel %vm5371_vm13, %v660_v5, %v667_v3 }
  0x9d   : > { %v1240_v4 = vrot.slane %v1238_v58, 4  ;;  %v1243_v6 = vrot.slane %v1241_v55, 5  ;;  %842 = vst [vmem:[#allocation2 + $0xbc] sm:$0x1] %v841_v63  ;;  %v1257_v17 = vshll.u32 %v5720_v31, 16  ;;  %v1368_v20 = vrot.slane %v5207_v19, 5 }
  0x9e   : > { %v1236_v10 = vsel %vm5396_vm14, %v1231_v61, %v1235_v47  ;;  %v1254_v29 = vor.u32 %v1253_v11, %v1249_v7  ;;  %839 = vst.msk [vmem:[#allocation2 + $0xb8] sm:$0xf] %vm259_vm0, %v668_v18  ;;  %v1371_v33 = vrot.slane %v5208_v30, 5  ;;  %v1289_v47 = vld [vmem:[#allocation2 + $0x30] sm:$0xe]  ;;  %v1382_v3 = vrot.slane %v5464_v40, 5 }
  0x9f   : > { %v4852_v21 = vcombine.low %v1226_v0, %v1236_v10  ;;  %v1244_v27 = vor.u32 %v1243_v6, %v1240_v4  ;;  %v1259_v44 = vrot.slane %v1257_v17, 5  ;;  %v1370_v45 = vrot.slane %v1368_v20, 4  ;;  %v1288_v53 = vld [vmem:[#allocation2 + $0x24] sm:$0xe]  ;;  %v5209_v0 = vld [vmem:[#allocation2 + $0x28] sm:$0xf] }
  0xa0   : > { %v1255_v46 = vrot.slane %v1254_v29, 4  ;;  %v1369_v36 = vsel %vm5346_vm8, %v4777_v57, %v1368_v20  ;;  %v4779_v49 = vrot.slane %v1289_v47, 9  ;;  %v1375_v61 = vrot.slane %v5209_v0, 5  ;;  %v1291_v10 = vld [vmem:[#allocation2 + $0x48] sm:$0xe] }
  0xa1   : > { %2819 = vrot.lane.b32.xlu1 %v4852_v21, %s5256_s25  ;;  %v1245_v34 = vrot.slane %v1244_v27, 4  ;;  %v880_v43 = vld [vmem:[#allocation2 + $0xb4] sm:$0xf]  ;;  %v1372_v52 = vsel %vm5346_vm8, %v1370_v45, %v1371_v33  ;;  %v4778_v6 = vrot.slane %v1288_v53, 9  ;;  %v5211_v20 = vld [vmem:[#allocation2 + $0x2c] sm:$0x1] }
  0xa2   : > { %v1262_v23 = vshrl.u32 %v880_v43, 16  ;;  %v1265_v50 = vshll.u32 %v880_v43, 16  ;;  %v1260_v22 = vsel %vm5396_vm14, %v1255_v46, %v1259_v44  ;;  %v4857_v57 = vcombine.low %v1369_v36, %v1372_v52  ;;  %v1290_v27 = vld [vmem:[#allocation2 + $0x3c] sm:$0xe]  ;;  %v1292_v0 = vld [vmem:[#allocation2 + $0x54] sm:$0xe] }
  0xa3   : > { %v1250_v5 = vsel %vm5396_vm14, %v1245_v34, %v1249_v7  ;;  %v5210_v7 = vld [vmem:[#allocation2 + $0x38] sm:$0x1]  ;;  %v1378_v21 = vrot.slane %v5211_v20, 5  ;;  %v1383_v29 = vsel %vm5346_vm8, %v4779_v49, %v1382_v3  ;;  %v1384_v30 = vrot.slane %v1382_v3, 4 }
  0xa4   : > { %v4853_v54 = vcombine.low %v1250_v5, %v1260_v22  ;;  %v5739_v58 = vld [vmem:[#allocation2 + $0xbc] sm:$0x1]  ;;  %v1264_v55 = vrot.slane %v1262_v23, 4  ;;  %v1267_v60 = vrot.slane %v1265_v50, 5  ;;  %v1385_v11 = vrot.slane %v5210_v7, 5 }
  0xa5   : > { %v5743_v63 = vld [vmem:[#allocation2 + $0xb8] sm:$0xf]  ;;  %v1281_v19 = vshll.u32 %v5739_v58, 16  ;;  %v1389_v33 = vrot.slane %v5495_v25, 5  ;;  %v1377_v34 = vrot.slane %v1375_v61, 4  ;;  %v4781_v46 = vrot.slane %v1291_v10, 9 }
  0xa6   : > { %2821 = vrot.lane.b32.xlu0 %v4853_v54, %s5256_s25  ;;  %v1268_v4 = vor.u32 %v1267_v60, %v1264_v55  ;;  %v1271_v17 = vshll.u32 %v5743_v63, 16  ;;  %v1275_v18 = vshrl.u32 %v5743_v63, 16  ;;  %v1386_v43 = vsel %vm5346_vm8, %v1384_v30, %v1385_v11  ;;  %v1293_v5 = vld [vmem:[#allocation2 + $0x60] sm:$0xe]  ;;  %v1295_v11 = vld [vmem:[#allocation2 + $0x78] sm:$0xe] }
  0xa7   : > { %v4780_v47 = vrot.slane %v1290_v27, 9  ;;  %v1396_v23 = vrot.slane %v5525_v15, 5  ;;  %v1399_v50 = vrot.slane %v5527_v16, 5  ;;  %v1283_v36 = vrot.slane %v1281_v19, 5 }
  0xa8   : > { %v1269_v40 = vrot.slane %v1268_v4, 4  ;;  %v1273_v44 = vrot.slane %v1271_v17, 5  ;;  %v1277_v45 = vrot.slane %v1275_v18, 4  ;;  %v4859_v52 = vcombine.low %v1383_v29, %v1386_v43 }
  0xa9   : > { %v1392_v25 = vrot.slane %v5506_v37, 5  ;;  %v1391_v54 = vrot.slane %v1389_v33, 4  ;;  %v1397_v55 = vsel %vm5346_vm8, %v4781_v46, %v1396_v23  ;;  %v1398_v60 = vrot.slane %v1396_v23, 4 }
  0xaa   : > { %2877 = vrot.lane.b32.xlu0 %v4857_v57, %s5255_s24  ;;  %v1278_v22 = vor.u32 %v1277_v45, %v1273_v44  ;;  %v1274_v53 = vsel %vm5396_vm14, %v1269_v40, %v1273_v44  ;;  %v1403_v15 = vrot.slane %v5534_v32, 5  ;;  %v4783_v3 = vrot.slane %v1293_v5, 9 }
  0xab   : > { %v1410_v16 = vrot.slane %v5568_v41, 5  ;;  %v1376_v4 = vsel %vm5346_vm8, %v4778_v6, %v1375_v61  ;;  %v1379_v37 = vsel %vm5346_vm8, %v1377_v34, %v1378_v21  ;;  %v1400_v57 = vsel %vm5346_vm8, %v1398_v60, %v1399_v50  ;;  %v1294_v61 = vld [vmem:[#allocation2 + $0x6c] sm:$0xe]  ;;  %v1297_v6 = vld [vmem:[#allocation2 + $0x90] sm:$0xe] }
  0xac   : > { %v1279_v49 = vrot.slane %v1278_v22, 4  ;;  %v1413_v7 = vrot.slane %v5578_v59, 5  ;;  %v4861_v10 = vcombine.low %v1397_v55, %v1400_v57  ;;  %v1390_v19 = vsel %vm5346_vm8, %v4780_v47, %v1389_v33  ;;  %v1298_v57 = vld [vmem:[#allocation2 + $0x9c] sm:$0xe] }
  0xad   : > { %v1411_v41 = vsel %vm5346_vm8, %v4783_v3, %v1410_v16  ;;  %v1412_v17 = vrot.slane %v1410_v16, 4  ;;  %v1393_v20 = vsel %vm5346_vm8, %v1391_v54, %v1392_v25  ;;  %v4782_v21 = vrot.slane %v1292_v0, 9 }
  0xae   : > { %2881 = vrot.lane.b32.xlu0 %v4859_v52, %s5255_s24  ;;  %v1284_v32 = vsel %vm5396_vm14, %v1279_v49, %v1283_v36  ;;  %v1405_v59 = vrot.slane %v1403_v15, 4  ;;  %v1406_v27 = vrot.slane %v5538_v35, 5  ;;  %v4785_v29 = vrot.slane %v1295_v11, 9 }
  0xaf   : > { %v4854_v18 = vcombine.low %v1274_v53, %v1284_v32  ;;  %v1414_v40 = vsel %vm5346_vm8, %v1412_v17, %v1413_v7  ;;  %v4858_v30 = vcombine.low %v1376_v4, %v1379_v37  ;;  %v1417_v45 = vrot.slane %v5598_v38, 5  ;;  %v1296_v38 = vld [vmem:[#allocation2 + $0x84] sm:$0xe]  ;;  %v1299_v53 = vld [vmem:[#allocation2 + $0xa8] sm:$0xe] }
  0xb0   : > { %v4863_v44 = vcombine.low %v1411_v41, %v1414_v40  ;;  %v1424_v33 = vrot.slane %v5615_v8, 5  ;;  %v4784_v34 = vrot.slane %v1294_v61, 9  ;;  %v1427_v46 = vrot.slane %v5617_v9, 5  ;;  %v1464_v32 = vld [vmem:[#allocation2 + $0xc] sm:$0xf] }
  0xb1   : > { %2823 = vrot.lane.b32.xlu1 %v4854_v18, %s5256_s25  ;;  %v4860_v43 = vcombine.low %v1390_v19, %v1393_v20  ;;  %v4787_v23 = vrot.slane %v1297_v6, 9  ;;  %v1404_v50 = vsel %vm5346_vm8, %v4782_v21, %v1403_v15  ;;  %v1407_v5 = vsel %vm5346_vm8, %v1405_v59, %v1406_v27  ;;  %v5826_v18 = vld [vmem:[#allocation2 + $0x1c] sm:$0xf]  ;;  %v1468_v59 = vld [vmem:[#allocation2 + $0x24] sm:$0xf] }
  0xb2   : > { %2885 = vrot.lane.b32.xlu0 %v4861_v10, %s5255_s24  ;;  %v1425_v35 = vsel %vm5346_vm8, %v4785_v29, %v1424_v33  ;;  %v1426_v47 = vrot.slane %v1424_v33, 4  ;;  %v1420_v22 = vrot.slane %v5604_v51, 5  ;;  %v1438_v8 = vrot.slane %v5680_v28, 5  ;;  %v5820_v10 = vld [vmem:[#allocation2 + $0x18] sm:$0xf] }
  0xb3   : > { %v1419_v9 = vrot.slane %v1417_v45, 4  ;;  %v1431_v52 = vrot.slane %v5638_v62, 5  ;;  %v1441_v25 = vrot.slane %v5683_v39, 5  ;;  %v4862_v60 = vcombine.low %v1404_v50, %v1407_v5  ;;  %v5833_v27 = vld [vmem:[#allocation2 + $0x28] sm:$0xf] }
  0xb4   : > { %v1428_v36 = vsel %vm5346_vm8, %v1426_v47, %v1427_v46  ;;  %v1439_v51 = vsel %vm5346_vm8, %v4787_v23, %v1438_v8  ;;  %v1440_v55 = vrot.slane %v1438_v8, 4  ;;  %v1418_v28 = vsel %vm5346_vm8, %v4784_v34, %v1417_v45  ;;  %v5835_v40 = vld [vmem:[#allocation2 + $0x30] sm:$0xf]  ;;  %v5837_v29 = vld [vmem:[#allocation2 + $0x34] sm:$0xf] }
  0xb5   : > { %2879 = vrot.lane.b32.xlu1 %v4858_v30, %s5255_s24  ;;  %v4865_v54 = vcombine.low %v1425_v35, %v1428_v36  ;;  %v4786_v49 = vrot.slane %v1296_v38, 9  ;;  %v1434_v0 = vrot.slane %v5647_v13, 5  ;;  %v4789_v3 = vrot.slane %v1299_v53, 9  ;;  %v5839_v30 = vld [vmem:[#allocation2 + $0x3c] sm:$0xf] }
  0xb6   : > { %2889 = vrot.lane.b32.xlu0 %v4863_v44, %s5255_s24  ;;  %v1442_v15 = vsel %vm5346_vm8, %v1440_v55, %v1441_v25  ;;  %v1452_v62 = vrot.slane %v5714_v56, 5  ;;  %v1455_v39 = vrot.slane %v5720_v31, 5  ;;  %v1421_v16 = vsel %vm5346_vm8, %v1419_v9, %v1420_v22  ;;  %v5818_v31 = vld [vmem:[#allocation2 + $0x10] sm:$0xf]  ;;  %v5842_v34 = vld [vmem:[#allocation2 + $0x40] sm:$0xf] }
  0xb7   : > { %v1433_v4 = vrot.slane %v1431_v52, 4  ;;  %v4867_v37 = vcombine.low %v1439_v51, %v1442_v15  ;;  %v1445_v13 = vrot.slane %v5699_v12, 5  ;;  %v1459_v56 = vrot.slane %v5743_v63, 5  ;;  %v1300_v12 = vld [vmem:[#allocation2 + $0xb4] sm:$0xe] }
  0xb8   : > { %v1453_v7 = vsel %vm5346_vm8, %v4789_v3, %v1452_v62  ;;  %v1454_v11 = vrot.slane %v1452_v62, 4  ;;  %v4864_v41 = vcombine.low %v1418_v28, %v1421_v16  ;;  %v1432_v17 = vsel %vm5346_vm8, %v4786_v49, %v1431_v52  ;;  %v5848_v47 = vld [vmem:[#allocation2 + $0x48] sm:$0xf]  ;;  %v5850_v23 = vld [vmem:[#allocation2 + $0x4c] sm:$0xf] }
  0xb9   : > { %2883 = vrot.lane.b32.xlu1 %v4860_v43, %s5255_s24  ;;  %v4788_v61 = vrot.slane %v1298_v57, 9  ;;  %v1435_v63 = vsel %vm5346_vm8, %v1433_v4, %v1434_v0  ;;  %v1447_v19 = vrot.slane %v1445_v13, 4  ;;  %v1448_v20 = vrot.slane %v5701_v14, 5  ;;  %v5880_v62 = vld [vmem:[#allocation2 + $0x6c] sm:$0xf] }
  0xba   : > { %2893 = vrot.lane.b32.xlu0 %v4865_v54, %s5255_s24  ;;  %v1456_v6 = vsel %vm5346_vm8, %v1454_v11, %v1455_v39  ;;  %v4790_v44 = vrot.slane %v1300_v12, 9  ;;  %v1461_v45 = vrot.slane %v1459_v56, 4  ;;  %v1462_v33 = vrot.slane %v5739_v58, 5 }
  0xbb   : > { %v4869_v21 = vcombine.low %v1453_v7, %v1456_v6  ;;  %v4866_v46 = vcombine.low %v1432_v17, %v1435_v63  ;;  %v4871_v43 = vcombine.low %v1464_v32, %v5818_v31  ;;  %v4872_v14 = vcombine.low %v5820_v10, %v5826_v18  ;;  %v5900_v6 = vld [vmem:[#allocation2 + $0x78] sm:$0xf] }
  0xbc   : > { %v4873_v35 = vcombine.low %v1468_v59, %v5833_v27  ;;  %v1446_v50 = vsel %vm5346_vm8, %v4788_v61, %v1445_v13  ;;  %v1449_v58 = vsel %vm5346_vm8, %v1447_v19, %v1448_v20  ;;  %v1513_v5 = vshrl.u32 %v1464_v32, 16  ;;  %v5909_v20 = vld [vmem:[#allocation2 + $0x70] sm:$0xf] }
  0xbd   : > { %2887 = vrot.lane.b32.xlu1 %v4862_v60, %s5255_s24  ;;  %v1516_v22 = vshll.u32 %v1464_v32, 16  ;;  %v1537_v38 = vshrl.u32 %v5820_v10, 16  ;;  %v1540_v8 = vshll.u32 %v5820_v10, 16  ;;  %v4874_v9 = vcombine.low %v5835_v40, %v5837_v29  ;;  %v5965_v10 = vld [vmem:[#allocation2 + $0x60] sm:$0xf] }
  0xbe   : > { %2897 = vrot.lane.b32.xlu0 %v4867_v37, %s5255_s24  ;;  %v4875_v36 = vcombine.low %v5839_v30, %v5842_v34  ;;  %v1460_v52 = vsel %vm5346_vm8, %v4790_v44, %v1459_v56  ;;  %v1463_v25 = vsel %vm5346_vm8, %v1461_v45, %v1462_v33  ;;  %v1561_v53 = vshrl.u32 %v1468_v59, 16  ;;  %v5892_v56 = vld [vmem:[#allocation2 + $0x54] sm:$0xf]  ;;  %v5916_v45 = vld [vmem:[#allocation2 + $0x58] sm:$0xf] }
  0xbf   : > { %v4876_v54 = vcombine.low %v5848_v47, %v5850_v23  ;;  %v4868_v51 = vcombine.low %v1446_v50, %v1449_v58  ;;  %v1526_v55 = vshrl.u32 %v5818_v31, 16  ;;  %v1564_v60 = vshll.u32 %v1468_v59, 16  ;;  %7906 = vst [vmem:[#allocation6_spill] sm:$0xff] %v5916_v45  ;;  %v5920_v50 = vld [vmem:[#allocation2 + $0x7c] sm:$0xf] }
  0xc0   : > { %v1585_v28 = vshrl.u32 %v5835_v40, 16  ;;  %v5873_v49 = vrot.slane %v1513_v5, 4  ;;  %v5875_v0 = vrot.slane %v1516_v22, 5  ;;  %v1588_v15 = vshll.u32 %v5835_v40, 16 }
  0xc1   : > { %2891 = vrot.lane.b32.xlu1 %v4864_v41, %s5255_s24  ;;  %v1609_v3 = vshrl.u32 %v5839_v30, 16  ;;  %v4870_v39 = vcombine.low %v1460_v52, %v1463_v25  ;;  %v5882_v16 = vrot.slane %v1537_v38, 4  ;;  %v5884_v4 = vrot.slane %v1540_v8, 5  ;;  %v5928_v52 = vld [vmem:[#allocation2 + $0x14] sm:$0x1] }
  0xc2   : > { %2901 = vrot.lane.b32.xlu0 %v4869_v21, %s5255_s24  ;;  %v1612_v37 = vshll.u32 %v5839_v30, 16  ;;  %v1550_v57 = vshrl.u32 %v5826_v18, 16  ;;  %v5888_v13 = vrot.slane %v1561_v53, 4  ;;  %v5894_v32 = vrot.slane %v1564_v60, 5  ;;  %v5963_v25 = vld [vmem:[#allocation2 + $0x80] sm:$0x1] }
  0xc3   : > { %v5896_v41 = vrot.slane %v1585_v28, 4  ;;  %v1633_v17 = vshrl.u32 %v5848_v47, 16  ;;  %v1705_v61 = vshrl.u32 %v5880_v62, 16  ;;  %v5904_v12 = vrot.slane %v1588_v15, 5  ;;  %v5938_v28 = vld [vmem:[#allocation2 + $0x84] sm:$0xf] }
  0xc4   : > { %v5906_v63 = vrot.slane %v1609_v3, 4  ;;  %v1708_v21 = vshll.u32 %v5880_v62, 16  ;;  %v5912_v59 = vrot.slane %v1612_v37, 5  ;;  %v1636_v30 = vshll.u32 %v5848_v47, 16  ;;  %v5940_v15 = vld [vmem:[#allocation2 + $0x74] sm:$0x1] }
  0xc5   : > { %2895 = vrot.lane.b32.xlu1 %v4866_v46, %s5255_s24  ;;  %v1657_v33 = vshrl.u32 %v5892_v56, 16  ;;  %v1729_v58 = vshrl.u32 %v5900_v6, 16  ;;  %v5923_v5 = vrot.slane %v1633_v17, 4  ;;  %v1718_v38 = vshrl.u32 %v5909_v20, 16 }
  0xc6   : > { %2969 = vrot.lane.b32.xlu0 %v4871_v43, %s5257_s26  ;;  %v1707_v43 = vrot.slane %v1705_v61, 4  ;;  %v1732_v8 = vshll.u32 %v5900_v6, 16  ;;  %v4879_v60 = vcombine.low %v5880_v62, %v5909_v20  ;;  %v1742_v37 = vshrl.u32 %v5920_v50, 16 }
  0xc7   : > { %v1731_v3 = vrot.slane %v1729_v58, 4  ;;  %v1522_v17 = vshll.u32 %v5818_v31, 16  ;;  %v1528_v61 = vrot.slane %v1526_v55, 4  ;;  %v1714_v62 = vshll.u32 %v5909_v20, 16 }
  0xc8   : > { %v1734_v44 = vrot.slane %v1732_v8, 5  ;;  %v1720_v11 = vrot.slane %v1718_v38, 4  ;;  %v1724_v58 = vshll.u32 %v5940_v15, 16  ;;  %v1543_v38 = vor.u32 %v5884_v4, %v5882_v16 }
  0xc9   : > { %2899 = vrot.lane.b32.xlu1 %v4868_v51, %s5255_s24  ;;  %v4877_v51 = vcombine.low %v5892_v56, %v5916_v45  ;;  %v1524_v19 = vrot.slane %v1522_v17, 5  ;;  %v1546_v7 = vshll.u32 %v5826_v18, 16  ;;  %v1965_v47 = vrot.slane %v5928_v52, 5 }
  0xca   : > { %2973 = vrot.lane.b32.xlu0 %v4873_v35, %s5257_s26  ;;  %v1710_v35 = vrot.slane %v1708_v21, 5  ;;  %v1532_v21 = vshll.u32 %v5928_v52, 16  ;;  %v1735_v4 = vor.u32 %v1734_v44, %v1731_v3  ;;  %vm3466_vm1 = vcmask 195584  }
  0xcb   : > { %v1529_v8 = vor.u32 %v1528_v61, %v1524_v19  ;;  %v1552_v61 = vrot.slane %v1550_v57, 4  ;;  %v5983_v57 = vrot.slane %v1657_v33, 4  ;;  %v1544_v33 = vrot.slane %v1543_v38, 4 }
  0xcc   : > { %v1711_v53 = vor.u32 %v1710_v35, %v1707_v43  ;;  %v1716_v43 = vrot.slane %v1714_v62, 5  ;;  %v5958_v35 = vld [vmem:[#allocation2 + $0x20] sm:$0x1]  ;;  %v1534_v17 = vrot.slane %v1532_v21, 5  ;;  %v1548_v62 = vrot.slane %v1546_v7, 5 }
  0xcd   : > { %2903 = vrot.lane.b32.xlu1 %v4870_v39, %s5255_s24  ;;  %v5943_v39 = vld [vmem:[#allocation2 + $0x88] sm:$0xf]  ;;  %v1530_v21 = vrot.slane %v1529_v8, 4  ;;  %v1556_v16 = vshll.u32 %v5958_v35, 16  ;;  %v1896_v8 = vld [vmem:[#allocation2 + $0xc] sm:$0xe] }
  0xce   : > { %2977 = vrot.lane.b32.xlu0 %v4875_v36, %s5257_s26  ;;  %v1519_v36 = vor.u32 %v5875_v0, %v5873_v49  ;;  %v4881_v55 = vcombine.low %v5938_v28, %v5943_v39  ;;  %v1712_v0 = vrot.slane %v1711_v53, 4  ;;  %v1721_v53 = vor.u32 %v1720_v11, %v1716_v43  ;;  %s5026_s24 = sshll.u32 %s7983_s19, 8 }
  0xcf   : > { %v1744_v11 = vrot.slane %v1742_v37, 4  ;;  %v1553_v44 = vor.u32 %v1552_v61, %v1548_v62  ;;  %v1904_v37 = vld [vmem:[#allocation2 + $0x6c] sm:$0xe]  ;;  %v1558_v46 = vrot.slane %v1556_v16, 5  ;;  %v4791_v61 = vrot.slane %v1896_v8, 9 }
  0xd0   : > { %v1520_v49 = vrot.slane %v1519_v36, 4  ;;  %v1726_v36 = vrot.slane %v1724_v58, 5  ;;  %v1722_v22 = vrot.slane %v1721_v53, 4  ;;  %v1748_v58 = vshll.u32 %v5963_v25, 16 }
  0xd1   : > { %2971 = vrot.lane.b32.xlu1 %v4872_v14, %s5257_s26  ;;  %v5967_v14 = vld [vmem:[#allocation2 + $0x64] sm:$0xf]  ;;  %v2025_v8 = vrot.slane %v5920_v50, 5  ;;  %vm3499_vm2 = vcmask 293888   ;;  %vm3532_vm4 = vcmask 392192   ;;  %vm3565_vm6 = vcmask 490496  }
  0xd2   : > { %2981 = vrot.lane.b32.xlu0 %v4877_v51, %s5257_s26  ;;  %v1717_v51 = vsel %vm5396_vm14, %v1712_v0, %v1716_v43  ;;  %v1738_v0 = vshll.u32 %v5920_v50, 16  ;;  %v5981_v43 = vrot.slane %v1636_v30, 5  ;;  %v4878_v7 = vcombine.low %v5965_v10, %v5967_v14 }
  0xd3   : > { %v1525_v40 = vsel %vm5396_vm14, %v1520_v49, %v1524_v19  ;;  %v1535_v30 = vsel %vm5396_vm14, %v1530_v21, %v1534_v17  ;;  %v1554_v19 = vrot.slane %v1553_v44, 4  ;;  %v2021_v17 = vrot.slane %v5940_v15, 5  ;;  %v6020_v44 = vld [vmem:[#allocation2 + $0x18] sm:$0xf] }
  0xd4   : > { %v1740_v3 = vrot.slane %v1738_v0, 5  ;;  %v2018_v0 = vrot.slane %v5909_v20, 5  ;;  %v4887_v16 = vcombine.low %v1525_v40, %v1535_v30  ;;  %v7907_v20 = vshll.u32 %v5892_v56, 16 }
  0xd5   : > { %2975 = vrot.lane.b32.xlu1 %v4874_v9, %s5257_s26  ;;  %v1727_v9 = vsel %vm5396_vm14, %v1722_v22, %v1726_v36  ;;  %v1750_v22 = vrot.slane %v1748_v58, 5  ;;  %v1962_v36 = vrot.slane %v5818_v31, 5  ;;  %v1549_v31 = vsel %vm5396_vm14, %v1544_v33, %v1548_v62  ;;  %v1897_v62 = vld [vmem:[#allocation2 + $0x18] sm:$0xe]  ;;  %v6037_v33 = vld [vmem:[#allocation2 + $0x1c] sm:$0xf] }
  0xd6   : > { %2985 = vrot.lane.b32.xlu0 %v4879_v60, %s5257_s26  ;;  %v1736_v60 = vrot.slane %v1735_v4, 4  ;;  %v4895_v53 = vcombine.low %v1717_v51, %v1727_v9  ;;  %v1745_v49 = vor.u32 %v1744_v11, %v1740_v3  ;;  %v4799_v4 = vrot.slane %v1904_v37, 9 }
  0xd7   : > { %v1964_v21 = vrot.slane %v1962_v36, 4  ;;  %v2020_v11 = vrot.slane %v2018_v0, 4  ;;  %v6010_v58 = vrot.slane %v7907_v20, 5  ;;  %v1559_v52 = vsel %vm5396_vm14, %v1554_v19, %v1558_v46 }
  0xd8   : > { %v1741_v38 = vsel %vm5396_vm14, %v1736_v60, %v1740_v3  ;;  %v1746_v51 = vrot.slane %v1745_v49, 4  ;;  %v2019_v15 = vsel %vm5346_vm8, %v4799_v4, %v2018_v0  ;;  %v6025_v60 = vld [vmem:[#allocation2 + $0x78] sm:$0xf]  ;;  %v6029_v46 = vsel %vm5346_vm8, %v4791_v61, %v1962_v36  ;;  %v6045_v61 = vld [vmem:[#allocation2 + $0x24] sm:$0xf] }
  0xd9   : > { %2979 = vrot.lane.b32.xlu1 %v4876_v54, %s5257_s26  ;;  %v1905_v54 = vld [vmem:[#allocation2 + $0x78] sm:$0xe]  ;;  %v2022_v40 = vsel %vm5346_vm8, %v2020_v11, %v2021_v17  ;;  %v6033_v3 = vsel %vm5346_vm8, %v1964_v21, %v1965_v47  ;;  %v2028_v37 = vrot.slane %v5963_v25, 5  ;;  %v4888_v30 = vcombine.low %v1549_v31, %v1559_v52  ;;  %v6051_v17 = vld [vmem:[#allocation2 + $0x7c] sm:$0xf] }
  0xda   : > { %2989 = vrot.lane.b32.xlu0 %v4881_v55, %s5257_s26  ;;  %v4880_v55 = vcombine.low %v5900_v6, %v5920_v50  ;;  %v1751_v6 = vsel %vm5396_vm14, %v1746_v51, %v1750_v22  ;;  %v4800_v9 = vrot.slane %v1905_v54, 9  ;;  %v2125_v19 = vshll.u32 %v6020_v44, 16  ;;  %v6054_v51 = vld [vmem:[#allocation2 + $0x84] sm:$0xf] }
  0xdb   : > { %v4896_v56 = vcombine.low %v1741_v38, %v1751_v6  ;;  %v4911_v49 = vcombine.low %v2019_v15, %v2022_v40  ;;  %v1972_v22 = vrot.slane %v5958_v35, 5  ;;  %v2027_v36 = vrot.slane %v2025_v8, 4 }
  0xdc   : > { %v2314_v50 = vshrl.u32 %v6025_v60, 16  ;;  %v4903_v25 = vcombine.low %v6029_v46, %v6033_v3  ;;  %v2026_v0 = vsel %vm5346_vm8, %v4800_v9, %v2025_v8  ;;  %v2317_v38 = vshll.u32 %v6025_v60, 16  ;;  %v6079_v3 = vld [vmem:[#allocation2 + $0x80] sm:$0x1] }
  0xdd   : > { %2983 = vrot.lane.b32.xlu1 %v4878_v7, %s5257_s26  ;;  %v1969_v7 = vrot.slane %v5826_v18, 5  ;;  %v2122_v18 = vshrl.u32 %v6020_v44, 16  ;;  %v2029_v35 = vsel %vm5346_vm8, %v2027_v36, %v2028_v37  ;;  %v2127_v47 = vrot.slane %v2125_v19, 5 }
  0xde   : > { %3065 = vrot.lane.b32.xlu0 %v4895_v53, %s5258_s27  ;;  %v4792_v53 = vrot.slane %v1897_v62, 9  ;;  %v2135_v54 = vshrl.u32 %v6037_v33, 16  ;;  %v2316_v31 = vrot.slane %v2314_v50, 4  ;;  %v2319_v11 = vrot.slane %v2317_v38, 5 }
  0xdf   : > { %v1971_v4 = vrot.slane %v1969_v7, 4  ;;  %v2124_v21 = vrot.slane %v2122_v18, 4  ;;  %v2146_v20 = vshrl.u32 %v6045_v61, 16  ;;  %v2149_v52 = vshll.u32 %v6045_v61, 16  ;;  %v6085_v18 = vld [vmem:[#allocation2 + $0x88] sm:$0xf] }
  0xe0   : > { %v4912_v6 = vcombine.low %v2026_v0, %v2029_v35  ;;  %v2327_v15 = vshrl.u32 %v6051_v17, 16  ;;  %v2338_v62 = vshrl.u32 %v6054_v51, 16  ;;  %v6070_v40 = vsel %vm5346_vm8, %v4792_v53, %v1969_v7  ;;  %v6088_v53 = vpop.permute.xlu0 %2873 }
  0xe1   : > { %2987 = vrot.lane.b32.xlu1 %v4880_v55, %s5257_s26  ;;  %v6059_v55 = vld [vmem:[#allocation2 + $0x28] sm:$0xf]  ;;  %v6074_v9 = vsel %vm5346_vm8, %v1971_v4, %v1972_v22  ;;  %v6081_v8 = vrot.slane %v2146_v20, 4  ;;  %v6083_v37 = vrot.slane %v2149_v52, 5  ;;  %v2131_v7 = vshll.u32 %v6037_v33, 16 }
  0xe2   : > { %3067 = vrot.lane.b32.xlu0 %v4896_v56, %s5258_s27  ;;  %v2341_v56 = vshll.u32 %v6054_v51, 16  ;;  %v2159_v46 = vshrl.u32 %v6059_v55, 16  ;;  %v2340_v19 = vrot.slane %v2338_v62, 4  ;;  %v2128_v22 = vor.u32 %v2127_v47, %v2124_v21 }
  0xe3   : > { %v2137_v36 = vrot.slane %v2135_v54, 4  ;;  %v2323_v50 = vshll.u32 %v6051_v17, 16  ;;  %v6095_v0 = vrot.slane %v2131_v7, 5  ;;  %v2329_v38 = vrot.slane %v2327_v15, 4  ;;  %v5194_v7 = vld [vmem:[%s7861_s2] sm:$0xff]  }
  0xe4   : > { %v2343_v4 = vrot.slane %v2341_v56, 5  ;;  %v2333_v35 = vshll.u32 %v6079_v3, 16  ;;  %v4904_v20 = vcombine.low %v6070_v40, %v6074_v9  ;;  %v2351_v52 = vshrl.u32 %v6085_v18, 16  ;;  %v6110_v40 = vld [vmem:[#allocation2 + $0x2c] sm:$0x1]  ;;  %5084 = vmatprep.subr.bf16.mxu0 %v5194_v7  ;;  %5130 = vmatprep.subr.bf16.mxu1 %v5194_v7 }
  0xe5   : > { %3049 = vrot.lane.b32.xlu1 %v4887_v16, %s5258_s27  ;;  %v4927_v16 = vcombine.low %v6025_v60, %v6051_v17  ;;  %v2320_v60 = vor.u32 %v2319_v11, %v2316_v31  ;;  %v2325_v47 = vrot.slane %v2323_v50, 5  ;;  %v4928_v54 = vcombine.low %v6054_v51, %v6085_v18  ;;  %v6123_v50 = vpop.permute.xlu0 %2793  ;;  %5085 = vmatpush3.bf16.msra.mxu0 %v5194_v7 }
  0xe6   : > { %3145 = vrot.lane.b32.xlu0 %v4911_v49, %s5259_s28  ;;  %v6090_v49 = vld [vmem:[#allocation2 + $0x20] sm:$0x1]  ;;  %v2155_v11 = vshll.u32 %v6059_v55, 16  ;;  %v6108_v15 = vrot.slane %v2128_v22, 4  ;;  %v2335_v56 = vrot.slane %v2333_v35, 5  ;;  %v2161_v9 = vrot.slane %v2159_v46, 4  ;;  %5137 = vmatpush3.bf16.msra.mxu1 %v5194_v7 }
  0xe7   : > { %v2321_v21 = vrot.slane %v2320_v60, 4  ;;  %v2141_v31 = vshll.u32 %v6090_v49, 16  ;;  %v2330_v62 = vor.u32 %v2329_v38, %v2325_v47  ;;  %v2152_v22 = vor.u32 %v6083_v37, %v6081_v8  ;;  %v2513_v7 = vld [vmem:[#allocation2 + $0x78] sm:$0xe] }
  0xe8   : > { %v2344_v60 = vor.u32 %v2343_v4, %v2340_v19  ;;  %v2347_v38 = vshll.u32 %v6085_v18, 16  ;;  %v2353_v35 = vrot.slane %v2351_v52, 4  ;;  %v7908_v8 = vshll.u32 %v5916_v45, 16 }
  0xe9   : > { %3051 = vrot.lane.b32.xlu1 %v4888_v30, %s5258_s27  ;;  %v2138_v30 = vor.u32 %v2137_v36, %v6095_v0  ;;  %v2326_v51 = vsel %vm5396_vm14, %v2321_v21, %v2325_v47  ;;  %v6121_v36 = vrot.slane %v2155_v11, 5  ;;  %v2331_v46 = vrot.slane %v2330_v62, 4 }
  0xea   : > { %3147 = vrot.lane.b32.xlu0 %v4912_v6, %s5259_s28  ;;  %v6106_v6 = vld [vmem:[#allocation2 + $0x8c] sm:$0x1]  ;;  %v2143_v2 = vrot.slane %v2141_v31, 5  ;;  %v2165_v47 = vshll.u32 %v6110_v40, 16  ;;  %v6131_v37 = vrot.slane %v7908_v8, 5  ;;  %v2345_v4 = vrot.slane %v2344_v60, 4 }
  0xeb   : > { %v2162_v21 = vor.u32 %v2161_v9, %v6121_v36  ;;  %v2336_v19 = vsel %vm5396_vm14, %v2331_v46, %v2335_v56  ;;  %v2349_v52 = vrot.slane %v2347_v38, 5  ;;  %v7909_v31 = vshrl.u32 %v5916_v45, 16 }
  0xec   : > { %v4919_v9 = vcombine.low %v6020_v44, %v6037_v33  ;;  %v4943_v56 = vcombine.low %v2326_v51, %v2336_v19  ;;  %v2134_v60 = vsel %vm5396_vm14, %v6108_v15, %v6095_v0  ;;  %v2153_v46 = vrot.slane %v2152_v22, 4  ;;  %v6157_v51 = vpop.permute.xlu0 %2795  ;;  %v2505_v15 = vld [vmem:[#allocation2 + $0x18] sm:$0xe] }
  0xed   : > { %3129 = vrot.lane.b32.xlu1 %v4903_v25, %s5259_s28  ;;  %v2357_v25 = vshll.u32 %v6106_v6, 16  ;;  %v6140_v11 = vrot.slane %v7909_v31, 4  ;;  %v2354_v38 = vor.u32 %v2353_v35, %v2349_v52  ;;  %v2163_v31 = vrot.slane %v2162_v21, 4 }
  0xee   : > { %3241 = vrot.lane.b32.xlu0 %v4927_v16, %s5260_s6  ;;  %v2139_v16 = vrot.slane %v2138_v30, 4  ;;  %v5196_v30 = vld [vmem:[%s7861_s2 + $0x8] sm:$0xff]   ;;  %v2167_v62 = vrot.slane %v2165_v47, 5  ;;  %v2350_v44 = vsel %vm5396_vm14, %v2345_v4, %v2349_v52  ;;  %v2571_v22 = vrot.slane %v6037_v33, 5  ;;  %v2506_v4 = vld [vmem:[#allocation2 + $0x24] sm:$0xe] }
  0xef   : > { %7910 = vst [vmem:[#allocation7_spill] sm:$0xff] %v6140_v11  ;;  %v2359_v8 = vrot.slane %v2357_v25, 5  ;;  %5086 = vmatprep.subr.bf16.mxu0 %v5196_v30  ;;  %5131 = vmatprep.subr.bf16.mxu1 %v5196_v30  ;;  %v2355_v0 = vrot.slane %v2354_v38, 4  ;;  %v4815_v35 = vrot.slane %v2513_v7, 9  ;;  %v2627_v25 = vrot.slane %v6051_v17, 5 }
  0xf0   : > { %5087 = vmatpush3.bf16.msra.mxu0 %v5196_v30  ;;  %5138 = vmatpush3.bf16.msra.mxu1 %v5196_v30  ;;  %v4920_v21 = vcombine.low %v6045_v61, %v6059_v55  ;;  %v2630_v47 = vrot.slane %v6079_v3, 5  ;;  %v2158_v33 = vsel %vm5396_vm14, %v2153_v46, %v6121_v36  ;;  %v2514_v52 = vld [vmem:[#allocation2 + $0x84] sm:$0xe]  ;;  %v2168_v61 = vsel %vm5396_vm14, %v2163_v31, %v2167_v62  ;;  %v6186_v31 = vpop.permute.xlu0 %2801 }
  0xf1   : > { %3131 = vrot.lane.b32.xlu1 %v4904_v20, %s5259_s28  ;;  %v2144_v20 = vsel %vm5396_vm14, %v2139_v16, %v2143_v2  ;;  %v1753_v2 = vshrl.u32 %v5938_v28, 16  ;;  %v1756_v16 = vshll.u32 %v5938_v28, 16  ;;  %v2360_v17 = vsel %vm5396_vm14, %v2355_v0, %v2359_v8 }
  0xf2   : > { %3243 = vrot.lane.b32.xlu0 %v4928_v54, %s5260_s6  ;;  %v6155_v54 = vpop.permute.xlu1 %2875  ;;  %v2628_v28 = vsel %vm5346_vm8, %v4815_v35, %v2627_v25  ;;  %v2629_v19 = vrot.slane %v2627_v25, 4  ;;  %v4935_v30 = vcombine.low %v2134_v60, %v2144_v20  ;;  %v2573_v3 = vrot.slane %v2571_v22, 4 }
  0xf3   : > { %v2574_v7 = vrot.slane %v6090_v49, 5  ;;  %v2578_v46 = vrot.slane %v6059_v55, 5  ;;  %v4808_v60 = vrot.slane %v2506_v4, 9  ;;  %v4816_v20 = vrot.slane %v2514_v52, 9 }
  0xf4   : > { %v2631_v36 = vsel %vm5346_vm8, %v2629_v19, %v2630_v47  ;;  %v2634_v62 = vrot.slane %v6085_v18, 5  ;;  %v1684_v49 = vshll.u32 %v5965_v10, 16  ;;  %v2581_v0 = vrot.slane %v6110_v40, 5  ;;  %v6200_v40 = vld [vmem:[#allocation2 + $0x2c] sm:$0x1] }
  0xf5   : > { %3225 = vrot.lane.b32.xlu1 %v4919_v9, %s5260_s6  ;;  %v4944_v9 = vcombine.low %v2350_v44, %v2360_v17  ;;  %v4959_v38 = vcombine.low %v2628_v28, %v2631_v36  ;;  %v2580_v44 = vrot.slane %v2578_v46, 4  ;;  %v2637_v55 = vrot.slane %v6106_v6, 5 }
  0xf6   : > { %3321 = vrot.lane.b32.xlu0 %v4943_v56, %s5261_s9  ;;  %v4807_v56 = vrot.slane %v2505_v15, 9  ;;  %v6183_v8 = vpop.permute.xlu1 %2797  ;;  %v6191_v15 = vld [vmem:[#allocation2 + $0x90] sm:$0xf]  ;;  %v1663_v35 = vor.u32 %v6010_v58, %v5983_v57  ;;  %v1766_v25 = vshrl.u32 %v5943_v39, 16  ;;  %v2636_v18 = vrot.slane %v2634_v62, 4 }
  0xf7   : > { %7911 = vst [vmem:[#allocation8_spill] sm:$0xff] %v6183_v8  ;;  %v1755_v47 = vrot.slane %v1753_v2, 4  ;;  %v1758_v17 = vrot.slane %v1756_v16, 5  ;;  %v4936_v28 = vcombine.low %v2158_v33, %v2168_v61  ;;  %v2575_v6 = vsel %vm5346_vm8, %v2573_v3, %v2574_v7  ;;  %v6350_v57 = vld [vmem:[#allocation2 + $0x34] sm:$0xf] }
  0xf8   : > { %v2572_v19 = vsel %vm5346_vm8, %v4807_v56, %v2571_v22  ;;  %v6208_v4 = vsel %vm5346_vm8, %v4808_v60, %v2578_v46  ;;  %v2638_v2 = vsel %vm5346_vm8, %v2636_v18, %v2637_v55  ;;  %v1777_v16 = vshrl.u32 %v6191_v15, 16  ;;  %v5198_v22 = vld [vmem:[%s7861_s2 + $0x10] sm:$0xff]   ;;  %v6232_v60 = vld [vmem:[#allocation2 + $0x8c] sm:$0x1]  ;;  %v5199_v18 = vld [vmem:[%s7861_s2 + $0x18] sm:$0xff]  }
  0xf9   : > { %3227 = vrot.lane.b32.xlu1 %v4920_v21, %s5260_s6  ;;  %v2635_v21 = vsel %vm5346_vm8, %v4816_v20, %v2634_v62  ;;  %v6218_v33 = vsel %vm5346_vm8, %v2580_v44, %v2581_v0  ;;  %v1567_v61 = vor.u32 %v5894_v32, %v5888_v13  ;;  %v1570_v3 = vshll.u32 %v5833_v27, 16  ;;  %5088 = vmatprep.subr.bf16.mxu0 %v5198_v22 }
  0xfa   : > { %3323 = vrot.lane.b32.xlu0 %v4944_v9, %s5261_s9  ;;  %v4960_v52 = vcombine.low %v2635_v21, %v2638_v2  ;;  %v6224_v56 = vpop.permute.xlu1 %2799  ;;  %v7913_v7 = vshrl.u32 %v5833_v27, 16  ;;  %v1580_v46 = vshll.u32 %v6200_v40, 16  ;;  %5132 = vmatprep.subr.bf16.mxu1 %v5198_v22  ;;  %v4951_v20 = vcombine.low %v2572_v19, %v2575_v6  ;;  %v6245_v2 = vld [vmem:[#allocation2 + $0x38] sm:$0x1] }
  0xfb   : > { %7912 = vst [vmem:[#allocation9_spill] sm:$0xff] %v6224_v56  ;;  %v1568_v62 = vrot.slane %v1567_v61, 4  ;;  %v1759_v13 = vor.u32 %v1758_v17, %v1755_v47  ;;  %v1762_v32 = vshll.u32 %v5943_v39, 16  ;;  %5089 = vmatpush3.bf16.msra.mxu0 %v5198_v22  ;;  %5139 = vmatpush3.bf16.msra.mxu1 %v5198_v22  ;;  %v4952_v44 = vcombine.low %v6208_v4, %v6218_v33 }
  0xfc   : > { %v1576_v36 = vrot.slane %v7913_v7, 4  ;;  %v1779_v0 = vrot.slane %v1777_v16, 4  ;;  %v1572_v55 = vrot.slane %v1570_v3, 5  ;;  %v1768_v21 = vrot.slane %v1766_v25, 4  ;;  %5090 = vmatprep.subr.bf16.mxu0 %v5199_v18  ;;  %5133 = vmatprep.subr.bf16.mxu1 %v5199_v18 }
  0xfd   : > { %3305 = vrot.lane.b32.xlu1 %v4935_v30, %s5261_s9  ;;  %v1780_v30 = vshll.u32 %v6191_v15, 16  ;;  %v1582_v47 = vrot.slane %v1580_v46, 5  ;;  %v6242_v17 = vrot.slane %v1762_v32, 5  ;;  %v1772_v6 = vshll.u32 %v6232_v60, 16 }
  0xfe   : > { %3401 = vrot.lane.b32.xlu0 %v4959_v38, %s5262_s10  ;;  %v6230_v38 = vpop.permute.xlu0 %2805  ;;  %v1577_v4 = vor.u32 %v1576_v36, %v1572_v55  ;;  %v1760_v22 = vrot.slane %v1759_v13, 4  ;;  %v1591_v16 = vor.u32 %v5904_v12, %v5896_v41  ;;  %v1594_v25 = vshll.u32 %v5837_v29, 16  ;;  %v6258_v36 = vpop.permute.xlu1 %2803 }
  0xff   : > { %v1782_v19 = vrot.slane %v1780_v30, 5  ;;  %v1573_v33 = vsel %vm5396_vm14, %v1568_v62, %v1572_v55  ;;  %v1774_v30 = vrot.slane %v1772_v6, 5  ;;  %v7914_v61 = vshrl.u32 %v5837_v29, 16  ;;  %5091 = vmatpush3.bf16.msra.mxu0 %v5199_v18  ;;  %5140 = vmatpush3.bf16.msra.mxu1 %v5199_v18 }
 0x100   : > { %v1578_v7 = vrot.slane %v1577_v4, 4  ;;  %v1592_v41 = vrot.slane %v1591_v16, 4  ;;  %v1596_v12 = vrot.slane %v1594_v25, 5  ;;  %v1604_v46 = vshll.u32 %v6245_v2, 16  ;;  %v6268_v4 = vld [vmem:[#allocation2 + $0x98] sm:$0x1] }
 0x101   : > { %3307 = vrot.lane.b32.xlu1 %v4936_v28, %s5261_s9  ;;  %v6247_v28 = vld [vmem:[#allocation2 + $0x94] sm:$0xf]  ;;  %v1600_v3 = vrot.slane %v7914_v61, 4  ;;  %v1783_v16 = vor.u32 %v1782_v19, %v1779_v0  ;;  %v1898_v25 = vld [vmem:[#allocation2 + $0x24] sm:$0xe]  ;;  %v7915_v61 = vshrl.u32 %v5965_v10, 16 }
 0x102   : > { %3403 = vrot.lane.b32.xlu0 %v4960_v52, %s5262_s10  ;;  %v1769_v52 = vor.u32 %v1768_v21, %v6242_v17  ;;  %v6261_v13 = vpop.permute.xlu0 %2809  ;;  %v1790_v55 = vshrl.u32 %v6247_v28, 16  ;;  %v1583_v18 = vsel %vm5396_vm14, %v1578_v7, %v1582_v47  ;;  %v1606_v6 = vrot.slane %v1604_v46, 5 }
 0x103   : > { %v6272_v9 = vrot.slane %v7915_v61, 4  ;;  %v4882_v62 = vcombine.low %v6191_v15, %v6247_v28  ;;  %v4889_v32 = vcombine.low %v1573_v33, %v1583_v18  ;;  %v1597_v0 = vsel %vm5396_vm14, %v1592_v41, %v1596_v12 }
 0x104   : > { %v1770_v21 = vrot.slane %v1769_v52, 4  ;;  %v1765_v52 = vsel %vm5396_vm14, %v1760_v22, %v6242_v17  ;;  %v1792_v7 = vrot.slane %v1790_v55, 4  ;;  %v1796_v15 = vshll.u32 %v6268_v4, 16  ;;  %v6290_v17 = vpop.permute.xlu1 %2807 }
 0x105   : > { %3385 = vrot.lane.b32.xlu1 %v4951_v20, %s5262_s10  ;;  %v1601_v20 = vor.u32 %v1600_v3, %v1596_v12  ;;  %v1786_v3 = vshll.u32 %v6247_v28, 16  ;;  %v4793_v33 = vrot.slane %v1898_v25, 9  ;;  %v1976_v46 = vrot.slane %v5833_v27, 5  ;;  %v6303_v25 = vld [vmem:[#allocation2 + $0x34] sm:$0xf] }
 0x106   : > { %v1775_v47 = vsel %vm5396_vm14, %v1770_v21, %v1774_v30  ;;  %3053 = vrot.lane.b32.xlu0 %v4889_v32, %s5258_s27  ;;  %v1784_v22 = vrot.slane %v1783_v16, 4  ;;  %v1979_v41 = vrot.slane %v6200_v40, 5  ;;  %v6293_v12 = vpop.permute.xlu0 %2813  ;;  %v1906_v21 = vld [vmem:[#allocation2 + $0x84] sm:$0xe]  ;;  %v6297_v32 = vrot.slane %v1684_v49, 5 }
 0x107   : > { %v1602_v19 = vrot.slane %v1601_v20, 4  ;;  %v1788_v30 = vrot.slane %v1786_v3, 5  ;;  %7916 = vst [vmem:[#allocation10_spill] sm:$0xff] %v6293_v12  ;;  %v1977_v27 = vsel %vm5346_vm8, %v4793_v33, %v1976_v46  ;;  %v1978_v18 = vrot.slane %v1976_v46, 4  ;;  %v1899_v20 = vld [vmem:[#allocation2 + $0x30] sm:$0xe] }
 0x108   : > { %v4897_v16 = vcombine.low %v1765_v52, %v1775_v47  ;;  %v1798_v10 = vrot.slane %v1796_v15, 5  ;;  %v5200_v49 = vld [vmem:[%s7861_s2 + $0x20] sm:$0xff]   ;;  %v2032_v3 = vrot.slane %v5943_v39, 5  ;;  %v2035_v33 = vrot.slane %v6232_v60, 5  ;;  %v1907_v46 = vld [vmem:[#allocation2 + $0x90] sm:$0xe] }
 0x109   : > { %3387 = vrot.lane.b32.xlu1 %v4952_v44, %s5262_s10  ;;  %v1607_v44 = vsel %vm5396_vm14, %v1602_v19, %v1606_v6  ;;  %v6301_v6 = vld [vmem:[#allocation2 + $0x30] sm:$0xf]  ;;  %v1793_v61 = vor.u32 %v1792_v7, %v1788_v30  ;;  %v4801_v19 = vrot.slane %v1906_v21, 9  ;;  %v4794_v7 = vrot.slane %v1899_v20, 9  ;;  %5092 = vmatprep.subr.bf16.mxu0 %v5200_v49  ;;  %v5214_v15 = vld [vmem:[#allocation2 + $0x40] sm:$0xf] }
 0x10a   : > { %v4890_v55 = vcombine.low %v1597_v0, %v1607_v44  ;;  %v1980_v0 = vsel %vm5346_vm8, %v1978_v18, %v1979_v41  ;;  %5134 = vmatprep.subr.bf16.mxu1 %v5200_v49  ;;  %v5215_v44 = vld [vmem:[#allocation2 + $0x3c] sm:$0xf]  ;;  %v2034_v40 = vrot.slane %v2032_v3, 4  ;;  %v1983_v41 = vrot.slane %v5837_v29, 5  ;;  %5093 = vmatpush3.bf16.msra.mxu0 %v5200_v49  ;;  %v5216_v39 = vld [vmem:[#allocation2 + $0x48] sm:$0xf] }
 0x10b   : > { %v1794_v52 = vrot.slane %v1793_v61, 4  ;;  %v4905_v47 = vcombine.low %v1977_v27, %v1980_v0  ;;  %v1986_v21 = vrot.slane %v6245_v2, 5  ;;  %5141 = vmatpush3.bf16.msra.mxu1 %v5200_v49  ;;  %v5217_v60 = vld [vmem:[#allocation2 + $0x4c] sm:$0xf]  ;;  %v2033_v27 = vsel %vm5346_vm8, %v4801_v19, %v2032_v3  ;;  %v2077_v61 = vld [vmem:[#allocation2 + $0x30] sm:$0xf] }
 0x10c   : > { %3055 = vrot.lane.b32.xlu0 %v4890_v55, %s5258_s27  ;;  %v4828_v55 = vcombine.low %v5215_v44, %v5214_v15  ;;  %v4829_v18 = vcombine.low %v5216_v39, %v5217_v60  ;;  %v6327_v20 = vpop.permute.xlu0 %2817  ;;  %v4802_v29 = vrot.slane %v1907_v46, 9  ;;  %v5201_v2 = vld [vmem:[%s7861_s2 + $0x28] sm:$0xff]   ;;  %v1985_v0 = vrot.slane %v1983_v41, 4 }
 0x10d   : > { %2991 = vrot.lane.b32.xlu1 %v4882_v62, %s5257_s26  ;;  %v1789_v62 = vsel %vm5396_vm14, %v1784_v22, %v1788_v30  ;;  %v1799_v22 = vsel %vm5396_vm14, %v1794_v52, %v1798_v10  ;;  %v6323_v30 = vpop.permute.xlu1 %2811  ;;  %v1984_v10 = vsel %vm5346_vm8, %v4794_v7, %v1983_v41  ;;  %v6340_v19 = vrot.slane %v1663_v35, 4  ;;  %5094 = vmatprep.subr.bf16.mxu0 %v5201_v2  ;;  %v5218_v52 = vld [vmem:[#allocation2 + $0x58] sm:$0xf]  ;;  %v6352_v35 = vld [vmem:[#allocation2 + $0x90] sm:$0xf] }
 0x10e   : > { %v4898_v49 = vcombine.low %v1789_v62, %v1799_v22  ;;  %v7918_v3 = vshll.u32 %v5967_v14, 16  ;;  %v2039_v62 = vrot.slane %v6247_v28, 5  ;;  %5135 = vmatprep.subr.bf16.mxu1 %v5201_v2  ;;  %v2042_v7 = vrot.slane %v6268_v4, 5  ;;  %5095 = vmatpush3.bf16.msra.mxu0 %v5201_v2 }
 0x10f   : > { %7917 = vst [vmem:[#allocation11_spill] sm:$0xff] %v6340_v19  ;;  %v2170_v58 = vshrl.u32 %v2077_v61, 16  ;;  %5142 = vmatpush3.bf16.msra.mxu1 %v5201_v2  ;;  %v2173_v41 = vshll.u32 %v2077_v61, 16  ;;  %v7920_v39 = vcombine.low %v6301_v6, %v6303_v25  ;;  %v6362_v4 = vsel %vm3417_vm15, %v4828_v55, %v6258_v36  ;;  %v2079_v2 = vld [vmem:[#allocation2 + $0x3c] sm:$0xf] }
 0x110   : > { %3133 = vrot.lane.b32.xlu0 %v4905_v47, %s5259_s28  ;;  %v6344_v46 = vrot.slane %v7918_v3, 5  ;;  %v1987_v47 = vsel %vm5346_vm8, %v1985_v0, %v1986_v21  ;;  %v2041_v44 = vrot.slane %v2039_v62, 4  ;;  %v6366_v60 = vsel %vm3417_vm15, %v4829_v18, %v6230_v38  ;;  %v6386_v18 = vld [vmem:[#allocation2 + $0x90] sm:$0xf]  ;;  %v6393_v0 = vld [vmem:[#allocation2 + $0x40] sm:$0xf] }
 0x111   : > { %3069 = vrot.lane.b32.xlu1 %v4897_v16, %s5258_s27  ;;  %v2036_v16 = vsel %vm5346_vm8, %v2034_v40, %v2035_v33  ;;  %v5219_v40 = vld [vmem:[#allocation2 + $0x54] sm:$0xf]  ;;  %v4906_v15 = vcombine.low %v1984_v10, %v1987_v47  ;;  %v3432_v21 = vsel %vm3417_vm15, %v7920_v39, %v6186_v31  ;;  %v2040_v22 = vsel %vm5346_vm8, %v4802_v29, %v2039_v62  ;;  %v6395_v3 = vld [vmem:[#allocation2 + $0x9c] sm:$0xf] }
 0x112   : > { %7919 = vst [vmem:[#allocation12_spill] sm:$0xff] %v6344_v46  ;;  %v4830_v33 = vcombine.low %v5219_v40, %v5218_v52  ;;  %v4913_v28 = vcombine.low %v2033_v27, %v2036_v16  ;;  %v6370_v27 = vld [vmem:[#allocation2 + $0x94] sm:$0xf]  ;;  %v2043_v31 = vsel %vm5346_vm8, %v2041_v44, %v2042_v7  ;;  %v4921_v36 = vcombine.low %v2077_v61, %v6350_v57  ;;  %v6413_v16 = vld [vmem:[#allocation2 + $0x98] sm:$0x1] }
 0x113   : > { %v2362_v38 = vshrl.u32 %v6352_v35, 16  ;;  %v2365_v25 = vshll.u32 %v6352_v35, 16  ;;  %v6388_v29 = vld [vmem:[#allocation2 + $0x94] sm:$0xf]  ;;  %v2172_v10 = vrot.slane %v2170_v58, 4  ;;  %v2183_v61 = vshrl.u32 %v6350_v57, 16 }
 0x114   : > { %3135 = vrot.lane.b32.xlu0 %v4906_v15, %s5259_s28  ;;  %v6384_v55 = vsel %vm3417_vm15, %v4830_v33, %v6290_v17  ;;  %v4914_v62 = vcombine.low %v2040_v22, %v2043_v31  ;;  %v2175_v52 = vrot.slane %v2173_v41, 5  ;;  %v2375_v17 = vshrl.u32 %v6370_v27, 16  ;;  %v6399_v33 = vld [vmem:[#allocation2 + $0xa0] sm:$0xf]  ;;  %v6410_v31 = vld [vmem:[#allocation2 + $0x38] sm:$0x1] }
 0x115   : > { %3071 = vrot.lane.b32.xlu1 %v4898_v49, %s5258_s27  ;;  %v6373_v49 = vpop.permute.xlu1 %2815  ;;  %v2194_v40 = vshrl.u32 %v2079_v2, 16  ;;  %v2364_v47 = vrot.slane %v2362_v38, 4  ;;  %v2367_v7 = vrot.slane %v2365_v25, 5  ;;  %v4929_v58 = vcombine.low %v6352_v35, %v6370_v27 }
 0x116   : > { %7921 = vst [vmem:[#allocation13_spill] sm:$0xff] %v6373_v49  ;;  %v2197_v15 = vshll.u32 %v2079_v2, 16  ;;  %v2207_v44 = vshrl.u32 %v6393_v0, 16  ;;  %v4922_v39 = vcombine.low %v2079_v2, %v6393_v0  ;;  %v2386_v41 = vshrl.u32 %v6395_v3, 16 }
 0x117   : > { %v2389_v22 = vshll.u32 %v6395_v3, 16  ;;  %v2196_v38 = vrot.slane %v2194_v40, 4  ;;  %v2399_v35 = vshrl.u32 %v6399_v33, 16  ;;  %v2176_v56 = vor.u32 %v2175_v52, %v2172_v10 }
 0x118   : > { %v6378_v6 = vpop.permute.xlu0 %2821  ;;  %3229 = vrot.lane.b32.xlu0 %v4921_v36, %s5260_s6  ;;  %v2199_v25 = vrot.slane %v2197_v15, 5  ;;  %v2388_v2 = vrot.slane %v2386_v41, 4  ;;  %v2185_v12 = vrot.slane %v2183_v61, 4  ;;  %v2189_v8 = vshll.u32 %v6410_v31, 16 }
 0x119   : > { %3149 = vrot.lane.b32.xlu1 %v4913_v28, %s5259_s28  ;;  %v6416_v36 = vpop.permute.xlu1 %2819  ;;  %v2391_v49 = vrot.slane %v2389_v22, 5  ;;  %v2368_v45 = vor.u32 %v2367_v7, %v2364_v47  ;;  %v2371_v40 = vshll.u32 %v6370_v27, 16  ;;  %v2177_v15 = vrot.slane %v2176_v56, 4  ;;  %v6428_v22 = vld [vmem:[#allocation2 + $0x44] sm:$0x1] }
 0x11a   : > { %v2377_v46 = vrot.slane %v2375_v17, 4  ;;  %v4930_v41 = vcombine.low %v6395_v3, %v6399_v33  ;;  %v2191_v7 = vrot.slane %v2189_v8, 5  ;;  %v2200_v17 = vor.u32 %v2199_v25, %v2196_v38  ;;  %v2507_v25 = vld [vmem:[#allocation2 + $0x30] sm:$0xe] }
 0x11b   : > { %v2369_v61 = vrot.slane %v2368_v45, 4  ;;  %v2373_v52 = vrot.slane %v2371_v40, 5  ;;  %v2203_v11 = vshll.u32 %v6393_v0, 16  ;;  %v2209_v3 = vrot.slane %v2207_v44, 4 }
 0x11c   : > { %v6406_v28 = vpop.permute.xlu0 %2877  ;;  %3231 = vrot.lane.b32.xlu0 %v4922_v39, %s5260_s6  ;;  %v2392_v40 = vor.u32 %v2391_v49, %v2388_v2  ;;  %vm3598_vm7 = vcmask 588800   ;;  %vm3792_vm9 = vcmask 1045504   ;;  %vm3664_vm10 = vcmask 785408  }
 0x11d   : > { %7922 = vst [vmem:[#allocation14_spill] sm:$0xff] %v6406_v28  ;;  %3151 = vrot.lane.b32.xlu1 %v4914_v62, %s5259_s28  ;;  %v2179_v28 = vshll.u32 %v6350_v57, 16  ;;  %v2381_v62 = vshll.u32 %v6413_v16, 16  ;;  %v2378_v39 = vor.u32 %v2377_v46, %v2373_v52  ;;  %v2374_v45 = vsel %vm5396_vm14, %v2369_v61, %v2373_v52 }
 0x11e   : > { %v7925_v46 = vcombine.low %v6386_v18, %v6388_v29  ;;  %v2393_v61 = vrot.slane %v2392_v40, 4  ;;  %v2401_v29 = vrot.slane %v2399_v35, 4  ;;  %vm3759_vm11 = vcmask 883712  }
 0x11f   : > { %v2181_v42 = vrot.slane %v2179_v28, 5  ;;  %v2383_v28 = vrot.slane %v2381_v62, 5 }
 0x120   : > { %v2882_v48 = vpop.permute.xlu0 %2881  ;;  %v6450_v44 = vsel %vm3417_vm15, %v7925_v46, %v6327_v20 }
 0x121   : > { %v6426_v10 = vsel %vm3466_vm1, %v3432_v21, %v2882_v48  ;;  %3245 = vrot.lane.b32.xlu1 %v4929_v58, %s5260_s6  ;;  %v2182_v56 = vsel %vm5396_vm14, %v2177_v15, %v2181_v42  ;;  %v2186_v47 = vor.u32 %v2185_v12, %v2181_v42  ;;  %v2213_v21 = vshll.u32 %v6428_v22, 16  ;;  %v6443_v12 = vld [vmem:[#allocation2 + $0xa4] sm:$0x1] }
 0x122   : > { %7923 = vst [vmem:[#allocation15_spill] sm:$0xff] %v6426_v10  ;;  %v2379_v10 = vrot.slane %v2378_v39, 4  ;;  %v2201_v15 = vrot.slane %v2200_v17, 4  ;;  %v2205_v42 = vrot.slane %v2203_v11, 5  ;;  %v2395_v11 = vshll.u32 %v6399_v33, 16 }
 0x123   : > { %v6434_v19 = vpop.permute.xlu1 %2823  ;;  %v2187_v48 = vrot.slane %v2186_v47, 4  ;;  %v2215_v38 = vrot.slane %v2213_v21, 5  ;;  %v4809_v17 = vrot.slane %v2507_v25, 9  ;;  %v2515_v39 = vld [vmem:[#allocation2 + $0x90] sm:$0xe]  ;;  %v2588_v21 = vrot.slane %v6410_v31, 5 }
 0x124   : > { %v2886_v58 = vpop.permute.xlu0 %2885  ;;  %v2384_v2 = vsel %vm5396_vm14, %v2379_v10, %v2383_v28  ;;  %v2210_v62 = vor.u32 %v2209_v3, %v2205_v42  ;;  %v2397_v20 = vrot.slane %v2395_v11, 5  ;;  %v2585_v10 = vrot.slane %v6350_v57, 5  ;;  %v5222_v28 = vld [vmem:[#allocation2 + $0x9c] sm:$0xf]  ;;  %v5223_v3 = vld [vmem:[#allocation2 + $0xa0] sm:$0xf] }
 0x125   : > { %v6441_v8 = vsel %vm3466_vm1, %v6366_v60, %v2886_v58  ;;  %3247 = vrot.lane.b32.xlu1 %v4930_v41, %s5260_s6  ;;  %v2192_v49 = vsel %vm5396_vm14, %v2187_v48, %v2191_v7  ;;  %v4945_v18 = vcombine.low %v2374_v45, %v2384_v2  ;;  %v2405_v41 = vshll.u32 %v6443_v12, 16  ;;  %v2508_v58 = vld [vmem:[#allocation2 + $0x3c] sm:$0xe] }
 0x126   : > { %7924 = vst [vmem:[#allocation16_spill] sm:$0xff] %v6441_v8  ;;  %v4937_v60 = vcombine.low %v2182_v56, %v2192_v49  ;;  %v2206_v7 = vsel %vm5396_vm14, %v2201_v15, %v2205_v42  ;;  %v2211_v56 = vrot.slane %v2210_v62, 4  ;;  %v4836_v48 = vcombine.low %v5222_v28, %v5223_v3 }
 0x127   : > { %v6458_v52 = vpop.permute.xlu1 %2879  ;;  %v2402_v35 = vor.u32 %v2401_v29, %v2397_v20  ;;  %v2407_v45 = vrot.slane %v2405_v41, 5  ;;  %v2398_v15 = vsel %vm5396_vm14, %v2393_v61, %v2397_v20  ;;  %v2586_v57 = vsel %vm5346_vm8, %v4809_v17, %v2585_v10 }
 0x128   : > { %v6461_v47 = vpop.permute.xlu0 %2889  ;;  %3309 = vrot.lane.b32.xlu0 %v4937_v60, %s5261_s9  ;;  %v2216_v40 = vsel %vm5396_vm14, %v2211_v56, %v2215_v38  ;;  %v2587_v42 = vrot.slane %v2585_v10, 4  ;;  %v4817_v25 = vrot.slane %v2515_v39, 9  ;;  %v2641_v60 = vrot.slane %v6370_v27, 5  ;;  %v1488_v39 = vld [vmem:[#allocation2 + $0x9c] sm:$0xf] }
 0x129   : > { %3325 = vrot.lane.b32.xlu1 %v4945_v18, %s5261_s9  ;;  %v4938_v46 = vcombine.low %v2206_v7, %v2216_v40  ;;  %v2403_v11 = vrot.slane %v2402_v35, 4  ;;  %v2644_v62 = vrot.slane %v6413_v16, 5  ;;  %v4810_v61 = vrot.slane %v2508_v58, 9  ;;  %v2516_v18 = vld [vmem:[#allocation2 + $0x9c] sm:$0xe] }
 0x12a   : > { %v2589_v38 = vsel %vm5346_vm8, %v2587_v42, %v2588_v21  ;;  %v2642_v27 = vsel %vm5346_vm8, %v4817_v25, %v2641_v60  ;;  %v2643_v41 = vrot.slane %v2641_v60, 4  ;;  %v5224_v7 = vld [vmem:[#allocation2 + $0xa8] sm:$0xf]  ;;  %v2592_v10 = vrot.slane %v6393_v0, 5 }
 0x12b   : > { %v2884_v49 = vpop.permute.xlu1 %2883  ;;  %v2408_v20 = vsel %vm5396_vm14, %v2403_v11, %v2407_v45  ;;  %v4953_v29 = vcombine.low %v2586_v57, %v2589_v38  ;;  %v2595_v16 = vrot.slane %v6428_v22, 5  ;;  %v4818_v35 = vrot.slane %v2516_v18, 9  ;;  %v6503_v57 = vld [vmem:[#allocation2 + $0xa0] sm:$0xf] }
 0x12c   : > { %v6476_v2 = vpop.permute.xlu0 %2893  ;;  %v6480_v31 = vsel %vm3466_vm1, %v6362_v4, %v2884_v49  ;;  %3311 = vrot.lane.b32.xlu0 %v4938_v46, %s5261_s9  ;;  %v5225_v4 = vld [vmem:[#allocation2 + $0xac] sm:$0xf]  ;;  %v4946_v17 = vcombine.low %v2398_v15, %v2408_v20  ;;  %v2645_v3 = vsel %vm5346_vm8, %v2643_v41, %v2644_v62  ;;  %v2648_v45 = vrot.slane %v6399_v33, 5  ;;  %v1490_v49 = vld [vmem:[#allocation2 + $0xa8] sm:$0xf] }
 0x12d   : > { %7926 = vst [vmem:[#allocation17_spill] sm:$0xff] %v6480_v31  ;;  %v4837_v56 = vcombine.low %v5224_v7, %v5225_v4  ;;  %v2651_v21 = vrot.slane %v6443_v12, 5  ;;  %v4961_v0 = vcombine.low %v2642_v27, %v2645_v3  ;;  %v2593_v22 = vsel %vm5346_vm8, %v4810_v61, %v2592_v10  ;;  %v6524_v27 = vld [vmem:[#allocation2 + $0xac] sm:$0xf]  ;;  %v6526_v41 = vld [vmem:[#allocation2 + $0x44] sm:$0x1] }
 0x12e   : > { %3327 = vrot.lane.b32.xlu1 %v4946_v17, %s5261_s9  ;;  %v2594_v15 = vrot.slane %v2592_v10, 4  ;;  %v2649_v33 = vsel %vm5346_vm8, %v4818_v35, %v2648_v45  ;;  %v2650_v12 = vrot.slane %v2648_v45, 4  ;;  %v1801_v42 = vshrl.u32 %v1488_v39, 16  ;;  %v5226_v17 = vld [vmem:[#allocation2 + $0xb4] sm:$0xf] }
 0x12f   : > { %v2888_v28 = vpop.permute.xlu1 %2887  ;;  %v1804_v46 = vshll.u32 %v1488_v39, 16  ;;  %v7928_v11 = vshrl.u32 %v5967_v14, 16  ;;  %v3459_v25 = vsel %vm3417_vm15, %v4836_v48, %v6416_v36  ;;  %v3462_v48 = vsel %vm3417_vm15, %v4837_v56, %v6378_v6  ;;  %v5227_v10 = vld [vmem:[#allocation2 + $0xb8] sm:$0xf]  ;;  %v6536_v35 = vld [vmem:[#allocation2 + $0x40] sm:$0xf] }
 0x130   : > { %v2898_v58 = vpop.permute.xlu0 %2897  ;;  %v6499_v40 = vsel %vm3466_vm1, %v6384_v55, %v2888_v28  ;;  %3389 = vrot.lane.b32.xlu0 %v4953_v29, %s5262_s10  ;;  %v2596_v60 = vsel %vm5346_vm8, %v2594_v15, %v2595_v16  ;;  %v2652_v18 = vsel %vm5346_vm8, %v2650_v12, %v2651_v21  ;;  %v1803_v20 = vrot.slane %v1801_v42, 4 }
 0x131   : > { %7927 = vst [vmem:[#allocation18_spill] sm:$0xff] %v6499_v40  ;;  %v6510_v55 = vrot.slane %v7928_v11, 4  ;;  %v6518_v38 = vsel %vm3466_vm1, %v6450_v44, %v2898_v58  ;;  %v4954_v62 = vcombine.low %v2593_v22, %v2596_v60  ;;  %v1806_v29 = vrot.slane %v1804_v46, 5  ;;  %v6543_v22 = vld [vmem:[#allocation2 + $0xa4] sm:$0x1] }
 0x132   : > { %3405 = vrot.lane.b32.xlu1 %v4961_v0, %s5262_s10  ;;  %v4962_v44 = vcombine.low %v2649_v33, %v2652_v18  ;;  %v1814_v7 = vshrl.u32 %v6503_v57, 16  ;;  %v1825_v4 = vshrl.u32 %v1490_v49, 16  ;;  %v4838_v16 = vcombine.low %v5226_v17, %v5227_v10  ;;  %v6555_v60 = vld [vmem:[#allocation2 + $0x50] sm:$0x1] }
 0x133   : > { %v6520_v61 = vpop.permute.xlu1 %2891  ;;  %v4883_v28 = vcombine.low %v1488_v39, %v6503_v57  ;;  %v1615_v3 = vor.u32 %v5912_v59, %v5906_v63  ;;  %v1618_v6 = vshll.u32 %v6536_v35, 16  ;;  %v1828_v56 = vshll.u32 %v1490_v49, 16 }
 0x134   : > { %v2902_v36 = vpop.permute.xlu0 %2901  ;;  %3391 = vrot.lane.b32.xlu0 %v4954_v62, %s5262_s10  ;;  %v1838_v45 = vshrl.u32 %v6524_v27, 16  ;;  %v7929_v21 = vshrl.u32 %v5842_v34, 16  ;;  %v1628_v0 = vshll.u32 %v6526_v41, 16  ;;  %v1807_v59 = vor.u32 %v1806_v29, %v1803_v20 }
 0x135   : > { %v1616_v39 = vrot.slane %v1615_v3, 4  ;;  %v1620_v33 = vrot.slane %v1618_v6, 5  ;;  %v6548_v63 = vsel %vm3466_vm1, %v3462_v48, %v2902_v36  ;;  %v1827_v42 = vrot.slane %v1825_v4, 4 }
 0x136   : > { %v1624_v58 = vrot.slane %v7929_v21, 4  ;;  %7930 = vst [vmem:[#allocation19_spill] sm:$0xff] %v6548_v63  ;;  %3407 = vrot.lane.b32.xlu1 %v4962_v44, %s5262_s10  ;;  %v4884_v34 = vcombine.low %v1490_v49, %v6524_v27  ;;  %v1810_v46 = vshll.u32 %v6503_v57, 16  ;;  %v1816_v11 = vrot.slane %v1814_v7, 4  ;;  %v6561_v44 = vld [vmem:[#allocation2 + $0x4c] sm:$0xf] }
 0x137   : > { %v6545_v15 = vpop.permute.xlu1 %2895  ;;  %v1630_v18 = vrot.slane %v1628_v0, 5  ;;  %v1808_v17 = vrot.slane %v1807_v59, 4  ;;  %v1820_v36 = vshll.u32 %v6543_v22, 16  ;;  %v1830_v20 = vrot.slane %v1828_v56, 5  ;;  %v6581_v59 = vld [vmem:[#allocation2 + $0xb0] sm:$0x1] }
 0x138   : > { %v6550_v12 = vpop.permute.xlu0 %2969  ;;  %2993 = vrot.lane.b32.xlu0 %v4883_v28, %s5257_s26  ;;  %v1625_v62 = vor.u32 %v1624_v58, %v1620_v33  ;;  %v1812_v29 = vrot.slane %v1810_v46, 5  ;;  %v1639_v48 = vor.u32 %v5981_v43, %v5923_v5  ;;  %v1642_v49 = vshll.u32 %v6561_v44, 16  ;;  %v6731_v63 = vld [vmem:[#allocation2 + $0x5c] sm:$0x1] }
 0x139   : > { %v1621_v7 = vsel %vm5396_vm14, %v1616_v39, %v1620_v33  ;;  %v7931_v28 = vshrl.u32 %v5850_v23, 16  ;;  %v1652_v6 = vshll.u32 %v6555_v60, 16  ;;  %v1822_v56 = vrot.slane %v1820_v36, 5 }
 0x13a   : > { %v1626_v4 = vrot.slane %v1625_v62, 4  ;;  %2995 = vrot.lane.b32.xlu1 %v4884_v34, %s5257_s26  ;;  %v1817_v43 = vor.u32 %v1816_v11, %v1812_v29  ;;  %v1640_v58 = vrot.slane %v1639_v48, 4  ;;  %v3465_v0 = vsel %vm3417_vm15, %v4838_v16, %v6434_v19 }
 0x13b   : > { %v2900_v10 = vpop.permute.xlu1 %2899  ;;  %v1648_v3 = vrot.slane %v7931_v28, 4  ;;  %v1813_v23 = vsel %vm5396_vm14, %v1808_v17, %v1812_v29  ;;  %v1644_v33 = vrot.slane %v1642_v49, 5  ;;  %v1654_v62 = vrot.slane %v1652_v6, 5  ;;  %v6599_v6 = vld [vmem:[#allocation2] sm:$0xf] }
 0x13c   : > { %v6569_v21 = vpop.permute.xlu0 %2973  ;;  %v6573_v5 = vsel %vm3466_vm1, %v3459_v25, %v2900_v10  ;;  %v1631_v39 = vsel %vm5396_vm14, %v1626_v4, %v1630_v18  ;;  %v1818_v34 = vrot.slane %v1817_v43, 4  ;;  %v1831_v25 = vor.u32 %v1830_v20, %v1827_v42  ;;  %v1900_v10 = vld [vmem:[#allocation2 + $0x3c] sm:$0xe] }
 0x13d   : > { %7932 = vst [vmem:[#allocation20_spill] sm:$0xff] %v6573_v5  ;;  %v4891_v46 = vcombine.low %v1621_v7, %v1631_v39  ;;  %v1645_v11 = vsel %vm5396_vm14, %v1640_v58, %v1644_v33  ;;  %v1649_v36 = vor.u32 %v1648_v3, %v1644_v33  ;;  %v1834_v19 = vshll.u32 %v6524_v27, 16  ;;  %v6597_v3 = vld [vmem:[#allocation2 + $0x4] sm:$0xf]  ;;  %v5232_v39 = vld [vmem:[#allocation2 + $0xc] sm:$0xf] }
 0x13e   : > { %v1840_v16 = vrot.slane %v1838_v45, 4  ;;  %v1823_v17 = vsel %vm5396_vm14, %v1818_v34, %v1822_v56  ;;  %v1832_v42 = vrot.slane %v1831_v25, 4  ;;  %v1844_v20 = vshll.u32 %v6581_v59, 16  ;;  %v2517_v5 = vld [vmem:[#allocation2 + $0xa8] sm:$0xe] }
 0x13f   : > { %v2904_v48 = vpop.permute.xlu1 %2903  ;;  %3057 = vrot.lane.b32.xlu0 %v4891_v46, %s5258_s27  ;;  %v4899_v49 = vcombine.low %v1813_v23, %v1823_v17  ;;  %v1650_v7 = vrot.slane %v1649_v36, 4  ;;  %v1836_v4 = vrot.slane %v1834_v19, 5  ;;  %v4795_v28 = vrot.slane %v1900_v10, 9  ;;  %v5233_v23 = vld [vmem:[#allocation2 + $0x10] sm:$0xf] }
 0x140   : > { %v6586_v18 = vpop.permute.xlu0 %2977  ;;  %v6592_v29 = vsel %vm3466_vm1, %v3465_v0, %v2904_v48  ;;  %v1687_v45 = vor.u32 %v6297_v32, %v6272_v9  ;;  %v4823_v43 = vcombine.low %v6599_v6, %v6597_v3  ;;  %v1990_v56 = vrot.slane %v6536_v35, 5  ;;  %v1908_v0 = vld [vmem:[#allocation2 + $0x9c] sm:$0xe]  ;;  %v1901_v36 = vld [vmem:[#allocation2 + $0x48] sm:$0xe] }
 0x141   : > { %7933 = vst [vmem:[#allocation21_spill] sm:$0xff] %v6592_v29  ;;  %v1993_v58 = vrot.slane %v6526_v41, 5  ;;  %v4824_v33 = vcombine.low %v5232_v39, %v5233_v23  ;;  %3073 = vrot.lane.b32.xlu1 %v4899_v49, %s5258_s27  ;;  %v1655_v46 = vsel %vm5396_vm14, %v1650_v7, %v1654_v62  ;;  %v1841_v34 = vor.u32 %v1840_v16, %v1836_v4  ;;  %v1909_v7 = vld [vmem:[#allocation2 + $0xa8] sm:$0xe]  ;;  %v5235_v23 = vld [vmem:[#allocation2 + $0x60] sm:$0xf] }
 0x142   : > { %v1846_v25 = vrot.slane %v1844_v20, 5  ;;  %v4892_v19 = vcombine.low %v1645_v11, %v1655_v46  ;;  %v1837_v41 = vsel %vm5396_vm14, %v1832_v42, %v1836_v4  ;;  %v1991_v35 = vsel %vm5346_vm8, %v4795_v28, %v1990_v56  ;;  %v6682_v32 = vld [vmem:[#allocation2 + $0x58] sm:$0xf]  ;;  %v6708_v29 = vld [vmem:[#allocation2 + $0x50] sm:$0x1] }
 0x143   : > { %v6608_v10 = vpop.permute.xlu1 %2971  ;;  %v1992_v17 = vrot.slane %v1990_v56, 4  ;;  %v1842_v3 = vrot.slane %v1841_v34, 4  ;;  %v4803_v49 = vrot.slane %v1908_v0, 9  ;;  %v2046_v6 = vrot.slane %v6503_v57, 5  ;;  %v2081_v0 = vld [vmem:[#allocation2 + $0x48] sm:$0xf] }
 0x144   : > { %v6610_v48 = vpop.permute.xlu0 %2981  ;;  %v2049_v62 = vrot.slane %v6543_v22, 5  ;;  %3059 = vrot.lane.b32.xlu0 %v4892_v19, %s5258_s27  ;;  %v4796_v20 = vrot.slane %v1901_v36, 9  ;;  %v1997_v11 = vrot.slane %v6561_v44, 5  ;;  %v2000_v42 = vrot.slane %v6555_v60, 5  ;;  %v5236_v36 = vld [vmem:[#allocation2 + $0x6c] sm:$0xf] }
 0x145   : > { %7934 = vst [vmem:[#allocation22_spill] sm:$0xff] %v6610_v48  ;;  %v1994_v16 = vsel %vm5346_vm8, %v1992_v17, %v1993_v58  ;;  %v1847_v4 = vsel %vm5396_vm14, %v1842_v3, %v1846_v25  ;;  %v2047_v57 = vsel %vm5346_vm8, %v4803_v49, %v2046_v6  ;;  %v2048_v56 = vrot.slane %v2046_v6, 4  ;;  %v5234_v58 = vld [vmem:[#allocation2 + $0x64] sm:$0xf]  ;;  %v5237_v25 = vld [vmem:[#allocation2 + $0x70] sm:$0xf] }
 0x146   : > { %v4907_v28 = vcombine.low %v1991_v35, %v1994_v16  ;;  %v4831_v46 = vcombine.low %v5235_v23, %v5234_v58  ;;  %v4900_v44 = vcombine.low %v1837_v41, %v1847_v4  ;;  %v1998_v60 = vsel %vm5346_vm8, %v4796_v20, %v1997_v11  ;;  %v2097_v58 = vld [vmem:[#allocation2 + $0xa8] sm:$0xf] }
 0x147   : > { %v6627_v22 = vpop.permute.xlu1 %2975  ;;  %v1999_v34 = vrot.slane %v1997_v11, 4  ;;  %v4832_v19 = vcombine.low %v5236_v36, %v5237_v25  ;;  %v2050_v35 = vsel %vm5346_vm8, %v2048_v56, %v2049_v62  ;;  %v4804_v17 = vrot.slane %v1909_v7, 9  ;;  %v6643_v62 = vld [vmem:[#allocation2 + $0x4c] sm:$0xf] }
 0x148   : > { %v6629_v39 = vpop.permute.xlu0 %2985  ;;  %v2053_v3 = vrot.slane %v6524_v27, 5  ;;  %3075 = vrot.lane.b32.xlu1 %v4900_v44, %s5258_s27  ;;  %3137 = vrot.lane.b32.xlu0 %v4907_v28, %s5259_s28  ;;  %v4915_v49 = vcombine.low %v2047_v57, %v2050_v35  ;;  %v2056_v6 = vrot.slane %v6581_v59, 5  ;;  %v2218_v16 = vshrl.u32 %v2081_v0, 16 }
 0x149   : > { %v2001_v41 = vsel %vm5346_vm8, %v1999_v34, %v2000_v42  ;;  %v2221_v7 = vshll.u32 %v2081_v0, 16  ;;  %v3420_v28 = vsel %vm3417_vm15, %v4823_v43, %v6123_v50  ;;  %v6653_v42 = vsel %vm3417_vm15, %v4824_v33, %v6157_v51  ;;  %v6665_v43 = vld [vmem:[#allocation2 + $0xac] sm:$0xf]  ;;  %v2083_v51 = vld [vmem:[#allocation2 + $0x54] sm:$0xf] }
 0x14a   : > { %v4908_v20 = vcombine.low %v1998_v60, %v2001_v41  ;;  %v2054_v11 = vsel %vm5346_vm8, %v4804_v17, %v2053_v3  ;;  %v2055_v4 = vrot.slane %v2053_v3, 4  ;;  %v3444_v59 = vsel %vm3417_vm15, %v4831_v46, %v6261_v13 }
 0x14b   : > { %v6645_v27 = vpop.permute.xlu1 %2979  ;;  %v2220_v57 = vrot.slane %v2218_v16, 4  ;;  %v3447_v23 = vsel %vm3417_vm15, %v4832_v19, %v6323_v30  ;;  %v6661_v44 = vsel %vm3466_vm1, %v3444_v59, %v6461_v47  ;;  %v2223_v50 = vrot.slane %v2221_v7, 5  ;;  %v6697_v59 = vld [vmem:[#allocation2 + $0xb8] sm:$0xf] }
 0x14c   : > { %v6647_v56 = vpop.permute.xlu0 %2989  ;;  %v2057_v60 = vsel %vm5346_vm8, %v2055_v4, %v2056_v6  ;;  %v6670_v13 = vrot.slane %v1687_v45, 4  ;;  %v6674_v33 = vsel %vm3466_vm1, %v3447_v23, %v6520_v61  ;;  %3153 = vrot.lane.b32.xlu1 %v4915_v49, %s5259_s28  ;;  %3139 = vrot.lane.b32.xlu0 %v4908_v20, %s5259_s28  ;;  %v4923_v47 = vcombine.low %v2081_v0, %v6643_v62  ;;  %v2099_v20 = vld [vmem:[#allocation2 + $0xb4] sm:$0xf] }
 0x14d   : > { %v4916_v30 = vcombine.low %v2054_v11, %v2057_v60  ;;  %v3468_v46 = vsel %vm3466_vm1, %v3420_v28, %v6088_v53  ;;  %v2227_v34 = vshll.u32 %v6643_v62, 16  ;;  %v2410_v36 = vshrl.u32 %v2097_v58, 16 }
 0x14e   : > { %v2413_v9 = vshll.u32 %v2097_v58, 16  ;;  %v2224_v25 = vor.u32 %v2223_v50, %v2220_v57  ;;  %v2231_v19 = vshrl.u32 %v6643_v62, 16  ;;  %v2419_v35 = vshll.u32 %v6665_v43, 16 }
 0x14f   : > { %v6684_v45 = vpop.permute.xlu1 %2983  ;;  %v2242_v17 = vshrl.u32 %v2083_v51, 16  ;;  %v2412_v0 = vrot.slane %v2410_v36, 4  ;;  %v2423_v53 = vshrl.u32 %v6665_v43, 16  ;;  %v4931_v49 = vcombine.low %v2097_v58, %v6665_v43 }
 0x150   : > { %7935 = vst [vmem:[#allocation23_spill] sm:$0xff] %v6684_v45  ;;  %v6686_v61 = vpop.permute.xlu0 %3065  ;;  %v2415_v3 = vrot.slane %v2413_v9, 5  ;;  %3155 = vrot.lane.b32.xlu1 %v4916_v30, %s5259_s28  ;;  %3233 = vrot.lane.b32.xlu0 %v4923_v47, %s5260_s6  ;;  %v2245_v6 = vshll.u32 %v2083_v51, 16  ;;  %v2251_v16 = vshll.u32 %v6682_v32, 16  ;;  %v2229_v11 = vrot.slane %v2227_v34, 5 }
 0x151   : > { %v2244_v41 = vrot.slane %v2242_v17, 4  ;;  %v2255_v7 = vshrl.u32 %v6682_v32, 16  ;;  %v4924_v28 = vcombine.low %v2083_v51, %v6682_v32  ;;  %v2225_v60 = vrot.slane %v2224_v25, 4 }
 0x152   : > { %v2416_v4 = vor.u32 %v2415_v3, %v2412_v0  ;;  %v2233_v50 = vrot.slane %v2231_v19, 4  ;;  %v2421_v58 = vrot.slane %v2419_v35, 5  ;;  %v2247_v30 = vrot.slane %v2245_v6, 5  ;;  %v6712_v6 = vld [vmem:[#allocation2 + $0xb0] sm:$0x1] }
 0x153   : > { %v6699_v57 = vpop.permute.xlu1 %2987  ;;  %v2425_v47 = vrot.slane %v2423_v53, 4  ;;  %v6703_v36 = vrot.slane %v2251_v16, 5  ;;  %v2434_v9 = vshrl.u32 %v2099_v20, 16  ;;  %v2437_v34 = vshll.u32 %v2099_v20, 16 }
 0x154   : > { %v6701_v23 = vpop.permute.xlu0 %3067  ;;  %v2417_v17 = vrot.slane %v2416_v4, 4  ;;  %3249 = vrot.lane.b32.xlu1 %v4931_v49, %s5260_s6  ;;  %v2248_v0 = vor.u32 %v2247_v30, %v2244_v41  ;;  %v2257_v51 = vrot.slane %v2255_v7, 4  ;;  %3235 = vrot.lane.b32.xlu0 %v4924_v28, %s5260_s6  ;;  %v2443_v3 = vshll.u32 %v6697_v59, 16 }
 0x155   : > { %v2436_v25 = vrot.slane %v2434_v9, 4  ;;  %v2439_v19 = vrot.slane %v2437_v34, 5  ;;  %v2447_v35 = vshrl.u32 %v6697_v59, 16  ;;  %v4932_v53 = vcombine.low %v2099_v20, %v6697_v59 }
 0x156   : > { %v6720_v49 = vsel %vm3499_vm2, %v3468_v46, %v6550_v12  ;;  %v6725_v41 = vsel %vm3466_vm1, %v6653_v42, %v6155_v54  ;;  %v2599_v7 = vrot.slane %v6643_v62, 5  ;;  %v2234_v28 = vor.u32 %v2233_v50, %v2229_v11 }
 0x157   : > { %v6714_v16 = vpop.permute.xlu1 %3049  ;;  %v2249_v30 = vrot.slane %v2248_v0, 4  ;;  %v2440_v20 = vor.u32 %v2439_v19, %v2436_v25  ;;  %v2230_v9 = vsel %vm5396_vm14, %v2225_v60, %v2229_v11  ;;  %v2237_v34 = vshll.u32 %v6708_v29, 16  ;;  %v6738_v0 = vld [vmem:[#allocation2 + $0xbc] sm:$0x1] }
 0x158   : > { %v6716_v4 = vpop.permute.xlu0 %3145  ;;  %v2445_v40 = vrot.slane %v2443_v3, 5  ;;  %3251 = vrot.lane.b32.xlu1 %v4932_v53, %s5260_s6  ;;  %v2235_v12 = vrot.slane %v2234_v28, 4  ;;  %v2426_v46 = vor.u32 %v2425_v47, %v2421_v58  ;;  %v2429_v54 = vshll.u32 %v6712_v6, 16  ;;  %v2509_v53 = vld [vmem:[#allocation2 + $0x48] sm:$0xe] }
 0x159   : > { %v2449_v42 = vrot.slane %v2447_v35, 4  ;;  %v2239_v45 = vrot.slane %v2237_v34, 5  ;;  %v2422_v62 = vsel %vm5396_vm14, %v2417_v17, %v2421_v58  ;;  %v2258_v50 = vor.u32 %v2257_v51, %v6703_v36 }
 0x15a   : > { %v2441_v3 = vrot.slane %v2440_v20, 4  ;;  %v2427_v25 = vrot.slane %v2426_v46, 4  ;;  %v2431_v19 = vrot.slane %v2429_v54, 5  ;;  %v2261_v47 = vshll.u32 %v6731_v63, 16 }
 0x15b   : > { %v6740_v11 = vpop.permute.xlu1 %3051  ;;  %v2655_v35 = vrot.slane %v6665_v43, 5  ;;  %v2606_v28 = vrot.slane %v6682_v32, 5  ;;  %v2240_v58 = vsel %vm5396_vm14, %v2235_v12, %v2239_v45  ;;  %v2259_v17 = vrot.slane %v2258_v50, 4  ;;  %v2510_v12 = vld [vmem:[#allocation2 + $0x54] sm:$0xe] }
 0x15c   : > { %v6742_v60 = vpop.permute.xlu0 %3147  ;;  %v4939_v51 = vcombine.low %v2230_v9, %v2240_v58  ;;  %v2432_v34 = vsel %vm5396_vm14, %v2427_v25, %v2431_v19  ;;  %v2254_v20 = vsel %vm5396_vm14, %v2249_v30, %v6703_v36  ;;  %v2263_v46 = vrot.slane %v2261_v47, 5 }
 0x15d   : > { %v4947_v54 = vcombine.low %v2422_v62, %v2432_v34  ;;  %v2450_v8 = vor.u32 %v2449_v42, %v2445_v40  ;;  %v2453_v48 = vshll.u32 %v6738_v0, 16  ;;  %v4811_v43 = vrot.slane %v2509_v53, 9 }
 0x15e   : > { %3313 = vrot.lane.b32.xlu0 %v4939_v51, %s5261_s9  ;;  %v2264_v45 = vsel %vm5396_vm14, %v2259_v17, %v2263_v46  ;;  %v2446_v9 = vsel %vm5396_vm14, %v2441_v3, %v2445_v40  ;;  %v2601_v36 = vrot.slane %v2599_v7, 4  ;;  %v2602_v30 = vrot.slane %v6708_v29, 5  ;;  %v2518_v40 = vld [vmem:[#allocation2 + $0xb4] sm:$0xe] }
 0x15f   : > { %v6755_v32 = vpop.permute.xlu1 %3129  ;;  %3329 = vrot.lane.b32.xlu1 %v4947_v54, %s5261_s9  ;;  %v4940_v42 = vcombine.low %v2254_v20, %v2264_v45  ;;  %v2451_v62 = vrot.slane %v2450_v8, 4  ;;  %v2455_v50 = vrot.slane %v2453_v48, 5  ;;  %v2600_v25 = vsel %vm5346_vm8, %v4811_v43, %v2599_v7  ;;  %v1492_v54 = vld [vmem:[#allocation2 + $0xb4] sm:$0xf] }
 0x160   : > { %v6757_v31 = vpop.permute.xlu0 %3241  ;;  %v2662_v19 = vrot.slane %v6697_v59, 5  ;;  %v2603_v47 = vsel %vm5346_vm8, %v2601_v36, %v2602_v30  ;;  %v4819_v53 = vrot.slane %v2517_v5, 9  ;;  %v2657_v58 = vrot.slane %v2655_v35, 4 }
 0x161   : > { %v2456_v29 = vsel %vm5396_vm14, %v2451_v62, %v2455_v50  ;;  %v4955_v3 = vcombine.low %v2600_v25, %v2603_v47  ;;  %v2658_v17 = vrot.slane %v6712_v6, 5  ;;  %v4812_v51 = vrot.slane %v2510_v12, 9  ;;  %v6818_v47 = vld [vmem:[#allocation2 + $0x5c] sm:$0x1] }
 0x162   : > { %3315 = vrot.lane.b32.xlu0 %v4940_v42, %s5261_s9  ;;  %v4948_v59 = vcombine.low %v2446_v9, %v2456_v29  ;;  %v2656_v7 = vsel %vm5346_vm8, %v4819_v53, %v2655_v35  ;;  %v2608_v5 = vrot.slane %v2606_v28, 4  ;;  %v2609_v34 = vrot.slane %v6731_v63, 5  ;;  %v6795_v9 = vld [vmem:[#allocation2 + $0xb8] sm:$0xf] }
 0x163   : > { %v6774_v8 = vpop.permute.xlu1 %3131  ;;  %v2659_v20 = vsel %vm5346_vm8, %v2657_v58, %v2658_v17  ;;  %v2607_v6 = vsel %vm5346_vm8, %v4812_v51, %v2606_v28  ;;  %v4820_v46 = vrot.slane %v2518_v40, 9  ;;  %v3503_v43 = vsel %vm3499_vm2, %v6725_v41, %v6608_v10  ;;  %v319_v28 = vld [vmem:[#allocation2 + $0xc0] sm:$0x1]  ;;  %v7936_v17 = vld [vmem:[#allocation11_spill] sm:$0xff] }
 0x164   : > { %v6776_v48 = vpop.permute.xlu0 %3243  ;;  %v3517_v35 = vsel %vm3499_vm2, %v6661_v44, %v6629_v39  ;;  %3331 = vrot.lane.b32.xlu1 %v4948_v59, %s5261_s9  ;;  %v4963_v63 = vcombine.low %v2656_v7, %v2659_v20  ;;  %v2610_v45 = vsel %vm5346_vm8, %v2608_v5, %v2609_v34  ;;  %v3519_v36 = vsel %vm3499_vm2, %v6674_v33, %v6699_v57  ;;  %v411_v44 = vld [vmem:[%s5338_s23 + $0x78] sm:$0xf]  ;;  %v412_v57 = vld [vmem:[%s5338_s23 + $0x7c] sm:$0xf] }
 0x165   : > { %v2663_v10 = vsel %vm5346_vm8, %v4820_v46, %v2662_v19  ;;  %v2664_v41 = vrot.slane %v2662_v19, 4  ;;  %v2665_v39 = vrot.slane %v6738_v0, 5  ;;  %v3534_v42 = vsel %vm3532_vm4, %v6720_v49, %v6714_v16  ;;  %v7937_v20 = vld [vmem:[#allocation7_spill] sm:$0xff] }
 0x166   : > { %3393 = vrot.lane.b32.xlu0 %v4955_v3, %s5262_s10  ;;  %v4956_v62 = vcombine.low %v2607_v6, %v2610_v45  ;;  %v1849_v50 = vshrl.u32 %v1492_v54, 16  ;;  %v1852_v33 = vshll.u32 %v1492_v54, 16  ;;  %v1862_v0 = vshrl.u32 %v6795_v9, 16 }
 0x167   : > { %v6804_v30 = vpop.permute.xlu1 %3225  ;;  %v2666_v25 = vsel %vm5346_vm8, %v2664_v41, %v2665_v39  ;;  %v320_v19 = vsel %vm5306_vm3, 0, %v319_v28  ;;  %v671_v58 = vshrl.u32 %v411_v44, 16  ;;  %v674_v40 = vshll.u32 %v411_v44, 16  ;;  %v6842_v41 = vld [vmem:[#allocation2 + $0xbc] sm:$0x1] }
 0x168   : > { %v6806_v12 = vpop.permute.xlu0 %3321  ;;  %3409 = vrot.lane.b32.xlu1 %v4963_v63, %s5262_s10  ;;  %v4964_v16 = vcombine.low %v2663_v10, %v2666_v25  ;;  %v1851_v49 = vrot.slane %v1849_v50, 4  ;;  %v1854_v53 = vrot.slane %v1852_v33, 5  ;;  %321 = vst [vmem:[#allocation2 + $0xc0] sm:$0x1] %v320_v19  ;;  %v679_v29 = vshrl.u32 %v412_v57, 16 }
 0x169   : > { %v682_v3 = vshll.u32 %v412_v57, 16  ;;  %v1669_v51 = vsel %vm5396_vm14, %v7936_v17, %v6131_v37  ;;  %v4885_v5 = vcombine.low %v1492_v54, %v6795_v9  ;;  %v673_v34 = vrot.slane %v671_v58, 7  ;;  %v7938_v57 = vld [vmem:[#allocation12_spill] sm:$0xff] }
 0x16a   : > { %3395 = vrot.lane.b32.xlu0 %v4956_v62, %s5262_s10  ;;  %v1673_v6 = vor.u32 %v7937_v20, %v6131_v37  ;;  %v1676_v46 = vshll.u32 %v6818_v47, 16  ;;  %v3550_v63 = vsel %vm3532_vm4, %v3517_v35, %v6686_v61  ;;  %v3536_v45 = vsel %vm3532_vm4, %v3503_v43, %v6740_v11  ;;  %v6849_v43 = vld [vmem:[#allocation2 + $0x68] sm:$0x1] }
 0x16b   : > { %v6825_v59 = vpop.permute.xlu1 %3227  ;;  %v3552_v28 = vsel %vm3532_vm4, %v3519_v36, %v6701_v23  ;;  %v6840_v10 = vrot.slane %v679_v29, 7  ;;  %v676_v54 = vor.u32 %v674_v40, %v673_v34  ;;  %v677_v39 = vrot.slane %v673_v34, 4 }
 0x16c   : > { %v6827_v7 = vpop.permute.xlu0 %3323  ;;  %3411 = vrot.lane.b32.xlu1 %v4964_v16, %s5262_s10  ;;  %v1674_v37 = vrot.slane %v1673_v6, 4  ;;  %v1678_v44 = vrot.slane %v1676_v46, 5  ;;  %v3567_v62 = vsel %vm3565_vm6, %v3534_v42, %v6755_v32  ;;  %v1855_v35 = vor.u32 %v1854_v53, %v1851_v49  ;;  %v375_v42 = vld [vmem:[#allocation2 + $0xc8] sm:$0x1] }
 0x16d   : > { %v684_v61 = vor.u32 %v682_v3, %v6840_v10  ;;  %v1858_v11 = vshll.u32 %v6795_v9, 16  ;;  %v1864_v50 = vrot.slane %v1862_v0, 4  ;;  %v1868_v33 = vshll.u32 %v6842_v41, 16  ;;  %v1902_v0 = vld [vmem:[#allocation2 + $0x54] sm:$0xe] }
 0x16e   : > { %2997 = vrot.lane.b32.xlu0 %v4885_v5, %s5257_s26  ;;  %v1679_v36 = vsel %vm5396_vm14, %v1674_v37, %v1678_v44  ;;  %v1693_v32 = vsel %vm5396_vm14, %v6670_v13, %v7938_v57  ;;  %v1697_v40 = vor.u32 %v6510_v55, %v7938_v57  ;;  %v3583_v29 = vsel %vm3565_vm6, %v3550_v63, %v6716_v4 }
 0x16f   : > { %v6851_v23 = vpop.permute.xlu1 %3305  ;;  %v685_v16 = vsel %vm5371_vm13, %v677_v39, %v684_v61  ;;  %v843_v49 = vld [vmem:[#allocation2 + $0xc0] sm:$0xf]  ;;  %v4893_v53 = vcombine.low %v1669_v51, %v1679_v36  ;;  %v1860_v58 = vrot.slane %v1858_v11, 5  ;;  %v1700_v13 = vshll.u32 %v6849_v43, 16  ;;  %v1910_v36 = vld [vmem:[#allocation2 + $0xb4] sm:$0xe] }
 0x170   : > { %v6861_v25 = vpop.permute.xlu0 %3401  ;;  %v844_v17 = vsel %vm5364_vm12, %v676_v54, %v843_v49  ;;  %846 = vst.msk [vmem:[#allocation2 + $0xc4] sm:$0xf] %vm259_vm0, %v685_v16  ;;  %v1856_v5 = vrot.slane %v1855_v35, 4  ;;  %v1870_v51 = vrot.slane %v1868_v33, 5  ;;  %v1698_v20 = vrot.slane %v1697_v40, 4  ;;  %v7942_v54 = vld [vmem:[#allocation6_spill] sm:$0xff] }
 0x171   : > { %845 = vst [vmem:[#allocation2 + $0xc0] sm:$0xf] %v844_v17  ;;  %v1865_v34 = vor.u32 %v1864_v50, %v1860_v58  ;;  %v1702_v55 = vrot.slane %v1700_v13, 5  ;;  %v376_v4 = vsel %vm5313_vm5, 0, %v375_v42  ;;  %v4797_v63 = vrot.slane %v1902_v0, 9 }
 0x172   : > { %3061 = vrot.lane.b32.xlu0 %v4893_v53, %s5258_s27  ;;  %v7943_v39 = vrot.slane %v7942_v54, 5  ;;  %v3569_v44 = vsel %vm3565_vm6, %v3536_v45, %v6774_v8  ;;  %v6884_v61 = vsel %vm3565_vm6, %v3552_v28, %v6742_v60  ;;  %377 = vst [vmem:[#allocation2 + $0xc8] sm:$0x1] %v376_v4  ;;  %v2007_v11 = vrot.slane %v6818_v47, 5  ;;  %v1903_v50 = vld [vmem:[#allocation2 + $0x60] sm:$0xe] }
 0x173   : > { %v6873_v6 = vpop.permute.xlu1 %3307  ;;  %v1866_v35 = vrot.slane %v1865_v34, 4  ;;  %v3600_v33 = vsel %vm3598_vm7, %v3567_v62, %v6804_v30  ;;  %v3616_v57 = vsel %vm3598_vm7, %v3583_v29, %v6757_v31  ;;  %v1703_v42 = vsel %vm5396_vm14, %v1698_v20, %v1702_v55 }
 0x174   : > { %v2006_v37 = vrot.slane %v7943_v39, 4  ;;  %v7944_v8 = vmov %v7943_v39  ;;  %v6897_v45 = vpop.permute.xlu0 %3403  ;;  %v686_v47 = vrot.slane %v6840_v10, 4  ;;  %v4894_v28 = vcombine.low %v1693_v32, %v1703_v42 }
 0x175   : > { %v2005_v60 = vsel %vm5346_vm8, %v4797_v63, %v7944_v8  ;;  %v2060_v30 = vrot.slane %v6795_v9, 5  ;;  %v1861_v31 = vsel %vm5396_vm14, %v1856_v5, %v1860_v58  ;;  %v1871_v16 = vsel %vm5396_vm14, %v1866_v35, %v1870_v51 }
 0x176   : > { %v2008_v19 = vsel %vm5346_vm8, %v2006_v37, %v2007_v11  ;;  %v4805_v49 = vrot.slane %v1910_v36, 9  ;;  %v4798_v53 = vrot.slane %v1903_v50, 9  ;;  %3063 = vrot.lane.b32.xlu0 %v4894_v28, %s5258_s27  ;;  %v2063_v32 = vrot.slane %v6842_v41, 5 }
 0x177   : > { %v6903_v62 = vpop.permute.xlu1 %3385  ;;  %v6909_v40 = vld [vmem:[#allocation2 + $0xc4] sm:$0xf]  ;;  %v4909_v10 = vcombine.low %v2005_v60, %v2008_v19  ;;  %v7945_v0 = vrot.slane %v5967_v14, 5  ;;  %v2014_v29 = vrot.slane %v6849_v43, 5  ;;  %v2062_v13 = vrot.slane %v2060_v30, 4 }
 0x178   : > { %v1494_v3 = vld [vmem:[#allocation2 + $0xc0] sm:$0xf]  ;;  %v1886_v58 = vshrl.u32 %v6909_v40, 16  ;;  %v1882_v17 = vshll.u32 %v6909_v40, 16  ;;  %vm3631_vm0 = vcmask 687104   ;;  %v4901_v43 = vcombine.low %v1861_v31, %v1871_v16  ;;  %v6929_v35 = vpop.permute.xlu0 %3053 }
 0x179   : > { %v2013_v9 = vrot.slane %v7945_v0, 4  ;;  %v7946_v5 = vmov %v7945_v0  ;;  %v1873_v51 = vshrl.u32 %v1494_v3, 16  ;;  %v1876_v20 = vshll.u32 %v1494_v3, 16  ;;  %v1911_v55 = vld [vmem:[#allocation2 + $0xc0] sm:$0xe] }
 0x17a   : > { %v2012_v34 = vsel %vm5346_vm8, %v4798_v53, %v7946_v5  ;;  %v4886_v41 = vcombine.low %v1494_v3, %v6909_v40  ;;  %v847_v63 = vld [vmem:[#allocation2 + $0xc8] sm:$0x1]  ;;  %v6925_v54 = vrot.slane %v1882_v17, 5  ;;  %v1888_v39 = vrot.slane %v1886_v58, 4  ;;  %v2085_v14 = vld [vmem:[#allocation2 + $0x60] sm:$0xf]  ;;  %3141 = vrot.lane.b32.xlu0 %v4909_v10, %s5259_s28 }
 0x17b   : > { %v6923_v4 = vpop.permute.xlu1 %3387  ;;  %v2015_v37 = vsel %vm5346_vm8, %v2013_v9, %v2014_v29  ;;  %v1875_v11 = vrot.slane %v1873_v51, 4  ;;  %v1878_v36 = vrot.slane %v1876_v20, 5  ;;  %v848_v50 = vsel %vm5306_vm3, %v686_v47, %v847_v63  ;;  %v6944_v31 = vld [vmem:[#allocation2 + $0x64] sm:$0xf]  ;;  %v5203_v47 = vld [vmem:[%s7861_s2 + $0x30] sm:$0x3f]  }
 0x17c   : > { %2999 = vrot.lane.b32.xlu1 %v4886_v41, %s5257_s26  ;;  %v4910_v42 = vcombine.low %v2012_v34, %v2015_v37  ;;  %849 = vst [vmem:[#allocation2 + $0xc8] sm:$0x1] %v848_v50  ;;  %v1889_v8 = vor.u32 %v1888_v39, %v6925_v54  ;;  %v6938_v60 = vsel %vm5346_vm8, %v4805_v49, %v2060_v30  ;;  %v4806_v19 = vrot.slane %v1911_v55, 9  ;;  %v2087_v3 = vld [vmem:[#allocation2 + $0x6c] sm:$0xf]  ;;  %s7136_s26 = scalar_lea.vmem %s7860_s1, %s5026_s24 }
 0x17d   : > { %v6942_v28 = vsel %vm5346_vm8, %v2062_v13, %v2063_v32  ;;  %v3602_v16 = vsel %vm3598_vm7, %v3569_v44, %v6825_v59  ;;  %v1879_v53 = vor.u32 %v1878_v36, %v1875_v11  ;;  %v2067_v10 = vrot.slane %v6909_v40, 5  ;;  %5144 = vmatprep.subr.msk.bf16.mxu0 %vm3792_vm9, %v5203_v47  ;;  %5145 = vmatprep.subr.msk.bf16.mxu1 %vm3792_vm9, %v5203_v47  ;;  %v6983_v5 = vld [vmem:[#allocation2 + $0xc4] sm:$0xf]  ;;  %v322_v55 = vld [vmem:[#allocation2 + $0xcc] sm:$0x1] }
 0x17e   : > { %v2266_v0 = vshrl.u32 %v2085_v14, 16  ;;  %v3618_v49 = vsel %vm3598_vm7, %v6884_v61, %v6776_v48  ;;  %v3633_v32 = vsel %vm3631_vm0, %v3600_v33, %v6851_v23  ;;  %v3649_v9 = vsel %vm3631_vm0, %v3616_v57, %v6806_v12  ;;  %v6961_v58 = vpop.permute.xlu0 %3055  ;;  %3143 = vrot.lane.b32.xlu0 %v4910_v42, %s5259_s28  ;;  %v6970_v23 = vld [vmem:[#allocation2 + $0xc0] sm:$0xf] }
 0x17f   : > { %v6952_v30 = vpop.permute.xlu1 %2991  ;;  %v2269_v29 = vshll.u32 %v2085_v14, 16  ;;  %v4917_v59 = vcombine.low %v6938_v60, %v6942_v28  ;;  %v3635_v48 = vsel %vm3631_vm0, %v3602_v16, %v6873_v6  ;;  %v4925_v44 = vcombine.low %v2085_v14, %v6944_v31  ;;  %v6981_v6 = vld [vmem:[#allocation2 + $0x70] sm:$0xf] }
 0x180   : > { %3077 = vrot.lane.b32.xlu1 %v4901_v43, %s5258_s27  ;;  %v1890_v12 = vrot.slane %v1889_v8, 4  ;;  %v3651_v61 = vsel %vm3631_vm0, %v3618_v49, %v6827_v7  ;;  %v6976_v33 = vsel %vm5346_vm8, %v4806_v19, %v2067_v10  ;;  %v2279_v57 = vshrl.u32 %v6944_v31, 16  ;;  %v7000_v8 = vld [vmem:[#allocation2 + $0x68] sm:$0x1] }
 0x181   : > { %v1880_v40 = vrot.slane %v1879_v53, 4  ;;  %v2069_v17 = vrot.slane %v2067_v10, 4  ;;  %v2268_v13 = vrot.slane %v2266_v0, 4  ;;  %v2290_v34 = vshrl.u32 %v2087_v3, 16 }
 0x182   : > { %v2271_v7 = vrot.slane %v2269_v29, 5  ;;  %v2458_v20 = vshrl.u32 %v6970_v23, 16  ;;  %v2461_v41 = vshll.u32 %v6970_v23, 16  ;;  %v6989_v43 = vpop.permute.xlu0 %3133  ;;  %3237 = vrot.lane.b32.xlu0 %v4925_v44, %s5260_s6  ;;  %v2293_v39 = vshll.u32 %v2087_v3, 16 }
 0x183   : > { %v6985_v51 = vpop.permute.xlu1 %3069  ;;  %v1511_v63 = vld [vmem:[#allocation2 + $0xc8] sm:$0x1]  ;;  %v4926_v37 = vcombine.low %v2087_v3, %v6981_v6  ;;  %v3666_v14 = vsel %vm3664_vm10, %v3633_v32, %v6903_v62  ;;  %v2471_v36 = vshrl.u32 %v6983_v5, 16  ;;  %v3682_v50 = vsel %vm3664_vm10, %v3649_v9, %v6861_v25  ;;  %v7016_v9 = vld [vmem:[#allocation2 + $0xd0] sm:$0xf] }
 0x184   : > { %v1892_v11 = vshll.u32 %v1511_v63, 16  ;;  %5098 = vmatprep.mubr.msk.bf16.mxu0 %vm3759_vm11, %v3666_v14  ;;  %v3794_v42 = vsel %vm3792_vm9, %v5203_v47, 0  ;;  %v1885_v19 = vsel %vm5396_vm14, %v1880_v40, %v6925_v54  ;;  %v2292_v16 = vrot.slane %v2290_v34, 4  ;;  %5114 = vmatprep.mubr.msk.bf16.mxu1 %vm3759_vm11, %v3682_v50  ;;  %v7027_v34 = vld [vmem:[#allocation2 + $0x74] sm:$0x1] }
 0x185   : > { %5097 = vmatpush3.bf16.msra.mxu0 %v3794_v42  ;;  %v3668_v62 = vsel %vm3664_vm10, %v3635_v48, %v6923_v4  ;;  %v323_v53 = vsel %vm5306_vm3, 0, %v322_v55  ;;  %5143 = vmatpush3.bf16.msra.mxu1 %v3794_v42  ;;  %v3684_v47 = vsel %vm3664_vm10, %v3651_v61, %v6897_v45  ;;  %v2272_v0 = vor.u32 %v2271_v7, %v2268_v13 }
 0x186   : > { %v1894_v25 = vrot.slane %v1892_v11, 5  ;;  %324 = vst [vmem:[#allocation2 + $0xcc] sm:$0x1] %v323_v53  ;;  %v2275_v54 = vshll.u32 %v6944_v31, 16  ;;  %v2070_v49 = vrot.slane %v1511_v63, 5  ;;  %v2295_v32 = vrot.slane %v2293_v39, 5  ;;  %3239 = vrot.lane.b32.xlu0 %v4926_v37, %s5260_s6  ;;  %v7019_v29 = vpop.permute.xlu0 %3135 }
 0x187   : > { %v7010_v10 = vpop.permute.xlu1 %3071  ;;  %v2281_v4 = vrot.slane %v2279_v57, 4  ;;  %v2285_v1 = vshll.u32 %v7000_v8, 16  ;;  %v2303_v45 = vshrl.u32 %v6981_v6, 16  ;;  %v2273_v48 = vrot.slane %v2272_v0, 4  ;;  %v7032_v39 = vld [vmem:[#allocation2 + $0xc8] sm:$0x1] }
 0x188   : > { %v1895_v3 = vsel %vm5396_vm14, %v1890_v12, %v1894_v25  ;;  %v2277_v44 = vrot.slane %v2275_v54, 5  ;;  %5099 = vmatmul.mubr.msk.bf16.vlgmr.msra.gmra.mrb[0].mxu0 %vm3759_vm11, %v3668_v62  ;;  %v2460_v40 = vrot.slane %v2458_v20, 4  ;;  %v2463_v13 = vrot.slane %v2461_v41, 5  ;;  %5115 = vmatmul.mubr.msk.bf16.vlgmr.msra.gmra.mrb[0].mxu1 %vm3759_vm11, %v3684_v47 }
 0x189   : > { %v4902_v61 = vcombine.low %v1885_v19, %v1895_v3  ;;  %v2467_v57 = vshll.u32 %v6983_v5, 16  ;;  %v2495_v55 = vshrl.u32 %v7016_v9, 16  ;;  %v2287_v63 = vrot.slane %v2285_v1, 5  ;;  %v378_v1 = vld [vmem:[#allocation2 + $0xd4] sm:$0x1] }
 0x18a   : > { %v2282_v12 = vor.u32 %v2281_v4, %v2277_v44  ;;  %v2473_v37 = vrot.slane %v2471_v36, 4  ;;  %v2071_v20 = vsel %vm5346_vm8, %v2069_v17, %v2070_v49  ;;  %v2296_v14 = vor.u32 %v2295_v32, %v2292_v16  ;;  %v7043_v53 = vpop.permute.xlu0 %3229 }
 0x18b   : > { %v7029_v7 = vpop.permute.xlu1 %3149  ;;  %3079 = vrot.lane.b32.xlu1 %v4902_v61, %s5258_s27  ;;  %v7037_v41 = vrot.slane %v2467_v57, 5  ;;  %v2299_v11 = vshll.u32 %v6981_v6, 16  ;;  %v2278_v50 = vsel %vm5396_vm14, %v2273_v48, %v2277_v44  ;;  %v2305_v19 = vrot.slane %v2303_v45, 4  ;;  %v2511_v57 = vld [vmem:[#allocation2 + $0x60] sm:$0xe] }
 0x18c   : > { %v2283_v42 = vrot.slane %v2282_v12, 4  ;;  %v2309_v62 = vshll.u32 %v7027_v34, 16  ;;  %v2464_v25 = vor.u32 %v2463_v13, %v2460_v40  ;;  %v2477_v47 = vshll.u32 %v7032_v39, 16 }
 0x18d   : > { %v7045_v36 = vld [vmem:[#allocation2 + $0xcc] sm:$0xf]  ;;  %v2297_v17 = vrot.slane %v2296_v14, 4  ;;  %v2301_v0 = vrot.slane %v2299_v11, 5  ;;  %v2474_v4 = vor.u32 %v2473_v37, %v7037_v41  ;;  %v4918_v3 = vcombine.low %v6976_v33, %v2071_v20 }
 0x18e   : > { %v2482_v16 = vshrl.u32 %v7045_v36, 16  ;;  %v2485_v49 = vshll.u32 %v7045_v36, 16  ;;  %v2288_v32 = vsel %vm5396_vm14, %v2283_v42, %v2287_v63  ;;  %v4933_v44 = vcombine.low %v6970_v23, %v6983_v5  ;;  %v7070_v14 = vpop.permute.xlu0 %3231 }
 0x18f   : > { %v7048_v54 = vpop.permute.xlu1 %3151  ;;  %3157 = vrot.lane.b32.xlu1 %v4917_v59, %s5259_s28  ;;  %v4941_v45 = vcombine.low %v2278_v50, %v2288_v32  ;;  %v2306_v48 = vor.u32 %v2305_v19, %v2301_v0  ;;  %v2311_v13 = vrot.slane %v2309_v62, 5  ;;  %v2465_v12 = vrot.slane %v2464_v25, 4  ;;  %v5238_v19 = vld [vmem:[#allocation2 + $0x18] sm:$0xf]  ;;  %v5239_v62 = vld [vmem:[#allocation2 + $0x1c] sm:$0xf] }
 0x190   : > { %v2484_v61 = vrot.slane %v2482_v16, 4  ;;  %v2487_v40 = vrot.slane %v2485_v49, 5  ;;  %v2302_v63 = vsel %vm5396_vm14, %v2297_v17, %v2301_v0  ;;  %v379_v60 = vsel %vm5313_vm5, 0, %v378_v1  ;;  %v5240_v16 = vld [vmem:[#allocation2 + $0x78] sm:$0xf] }
 0x191   : > { %3317 = vrot.lane.b32.xlu0 %v4941_v45, %s5261_s9  ;;  %v2307_v37 = vrot.slane %v2306_v48, 4  ;;  %v2475_v59 = vrot.slane %v2474_v4, 4  ;;  %v2479_v33 = vrot.slane %v2477_v47, 5  ;;  %380 = vst [vmem:[#allocation2 + $0xd4] sm:$0x1] %v379_v60  ;;  %v2491_v23 = vshll.u32 %v7016_v9, 16 }
 0x192   : > { %v2497_v20 = vrot.slane %v2495_v55, 4  ;;  %v4813_v50 = vrot.slane %v2511_v57, 9  ;;  %v2613_v42 = vrot.slane %v6944_v31, 5  ;;  %v2616_v46 = vrot.slane %v7000_v8, 5  ;;  %v2512_v55 = vld [vmem:[#allocation2 + $0x6c] sm:$0xe] }
 0x193   : > { %v7067_v28 = vpop.permute.xlu1 %3245  ;;  %3159 = vrot.lane.b32.xlu1 %v4918_v3, %s5259_s28  ;;  %v2312_v11 = vsel %vm5396_vm14, %v2307_v37, %v2311_v13  ;;  %v4825_v25 = vcombine.low %v5238_v19, %v5239_v62  ;;  %v2488_v17 = vor.u32 %v2487_v40, %v2484_v61  ;;  %v7077_v0 = vrot.slane %v2491_v23, 5  ;;  %v5241_v49 = vld [vmem:[#allocation2 + $0x7c] sm:$0xf]  ;;  %v5243_v37 = vld [vmem:[#allocation2 + $0x28] sm:$0xf]  ;;  %v7949_v19 = vld [vmem:[#allocation14_spill] sm:$0xff] }
 0x194   : > { %v4942_v47 = vcombine.low %v2302_v63, %v2312_v11  ;;  %v4833_v32 = vcombine.low %v5240_v16, %v5241_v49  ;;  %v2470_v4 = vsel %vm5396_vm14, %v2465_v12, %v7037_v41  ;;  %v2614_v31 = vsel %vm5346_vm8, %v4813_v50, %v2613_v42  ;;  %v5242_v63 = vld [vmem:[#allocation2 + $0x24] sm:$0xf]  ;;  %v2519_v23 = vld [vmem:[#allocation2 + $0xc0] sm:$0xe]  ;;  %v5245_v50 = vld [vmem:[#allocation2 + $0x88] sm:$0xf] }
 0x195   : > { %v2615_v1 = vrot.slane %v2613_v42, 4  ;;  %v4934_v3 = vcombine.low %v7045_v36, %v7016_v9  ;;  %v2480_v45 = vsel %vm5396_vm14, %v2475_v59, %v2479_v33  ;;  %v2498_v48 = vor.u32 %v2497_v20, %v7077_v0  ;;  %v7947_v36 = vld [vmem:[#allocation8_spill] sm:$0xff]  ;;  %v7948_v20 = vld [vmem:[#allocation10_spill] sm:$0xff] }
 0x196   : > { %3319 = vrot.lane.b32.xlu0 %v4942_v47, %s5261_s9  ;;  %v2669_v61 = vrot.slane %v6983_v5, 5  ;;  %v4814_v40 = vrot.slane %v2512_v55, 9  ;;  %v2620_v13 = vrot.slane %v6981_v6, 5  ;;  %v2623_v57 = vrot.slane %v7027_v34, 5  ;;  %v5244_v11 = vld [vmem:[#allocation2 + $0x84] sm:$0xf] }
 0x197   : > { %v7084_v8 = vpop.permute.xlu1 %3247  ;;  %3253 = vrot.lane.b32.xlu1 %v4933_v44, %s5260_s6  ;;  %v2617_v41 = vsel %vm5346_vm8, %v2615_v1, %v2616_v46  ;;  %v3426_v12 = vsel %vm3417_vm15, %v4825_v25, %v7947_v36  ;;  %v4826_v60 = vcombine.low %v5242_v63, %v5243_v37  ;;  %v2489_v59 = vrot.slane %v2488_v17, 4  ;;  %v2520_v36 = vld [vmem:[#allocation2 + $0xcc] sm:$0xe] }
 0x198   : > { %v4957_v33 = vcombine.low %v2614_v31, %v2617_v41  ;;  %v3450_v44 = vsel %vm3417_vm15, %v4833_v32, %v7948_v20  ;;  %v4834_v42 = vcombine.low %v5244_v11, %v5245_v50  ;;  %v2120_v6 = vld [vmem:[#allocation2 + $0xd4] sm:$0x1]  ;;  %v2621_v34 = vsel %vm5346_vm8, %v4814_v40, %v2620_v13  ;;  %v7950_v41 = vld [vmem:[#allocation9_spill] sm:$0xff] }
 0x199   : > { %v2622_v46 = vrot.slane %v2620_v13, 4  ;;  %v3472_v62 = vsel %vm3466_vm1, %v3426_v12, %v7949_v19  ;;  %v4949_v25 = vcombine.low %v2470_v4, %v2480_v45  ;;  %v2499_v47 = vrot.slane %v2498_v48, 4 }
 0x19a   : > { %v3310_v5 = vpop.permute.xlu0 %3309  ;;  %v2501_v17 = vshll.u32 %v2120_v6, 16  ;;  %3397 = vrot.lane.b32.xlu0 %v4957_v33, %s5262_s10  ;;  %v4821_v16 = vrot.slane %v2519_v23, 9  ;;  %v2671_v49 = vrot.slane %v2669_v61, 4  ;;  %v2672_v32 = vrot.slane %v7032_v39, 5 }
 0x19b   : > { %v3326_v55 = vpop.permute.xlu1 %3325  ;;  %3255 = vrot.lane.b32.xlu1 %v4934_v3, %s5260_s6  ;;  %v2624_v31 = vsel %vm5346_vm8, %v2622_v46, %v2623_v57  ;;  %v2494_v1 = vsel %vm5396_vm14, %v2489_v59, %v7077_v0  ;;  %v2676_v48 = vrot.slane %v7016_v9, 5  ;;  %v3429_v40 = vsel %vm3417_vm15, %v4826_v60, %v7950_v41  ;;  %v7951_v3 = vld [vmem:[#allocation13_spill] sm:$0xff]  ;;  %v3993_v41 = vld [vmem:[%s7136_s26 + $0x20] sm:$0xff] }
 0x19c   : > { %v2503_v4 = vrot.slane %v2501_v17, 5  ;;  %v4958_v45 = vcombine.low %v2621_v34, %v2624_v31  ;;  %v3453_v13 = vsel %vm3417_vm15, %v4834_v42, %v7951_v3  ;;  %v3488_v39 = vsel %vm3466_vm1, %v3450_v44, %v6476_v2  ;;  %v3998_v31 = vld [vmem:[%s7136_s26 + $0x48] sm:$0xff] }
 0x19d   : > { %v3505_v57 = vsel %vm3499_vm2, %v3472_v62, %v6569_v21  ;;  %v3474_v0 = vsel %vm3466_vm1, %v3429_v40, %v6458_v52  ;;  %v3521_v9 = vsel %vm3499_vm2, %v3488_v39, %v6647_v56  ;;  %v2670_v21 = vsel %vm5346_vm8, %v4821_v16, %v2669_v61  ;;  %v3989_v56 = vld [vmem:[%s7136_s26] sm:$0xff]  ;;  %v4002_v3 = vld [vmem:[%s7136_s26 + $0x68] sm:$0xff] }
 0x19e   : > { %v3312_v12 = vpop.permute.xlu0 %3311  ;;  %v3538_v63 = vsel %vm3532_vm4, %v3505_v57, %v6929_v35  ;;  %v2504_v37 = vsel %vm5396_vm14, %v2499_v47, %v2503_v4  ;;  %3399 = vrot.lane.b32.xlu0 %v4958_v45, %s5262_s10  ;;  %v2673_v24 = vsel %vm5346_vm8, %v2671_v49, %v2672_v32  ;;  %v4822_v35 = vrot.slane %v2520_v36, 9  ;;  %v3994_v47 = vld [vmem:[%s7136_s26 + $0x28] sm:$0xff]  ;;  %v3996_v49 = vld [vmem:[%s7136_s26 + $0x38] sm:$0xff]  ;;  %v3991_v4 = vld [vmem:[%s7136_s26 + $0x10] sm:$0xff] }
 0x19f   : > { %3333 = vrot.lane.b32.xlu1 %v4949_v25, %s5261_s9  ;;  %v4950_v52 = vcombine.low %v2494_v1, %v2504_v37  ;;  %v3571_v2 = vsel %vm3565_vm6, %v3538_v63, %v6989_v43  ;;  %v2678_v60 = vrot.slane %v2676_v48, 4  ;;  %v2679_v59 = vrot.slane %v2120_v6, 5  ;;  %v4000_v45 = vld [vmem:[%s7136_s26 + $0x58] sm:$0xff]  ;;  %v4006_v63 = vld [vmem:[%s7136_s26 + $0x88] sm:$0xff]  ;;  %v3999_v37 = vld [vmem:[%s7136_s26 + $0x50] sm:$0xff] }
 0x1a0   : > { %v3604_v33 = vsel %vm3598_vm7, %v3571_v2, %v7043_v53  ;;  %v3328_v23 = vpop.permute.xlu1 %3327  ;;  %v3490_v20 = vsel %vm3466_vm1, %v3453_v13, %v6545_v15  ;;  %v3507_v43 = vsel %vm3499_vm2, %v3474_v0, %v6627_v22  ;;  %v3554_v61 = vsel %vm3532_vm4, %v3521_v9, %v6985_v51  ;;  %v3995_v13 = vld [vmem:[%s7136_s26 + $0x30] sm:$0xff]  ;;  %v4004_v36 = vld [vmem:[%s7136_s26 + $0x78] sm:$0xff] }
 0x1a1   : > { %v3637_v44 = vsel %vm3631_vm0, %v3604_v33, %v3310_v5  ;;  %v3523_v50 = vsel %vm3499_vm2, %v3490_v20, %v6952_v30  ;;  %v3540_v53 = vsel %vm3532_vm4, %v3507_v43, %v6961_v58  ;;  %v3587_v42 = vsel %vm3565_vm6, %v3554_v61, %v7029_v7  ;;  %v3992_v30 = vld [vmem:[%s7136_s26 + $0x18] sm:$0xff]  ;;  %v4005_v20 = vld [vmem:[%s7136_s26 + $0x80] sm:$0xff]  ;;  %v4014_v43 = vld [vmem:[%s7136_s26 + $0xc8] sm:$0xff] }
 0x1a2   : > { %v3390_v11 = vpop.permute.xlu0 %3389  ;;  %4023 = vperm.xlu0 %5165, %v3989_v56   ;;  %v4965_v22 = vcombine.low %v2670_v21, %v2673_v24  ;;  %v3573_v51 = vsel %vm3565_vm6, %v3540_v53, %v7019_v29  ;;  %v3620_v5 = vsel %vm3598_vm7, %v3587_v42, %v7067_v28  ;;  %v2677_v58 = vsel %vm5346_vm8, %v4822_v35, %v2676_v48  ;;  %v4008_v2 = vld [vmem:[%s7136_s26 + $0x98] sm:$0xff]  ;;  %v4001_v24 = vld [vmem:[%s7136_s26 + $0x60] sm:$0xff]  ;;  %v4010_v35 = vld [vmem:[%s7136_s26 + $0xa8] sm:$0xff] }
 0x1a3   : > { %v3670_v15 = vsel %vm3664_vm10, %v3637_v44, %v3390_v11  ;;  %3335 = vrot.lane.b32.xlu1 %v4950_v52, %s5261_s9  ;;  %v2680_v7 = vsel %vm5346_vm8, %v2678_v60, %v2679_v59  ;;  %v3606_v6 = vsel %vm3598_vm7, %v3573_v51, %v7070_v14  ;;  %v3653_v34 = vsel %vm3631_vm0, %v3620_v5, %v3326_v55  ;;  %v4003_v60 = vld [vmem:[%s7136_s26 + $0x70] sm:$0xff]  ;;  %v7952_v53 = vld [vmem:[#allocation15_spill] sm:$0xff] }
 0x1a4   : > { %5102 = vmatprep.mubr.msk.bf16.mxu0 %vm3759_vm11, %v3670_v15  ;;  %v3406_v46 = vpop.permute.xlu1 %3405  ;;  %v3556_v29 = vsel %vm3532_vm4, %v3523_v50, %v7010_v10  ;;  %v3639_v28 = vsel %vm3631_vm0, %v3606_v6, %v3312_v12  ;;  %v4966_v14 = vcombine.low %v2677_v58, %v2680_v7  ;;  %v3997_v12 = vld [vmem:[%s7136_s26 + $0x40] sm:$0xff]  ;;  %v4007_v44 = vld [vmem:[%s7136_s26 + $0x90] sm:$0xff]  ;;  %v4016_v50 = vld [vmem:[%s7136_s26 + $0xd8] sm:$0xff]  ;;  %v3509_v42 = vsel %vm3499_vm2, %v7952_v53, %v6586_v18 }
 0x1a5   : > { %v3686_v19 = vsel %vm3664_vm10, %v3653_v34, %v3406_v46  ;;  %v3589_v25 = vsel %vm3565_vm6, %v3556_v29, %v7048_v54  ;;  %v4018_v34 = vld [vmem:[%s7136_s26 + $0xe8] sm:$0xff]  ;;  %vm4501_vm3 = vcmask 27648  }
 0x1a6   : > { %v3392_v62 = vpop.permute.xlu0 %3391  ;;  %5118 = vmatprep.mubr.msk.bf16.mxu1 %vm3759_vm11, %v3686_v19  ;;  %4038 = vperm.xlu0 %5165, %v3992_v30   ;;  %v3622_v10 = vsel %vm3598_vm7, %v3589_v25, %v7084_v8  ;;  %v3990_v8 = vld [vmem:[%s7136_s26 + $0x8] sm:$0xff]  ;;  %v4011_v19 = vld [vmem:[%s7136_s26 + $0xb0] sm:$0xff] }
 0x1a7   : > { %v3672_v26 = vsel %vm3664_vm10, %v3639_v28, %v3392_v62  ;;  %3413 = vrot.lane.b32.xlu1 %v4965_v22, %s5262_s10  ;;  %v3655_v54 = vsel %vm3631_vm0, %v3622_v10, %v3328_v23  ;;  %v4012_v23 = vld [vmem:[%s7136_s26 + $0xb8] sm:$0xff]  ;;  %v4009_v22 = vld [vmem:[%s7136_s26 + $0xa0] sm:$0xff]  ;;  %v7953_v18 = vld [vmem:[#allocation17_spill] sm:$0xff] }
 0x1a8   : > { %5103 = vmatmul.mubr.msk.bf16.gmra.mrb[4].mxu0 %vm3759_vm11, %v3672_v26  ;;  %v3408_v17 = vpop.permute.xlu1 %3407  ;;  %v3511_v46 = vsel %vm3499_vm2, %v7953_v18, %v6645_v27 }
 0x1a9   : > { %v3688_v55 = vsel %vm3664_vm10, %v3655_v54, %v3408_v17 }
 0x1aa   : > { %v7191_v16 = vpop.permute.xlu0 %2993  ;;  %5119 = vmatmul.mubr.msk.bf16.gmra.mrb[4].mxu1 %vm3759_vm11, %v3688_v55  ;;  %4048 = vperm.xlu0 %5165, %v3994_v47  }
 0x1ab   : > { %3415 = vrot.lane.b32.xlu1 %v4966_v14, %s5262_s10  ;;  %v3525_v5 = vsel %vm3499_vm2, %v6518_v38, %v7191_v16  ;;  %v7954_v14 = vld [vmem:[#allocation20_spill] sm:$0xff] }
 0x1ac   : > { %v7197_v32 = vpop.permute.xlu1 %2995 }
 0x1ad   : > { %v3527_v10 = vsel %vm3499_vm2, %v7954_v14, %v7197_v32 }
 0x1ae   : > { %4058 = vperm.xlu0 %5165, %v3996_v49   ;;  %v4020_v49 = vld [vmem:[%s7136_s26 + $0xf8] sm:$0xff] }
 0x1af   : > { %4028 = vperm.xlu1 %5166, %v3990_v8  }
 0x1b1   : > { %v3058_v1 = vpop.permute.xlu0 %3057 }
 0x1b2   : > { %4068 = vperm.xlu0 %5165, %v3998_v31   ;;  %v3542_v51 = vsel %vm3532_vm4, %v3509_v42, %v3058_v1  ;;  %v4013_v1 = vld [vmem:[%s7136_s26 + $0xc0] sm:$0xff] }
 0x1b3   : > { %4033 = vperm.xlu1 %5166, %v3991_v4   ;;  %v3074_v48 = vpop.permute.xlu1 %3073 }
 0x1b4   : > { %v3558_v7 = vsel %vm3532_vm4, %v3525_v5, %v3074_v48 }
 0x1b6   : > { %v3060_v40 = vpop.permute.xlu0 %3059  ;;  %4078 = vperm.xlu0 %5165, %v4000_v45  }
 0x1b7   : > { %4043 = vperm.xlu1 %5166, %v3993_v41   ;;  %v3544_v62 = vsel %vm3532_vm4, %v3511_v46, %v3060_v40  ;;  %v7959_v46 = vld [vmem:[#allocation19_spill] sm:$0xff] }
 0x1ba   : > { %v7205_v39 = vpop.permute.xlu1 %3075  ;;  %v3138_v57 = vpop.permute.xlu0 %3137  ;;  %4088 = vperm.xlu0 %5165, %v4002_v3  }
 0x1bb   : > { %4053 = vperm.xlu1 %5166, %v3995_v13   ;;  %v3575_v30 = vsel %vm3565_vm6, %v3542_v51, %v3138_v57  ;;  %v3560_v17 = vsel %vm3532_vm4, %v3527_v10, %v7205_v39  ;;  %v4015_v13 = vld [vmem:[%s7136_s26 + $0xd0] sm:$0xff]  ;;  %v4017_v57 = vld [vmem:[%s7136_s26 + $0xe0] sm:$0xff] }
 0x1be   : > { %v3154_v0 = vpop.permute.xlu1 %3153  ;;  %v3140_v9 = vpop.permute.xlu0 %3139  ;;  %4098 = vperm.xlu0 %5165, %v4004_v36   ;;  %v4019_v36 = vld [vmem:[%s7136_s26 + $0xf0] sm:$0xff] }
 0x1bf   : > { %4063 = vperm.xlu1 %5166, %v3997_v12   ;;  %v3591_v29 = vsel %vm3565_vm6, %v3558_v7, %v3154_v0  ;;  %v3577_v27 = vsel %vm3565_vm6, %v3544_v62, %v3140_v9 }
 0x1c2   : > { %v3156_v52 = vpop.permute.xlu1 %3155  ;;  %4108 = vperm.xlu0 %5165, %v4006_v63   ;;  %v3234_v21 = vpop.permute.xlu0 %3233 }
 0x1c3   : > { %4073 = vperm.xlu1 %5166, %v3999_v37   ;;  %v3608_v6 = vsel %vm3598_vm7, %v3575_v30, %v3234_v21  ;;  %v3593_v8 = vsel %vm3565_vm6, %v3560_v17, %v3156_v52 }
 0x1c6   : > { %v3250_v56 = vpop.permute.xlu1 %3249  ;;  %4118 = vperm.xlu0 %5165, %v4008_v2   ;;  %v3236_v59 = vpop.permute.xlu0 %3235 }
 0x1c7   : > { %4083 = vperm.xlu1 %5166, %v4001_v24   ;;  %v3624_v25 = vsel %vm3598_vm7, %v3591_v29, %v3250_v56  ;;  %v3610_v55 = vsel %vm3598_vm7, %v3577_v27, %v3236_v59  ;;  %v7956_v59 = vld [vmem:[#allocation16_spill] sm:$0xff] }
 0x1ca   : > { %4128 = vperm.xlu0 %5165, %v4010_v35   ;;  %v3252_v33 = vpop.permute.xlu1 %3251 }
 0x1cb   : > { %4093 = vperm.xlu1 %5166, %v4003_v60   ;;  %v3626_v4 = vsel %vm3598_vm7, %v3593_v8, %v3252_v33  ;;  %v7955_v60 = vld [vmem:[#allocation22_spill] sm:$0xff] }
 0x1cc   : > { %v3513_v33 = vsel %vm3499_vm2, %v7956_v59, %v7955_v60 }
 0x1ce   : > { %4138 = vperm.xlu0 %5165, %v4012_v23  }
 0x1cf   : > { %4103 = vperm.xlu1 %5166, %v4005_v20  }
 0x1d0   : > { %v3314_v61 = vpop.permute.xlu0 %3313 }
 0x1d1   : > { %v3330_v11 = vpop.permute.xlu1 %3329  ;;  %v3641_v28 = vsel %vm3631_vm0, %v3608_v6, %v3314_v61 }
 0x1d2   : > { %4148 = vperm.xlu0 %5165, %v4014_v43   ;;  %v3657_v47 = vsel %vm3631_vm0, %v3624_v25, %v3330_v11  ;;  %v7957_v11 = vld [vmem:[#allocation23_spill] sm:$0xff]  ;;  %v7960_v25 = vld [vmem:[#allocation21_spill] sm:$0xff] }
 0x1d3   : > { %4113 = vperm.xlu1 %5166, %v4007_v44  }
 0x1d4   : > { %v3316_v15 = vpop.permute.xlu0 %3315 }
 0x1d5   : > { %v3643_v32 = vsel %vm3631_vm0, %v3610_v55, %v3316_v15 }
 0x1d6   : > { %v3332_v58 = vpop.permute.xlu1 %3331  ;;  %4158 = vperm.xlu0 %5165, %v4016_v50   ;;  %v7958_v50 = vld [vmem:[#allocation18_spill] sm:$0xff] }
 0x1d7   : > { %4123 = vperm.xlu1 %5166, %v4009_v22   ;;  %v3659_v48 = vsel %vm3631_vm0, %v3626_v4, %v3332_v58  ;;  %v3515_v53 = vsel %vm3499_vm2, %v7958_v50, %v7957_v11 }
 0x1d8   : > { %v3394_v38 = vpop.permute.xlu0 %3393 }
 0x1d9   : > { %v3674_v26 = vsel %vm3664_vm10, %v3641_v28, %v3394_v38 }
 0x1da   : > { %5106 = vmatprep.mubr.msk.bf16.mxu0 %vm3759_vm11, %v3674_v26  ;;  %v3410_v54 = vpop.permute.xlu1 %3409  ;;  %4168 = vperm.xlu0 %5165, %v4018_v34  }
 0x1db   : > { %v3690_v16 = vsel %vm3664_vm10, %v3657_v47, %v3410_v54  ;;  %4133 = vperm.xlu1 %5166, %v4011_v19  }
 0x1dc   : > { %v3396_v31 = vpop.permute.xlu0 %3395  ;;  %5122 = vmatprep.mubr.msk.bf16.mxu1 %vm3759_vm11, %v3690_v16 }
 0x1dd   : > { %v3676_v45 = vsel %vm3664_vm10, %v3643_v32, %v3396_v31 }
 0x1de   : > { %5107 = vmatmul.mubr.msk.bf16.gmra.mrb[8].mxu0 %vm3759_vm11, %v3676_v45  ;;  %v3412_v41 = vpop.permute.xlu1 %3411  ;;  %4178 = vperm.xlu0 %5165, %v4020_v49  }
 0x1df   : > { %v3692_v40 = vsel %vm3664_vm10, %v3659_v48, %v3412_v41  ;;  %4143 = vperm.xlu1 %5166, %v4013_v1   ;;  %v7310_v48 = vld [vmem:[%s7862_s3] ss:$0 sm:$0xff] }
 0x1e0   : > { %v2998_v3 = vpop.permute.xlu0 %2997  ;;  %5123 = vmatmul.mubr.msk.bf16.gmra.mrb[8].mxu1 %vm3759_vm11, %v3692_v40 }
 0x1e1   : > { %v3529_v29 = vsel %vm3499_vm2, %v7959_v46, %v2998_v3 }
 0x1e3   : > { %4153 = vperm.xlu1 %5166, %v4015_v13  }
 0x1e4   : > { %v3062_v39 = vpop.permute.xlu0 %3061 }
 0x1e5   : > { %v3546_v20 = vsel %vm3532_vm4, %v3513_v33, %v3062_v39 }
 0x1e7   : > { %4163 = vperm.xlu1 %5166, %v4017_v57  }
 0x1e8   : > { %v3064_v12 = vpop.permute.xlu0 %3063 }
 0x1e9   : > { %v3548_v22 = vsel %vm3532_vm4, %v3515_v53, %v3064_v12 }
 0x1eb   : > { %4173 = vperm.xlu1 %5166, %v4019_v36  }
 0x1ec   : > { %v3142_v0 = vpop.permute.xlu0 %3141 }
 0x1ed   : > { %v3579_v61 = vsel %vm3565_vm6, %v3546_v20, %v3142_v0 }
 0x1ee   : > { %v3000_v9 = vpop.permute.xlu1 %2999 }
 0x1ef   : > { %v3531_v26 = vsel %vm3499_vm2, %v7960_v25, %v3000_v9 }
 0x1f0   : > { %v3144_v63 = vpop.permute.xlu0 %3143 }
 0x1f1   : > { %v3581_v30 = vsel %vm3565_vm6, %v3548_v22, %v3144_v63 }
 0x1f2   : > { %v3078_v37 = vpop.permute.xlu1 %3077 }
 0x1f3   : > { %v3562_v38 = vsel %vm3532_vm4, %v3529_v29, %v3078_v37 }
 0x1f4   : > { %v3238_v52 = vpop.permute.xlu0 %3237 }
 0x1f5   : > { %v3612_v44 = vsel %vm3598_vm7, %v3579_v61, %v3238_v52 }
 0x1f8   : > { %v3240_v21 = vpop.permute.xlu0 %3239 }
 0x1f9   : > { %v3614_v58 = vsel %vm3598_vm7, %v3581_v30, %v3240_v21 }
 0x1fd   : > { %v3080_v2 = vpop.permute.xlu1 %3079 }
 0x1fe   : > { %v3564_v27 = vsel %vm3532_vm4, %v3531_v26, %v3080_v2 }
 0x201   : > { %v3158_v24 = vpop.permute.xlu1 %3157 }
 0x202   : > { %v3595_v19 = vsel %vm3565_vm6, %v3562_v38, %v3158_v24 }
 0x203   : > { %v3318_v56 = vpop.permute.xlu0 %3317 }
 0x204   : > { %v3645_v42 = vsel %vm3631_vm0, %v3612_v44, %v3318_v56 }
 0x205   : > { %v3160_v35 = vpop.permute.xlu1 %3159 }
 0x206   : > { %v3597_v54 = vsel %vm3565_vm6, %v3564_v27, %v3160_v35 }
 0x208   : > { %v3320_v23 = vpop.permute.xlu0 %3319 }
 0x209   : > { %v3254_v43 = vpop.permute.xlu1 %3253  ;;  %v3647_v7 = vsel %vm3631_vm0, %v3614_v58, %v3320_v23 }
 0x20a   : > { %v3628_v62 = vsel %vm3598_vm7, %v3595_v19, %v3254_v43 }
 0x20c   : > { %v3398_v15 = vpop.permute.xlu0 %3397 }
 0x20d   : > { %v3256_v51 = vpop.permute.xlu1 %3255  ;;  %v3678_v5 = vsel %vm3664_vm10, %v3645_v42, %v3398_v15 }
 0x20e   : > { %5110 = vmatprep.mubr.msk.bf16.mxu0 %vm3759_vm11, %v3678_v5  ;;  %v3630_v17 = vsel %vm3598_vm7, %v3597_v54, %v3256_v51 }
 0x210   : > { %v3400_v6 = vpop.permute.xlu0 %3399 }
 0x211   : > { %v3334_v34 = vpop.permute.xlu1 %3333  ;;  %v3680_v18 = vsel %vm3664_vm10, %v3647_v7, %v3400_v6 }
 0x212   : > { %5111 = vmatmul.mubr.msk.bf16.gmra.mrb[12].mxu0 %vm3759_vm11, %v3680_v18  ;;  %v3661_v14 = vsel %vm3631_vm0, %v3628_v62, %v3334_v34 }
 0x215   : > { %v3336_v28 = vpop.permute.xlu1 %3335 }
 0x216   : > { %v3663_v55 = vsel %vm3631_vm0, %v3630_v17, %v3336_v28 }
 0x219   : > { %v3414_v10 = vpop.permute.xlu1 %3413 }
 0x21a   : > { %v3694_v47 = vsel %vm3664_vm10, %v3661_v14, %v3414_v10 }
 0x21b   : > { %5126 = vmatprep.mubr.msk.bf16.mxu1 %vm3759_vm11, %v3694_v47 }
 0x21d   : > { %v3416_v16 = vpop.permute.xlu1 %3415 }
 0x21e   : > { %v3696_v49 = vsel %vm3664_vm10, %v3663_v55, %v3416_v16 }
 0x21f   : > { %5127 = vmatmul.mubr.msk.bf16.gmra.mrb[12].mxu1 %vm3759_vm11, %v3696_v49 }
 0x221   : > { %v4024_v32 = vpop.permute.xlu0 %4023 }
 0x225   : > { %v7301_v1 = vpop.permute.xlu0 %4038 }
 0x229   : > { %v7305_v45 = vpop.permute.xlu0 %4048 }
 0x22d   : > { %v7314_v40 = vpop.permute.xlu0 %4058 }
 0x22e   : > { %v4029_v8 = vpop.permute.xlu1 %4028 }
 0x231   : > { %v7333_v33 = vpop.permute.xlu0 %4068 }
 0x232   : > { %v7299_v31 = vpop.permute.xlu1 %4033 }
 0x235   : > { %v7354_v50 = vpop.permute.xlu0 %4078 }
 0x236   : > { %v7303_v4 = vpop.permute.xlu1 %4043 }
 0x239   : > { %v7373_v5 = vpop.permute.xlu0 %4088 }
 0x23a   : > { %v7312_v41 = vpop.permute.xlu1 %4053 }
 0x23d   : > { %v7380_v58 = vpop.permute.xlu0 %4098 }
 0x23e   : > { %v7325_v56 = vpop.permute.xlu1 %4063 }
 0x241   : > { %v7384_v6 = vpop.permute.xlu0 %4108 }
 0x242   : > { %v7347_v61 = vpop.permute.xlu1 %4073 }
 0x245   : > { %v7406_v17 = vpop.permute.xlu0 %4118 }
 0x246   : > { %v7367_v22 = vpop.permute.xlu1 %4083 }
 0x24a   : > { %v7378_v30 = vpop.permute.xlu1 %4093 }
 0x24e   : > { %v7382_v7 = vpop.permute.xlu1 %4103 }
 0x252   : > { %v7396_v26 = vpop.permute.xlu1 %4113 }
 0x25b   : > { %v5100_v3 = vpop.f32.mrb[0].mxu0  ;;  %v5116_v39 = vpop.f32.mrb[0].mxu1 }
 0x25c   : > { %v7317_v13 = vadd.f32 %v5100_v3, %v7310_v48  ;;  %v3830_v57 = vpop.f32.mrb[1].mxu0  ;;  %v3894_v12 = vpop.f32.mrb[1].mxu1  ;;  %v7336_v23 = vadd.f32 %v5116_v39, %v7310_v48 }
 0x25d   : > { %v3831_v36 = vadd.f32 %v7310_v48, %v3830_v57  ;;  %v5101_v0 = vpop.f32.mrb[2].mxu0  ;;  %v5117_v37 = vpop.f32.mrb[2].mxu1  ;;  %v7351_v11 = vadd.f32 %v7310_v48, %v3894_v12 }
 0x25e   : > { %v3959_v9 = vmax.f32 %v7317_v13, 0.0  ;;  %v7322_v63 = vadd.f32 %v5101_v0, %v7310_v48  ;;  %v3833_v52 = vpop.f32.mrb[3].mxu0  ;;  %v3897_v24 = vpop.f32.mrb[3].mxu1  ;;  %v7344_v43 = vadd.f32 %v5117_v37, %v7310_v48  ;;  %v3975_v44 = vmax.f32 %v7336_v23, 0.0 }
 0x25f   : > { %v3957_v2 = vmax.f32 %v3831_v36, 0.0  ;;  %v3834_v21 = vadd.f32 %v7310_v48, %v3833_v52  ;;  %v7358_v42 = vadd.f32 %v7310_v48, %v3897_v24  ;;  %v3973_v15 = vmax.f32 %v7351_v11, 0.0  ;;  %v4124_v3 = vpop.permute.xlu1 %4123  ;;  %v4129_v0 = vpop.permute.xlu0 %4128 }
 0x260   : > { %v3960_v35 = vmax.f32 %v7322_v63, 0.0  ;;  %4249 = vrot.lane.b32.xlu1 %v3959_v9, %s5263_s29  ;;  %v3976_v53 = vmax.f32 %v7344_v43, 0.0 }
 0x261   : > { %v3958_v60 = vmax.f32 %v3834_v21, 0.0  ;;  %v7331_v59 = vmul.f32 %v4024_v32, %v3957_v2  ;;  %v7886_v51 = vmax.f32 %v7358_v42, 0.0  ;;  %v4197_v43 = vmul.f32 %v7382_v7, %v3973_v15 }
 0x262   : > { %4251 = vrot.lane.b32.xlu0 %v3960_v35, %s5263_s29 }
 0x263   : > { %v7341_v20 = vmul.f32 %v4029_v8, %v3958_v60 }
 0x264   : > { %4245 = vrot.lane.b32.xlu1 %v3957_v2, %s5263_s29 }
 0x266   : > { %4247 = vrot.lane.b32.xlu0 %v3958_v60, %s5263_s29 }
 0x268   : > { %4281 = vrot.lane.b32.xlu1 %v3975_v44, %s5263_s29 }
 0x26a   : > { %4283 = vrot.lane.b32.xlu0 %v3976_v53, %s5263_s29 }
 0x26c   : > { %4277 = vrot.lane.b32.xlu1 %v3973_v15, %s5263_s29 }
 0x26e   : > { %4279 = vrot.lane.b32.xlu0 %v7886_v51, %s5263_s29 }
 0x27b   : > { %v5104_v34 = vpop.f32.mrb[4].mxu0 }
 0x27c   : > { %v7387_v18 = vadd.f32 %v5104_v34, %v7310_v48  ;;  %v3846_v46 = vpop.f32.mrb[5].mxu0 }
 0x27d   : > { %v5105_v29 = vpop.f32.mrb[6].mxu0  ;;  %v7391_v38 = vadd.f32 %v7310_v48, %v3846_v46  ;;  %v5120_v25 = vpop.f32.mrb[4].mxu1 }
 0x27e   : > { %v7884_v28 = vmax.f32 %v7387_v18, 0.0  ;;  %v7394_v19 = vadd.f32 %v5105_v29, %v7310_v48  ;;  %v3849_v62 = vpop.f32.mrb[7].mxu0  ;;  %v3910_v14 = vpop.f32.mrb[5].mxu1  ;;  %v7410_v49 = vadd.f32 %v5120_v25, %v7310_v48 }
 0x27f   : > { %v7400_v27 = vadd.f32 %v7310_v48, %v3849_v62  ;;  %v3911_v47 = vadd.f32 %v7310_v48, %v3910_v14  ;;  %v5121_v54 = vpop.f32.mrb[6].mxu1  ;;  %v7881_v16 = vmax.f32 %v7391_v38, 0.0 }
 0x280   : > { %v7882_v10 = vmax.f32 %v7394_v19, 0.0  ;;  %4257 = vrot.lane.b32.xlu1 %v7884_v28, %s5263_s29  ;;  %v3913_v55 = vpop.f32.mrb[7].mxu1  ;;  %v7418_v57 = vadd.f32 %v5121_v54, %v7310_v48  ;;  %v7878_v37 = vmax.f32 %v7410_v49, 0.0  ;;  %v4184_v28 = vmul.f32 %v7301_v1, %v3960_v35 }
 0x281   : > { %v3977_v8 = vmax.f32 %v3911_v47, 0.0  ;;  %v3914_v32 = vadd.f32 %v7310_v48, %v3913_v55  ;;  %v7879_v39 = vmax.f32 %v7400_v27, 0.0  ;;  %v4199_v35 = vmul.f32 %v7396_v26, %v3975_v44 }
 0x282   : > { %4259 = vrot.lane.b32.xlu0 %v7882_v10, %s5263_s29  ;;  %v7874_v2 = vmax.f32 %v7418_v57, 0.0 }
 0x283   : > { %v3978_v36 = vmax.f32 %v3914_v32, 0.0  ;;  %v7423_v12 = vmul.f32 %v4124_v3, %v3977_v8  ;;  %v7457_v3 = vpop.permute.xlu1 %4133 }
 0x284   : > { %4253 = vrot.lane.b32.xlu1 %v7881_v16, %s5263_s29  ;;  %v4183_v16 = vmul.f32 %v7299_v31, %v3959_v9 }
 0x285   : > { %v7429_v52 = vmul.f32 %v4129_v0, %v3978_v36 }
 0x286   : > { %4255 = vrot.lane.b32.xlu0 %v7879_v39, %s5263_s29 }
 0x288   : > { %4289 = vrot.lane.b32.xlu1 %v7878_v37, %s5263_s29 }
 0x28a   : > { %4291 = vrot.lane.b32.xlu0 %v7874_v2, %s5263_s29 }
 0x28c   : > { %4285 = vrot.lane.b32.xlu1 %v3977_v8, %s5263_s29 }
 0x28e   : > { %4287 = vrot.lane.b32.xlu0 %v3978_v36, %s5263_s29 }
 0x2b1   : > { %v5108_v21 = vpop.f32.mrb[8].mxu0 }
 0x2b2   : > { %v7441_v24 = vadd.f32 %v5108_v21, %v7310_v48  ;;  %v3862_v60 = vpop.f32.mrb[9].mxu0  ;;  %v7466_v21 = vpop.permute.xlu0 %4138 }
 0x2b3   : > { %v5109_v34 = vpop.f32.mrb[10].mxu0  ;;  %v5124_v46 = vpop.f32.mrb[8].mxu1  ;;  %v7445_v62 = vadd.f32 %v7310_v48, %v3862_v60 }
 0x2b4   : > { %v7872_v29 = vmax.f32 %v7441_v24, 0.0  ;;  %v7448_v25 = vadd.f32 %v5109_v34, %v7310_v48  ;;  %v3865_v14 = vpop.f32.mrb[11].mxu0  ;;  %v3926_v47 = vpop.f32.mrb[9].mxu1  ;;  %v7461_v0 = vadd.f32 %v5124_v46, %v7310_v48 }
 0x2b5   : > { %v5125_v54 = vpop.f32.mrb[10].mxu1  ;;  %v7452_v8 = vadd.f32 %v7310_v48, %v3865_v14  ;;  %v7875_v36 = vmax.f32 %v7445_v62, 0.0  ;;  %v7475_v14 = vpop.permute.xlu1 %4143 }
 0x2b6   : > { %v7873_v55 = vmax.f32 %v7448_v25, 0.0  ;;  %4265 = vrot.lane.b32.xlu1 %v7872_v29, %s5263_s29  ;;  %v3929_v32 = vpop.f32.mrb[11].mxu1  ;;  %v7470_v34 = vadd.f32 %v5125_v54, %v7310_v48  ;;  %v7877_v46 = vmax.f32 %v7461_v0, 0.0  ;;  %v7479_v29 = vadd.f32 %v7310_v48, %v3926_v47  ;;  %v7485_v2 = vpop.permute.xlu0 %4148 }
 0x2b7   : > { %v7876_v60 = vmax.f32 %v7452_v8, 0.0  ;;  %v7488_v54 = vadd.f32 %v7310_v48, %v3929_v32 }
 0x2b8   : > { %4267 = vrot.lane.b32.xlu0 %v7873_v55, %s5263_s29  ;;  %v7880_v55 = vmax.f32 %v7470_v34, 0.0 }
 0x2b9   : > { %v7885_v47 = vmax.f32 %v7488_v54, 0.0 }
 0x2ba   : > { %4261 = vrot.lane.b32.xlu1 %v7875_v36, %s5263_s29  ;;  %v7883_v36 = vmax.f32 %v7479_v29, 0.0  ;;  %v7503_v32 = vpop.permute.xlu0 %4158 }
 0x2bc   : > { %4263 = vrot.lane.b32.xlu0 %v7876_v60, %s5263_s29  ;;  %v7498_v60 = vpop.permute.xlu1 %4153 }
 0x2be   : > { %4297 = vrot.lane.b32.xlu1 %v7877_v46, %s5263_s29  ;;  %v7510_v37 = vpop.permute.xlu0 %4168 }
 0x2bf   : > { %7961 = vst [vmem:[#allocation11_spill] sm:$0xff] %v7510_v37 }
 0x2c0   : > { %4299 = vrot.lane.b32.xlu0 %v7880_v55, %s5263_s29  ;;  %v7508_v46 = vpop.permute.xlu1 %4163 }
 0x2c2   : > { %4293 = vrot.lane.b32.xlu1 %v7883_v36, %s5263_s29  ;;  %v7514_v55 = vpop.permute.xlu0 %4178 }
 0x2c4   : > { %4295 = vrot.lane.b32.xlu0 %v7885_v47, %s5263_s29  ;;  %v7512_v39 = vpop.permute.xlu1 %4173 }
 0x2d2   : > { %v4250_v10 = vpop.permute.xlu1 %4249 }
 0x2d3   : > { %v4343_v36 = vadd.f32 %v4250_v10, %v4183_v16 }
 0x2d4   : > { %v4252_v47 = vpop.permute.xlu0 %4251 }
 0x2d5   : > { %v7528_v51 = vpack.c.bf16 %v4343_v36, %v4343_v36  ;;  %v4344_v13 = vadd.f32 %v4252_v47, %v4184_v28  ;;  %v4200_v36 = vmul.f32 %v7406_v17, %v3976_v53 }
 0x2d6   : > { %v4246_v31 = vpop.permute.xlu1 %4245 }
 0x2d7   : > { %4504 = vst.msk [vmem:[%s7526_s7 + $0x8] sm:$0xf] %vm4501_vm3, %v7528_v51  ;;  %v7533_v9 = vpack.c.bf16 %v4344_v13, %v4344_v13  ;;  %v4341_v1 = vadd.f32 %v4246_v31, %v7331_v59  ;;  %v7962_v13 = vmax.f32 %v7358_v42, 0.0 }
 0x2d8   : > { %v4248_v63 = vpop.permute.xlu0 %4247 }
 0x2d9   : > { %4505 = vst.msk [vmem:[%s7526_s7 + $0xc] sm:$0xf] %vm4501_vm3, %v7533_v9  ;;  %v7542_v10 = vpack.c.bf16 %v4341_v1, %v4341_v1  ;;  %v4342_v28 = vadd.f32 %v4248_v63, %v7341_v20  ;;  %v4198_v31 = vmul.f32 %v7384_v6, %v7962_v13 }
 0x2da   : > { %v4282_v16 = vpop.permute.xlu1 %4281 }
 0x2db   : > { %4502 = vst.msk [vmem:[%s7526_s7] sm:$0xf] %vm4501_vm3, %v7542_v10  ;;  %v7551_v59 = vpack.c.bf16 %v4342_v28, %v4342_v28  ;;  %v4359_v23 = vadd.f32 %v4282_v16, %v4199_v35 }
 0x2dc   : > { %v4284_v44 = vpop.permute.xlu0 %4283 }
 0x2dd   : > { %4503 = vst.msk [vmem:[%s7526_s7 + $0x4] sm:$0xf] %vm4501_vm3, %v7551_v59  ;;  %v7556_v26 = vpack.c.bf16 %v4359_v23, %v4359_v23  ;;  %v4360_v20 = vadd.f32 %v4284_v44, %v4200_v36 }
 0x2de   : > { %v4278_v53 = vpop.permute.xlu1 %4277 }
 0x2df   : > { %4520 = vst.msk [vmem:[%s7526_s7 + $0x48] sm:$0xf] %vm4501_vm3, %v7556_v26  ;;  %v7564_v17 = vpack.c.bf16 %v4360_v20, %v4360_v20  ;;  %v4357_v47 = vadd.f32 %v4278_v53, %v4197_v43 }
 0x2e0   : > { %v4280_v1 = vpop.permute.xlu0 %4279 }
 0x2e1   : > { %4521 = vst.msk [vmem:[%s7526_s7 + $0x4c] sm:$0xf] %vm4501_vm3, %v7564_v17  ;;  %v7572_v63 = vpack.c.bf16 %v4357_v47, %v4357_v47  ;;  %v4358_v11 = vadd.f32 %v4280_v1, %v4198_v31  ;;  %v7963_v47 = vmax.f32 %v7387_v18, 0.0 }
 0x2e3   : > { %4518 = vst.msk [vmem:[%s7526_s7 + $0x40] sm:$0xf] %vm4501_vm3, %v7572_v63  ;;  %v7577_v15 = vpack.c.bf16 %v4358_v11, %v4358_v11  ;;  %v4187_v13 = vmul.f32 %v7312_v41, %v7963_v47 }
 0x2e5   : > { %v5112_v7 = vpop.f32.mrb[12].mxu0  ;;  %4519 = vst.msk [vmem:[%s7526_s7 + $0x44] sm:$0xf] %vm4501_vm3, %v7577_v15 }
 0x2e6   : > { %v7583_v42 = vadd.f32 %v5112_v7, %v7310_v48  ;;  %v3878_v6 = vpop.f32.mrb[13].mxu0  ;;  %v7964_v7 = vmax.f32 %v7394_v19, 0.0 }
 0x2e7   : > { %v5113_v35 = vpop.f32.mrb[14].mxu0  ;;  %v7587_v16 = vadd.f32 %v7310_v48, %v3878_v6 }
 0x2e8   : > { %v7889_v28 = vmax.f32 %v7583_v42, 0.0  ;;  %v7590_v36 = vadd.f32 %v5113_v35, %v7310_v48  ;;  %v3881_v23 = vpop.f32.mrb[15].mxu0  ;;  %v4188_v6 = vmul.f32 %v7314_v40, %v7964_v7  ;;  %v7967_v7 = vmax.f32 %v7410_v49, 0.0 }
 0x2e9   : > { %v7594_v20 = vadd.f32 %v7310_v48, %v3881_v23  ;;  %v7887_v43 = vmax.f32 %v7587_v16, 0.0 }
 0x2ea   : > { %v7888_v44 = vmax.f32 %v7590_v36, 0.0  ;;  %4273 = vrot.lane.b32.xlu1 %v7889_v28, %s5263_s29 }
 0x2eb   : > { %v7890_v53 = vmax.f32 %v7594_v20, 0.0 }
 0x2ec   : > { %4275 = vrot.lane.b32.xlu0 %v7888_v44, %s5263_s29 }
 0x2ee   : > { %4269 = vrot.lane.b32.xlu1 %v7887_v43, %s5263_s29 }
 0x2f0   : > { %4271 = vrot.lane.b32.xlu0 %v7890_v53, %s5263_s29  ;;  %v7965_v53 = vmax.f32 %v7391_v38, 0.0 }
 0x2f2   : > { %v4258_v31 = vpop.permute.xlu1 %4257  ;;  %v5128_v1 = vpop.f32.mrb[12].mxu1  ;;  %v4185_v18 = vmul.f32 %v7303_v4, %v7965_v53 }
 0x2f3   : > { %v4347_v11 = vadd.f32 %v4258_v31, %v4187_v13  ;;  %v3951_v35 = vadd.f32 %v5128_v1, %v7310_v48  ;;  %v3942_v23 = vpop.f32.mrb[13].mxu1 }
 0x2f4   : > { %v4260_v43 = vpop.permute.xlu0 %4259  ;;  %v5129_v44 = vpop.f32.mrb[14].mxu1  ;;  %v7621_v47 = vadd.f32 %v7310_v48, %v3942_v23 }
 0x2f5   : > { %v5035_v28 = vpack.c.bf16 %v4347_v11, %v4347_v11  ;;  %v4348_v37 = vadd.f32 %v4260_v43, %v4188_v6  ;;  %v3987_v41 = vmax.f32 %v3951_v35, 0.0  ;;  %v3954_v19 = vadd.f32 %v5129_v44, %v7310_v48  ;;  %v3945_v13 = vpop.f32.mrb[15].mxu1 }
 0x2f6   : > { %v4254_v40 = vpop.permute.xlu1 %4253  ;;  %v7966_v11 = vmax.f32 %v7400_v27, 0.0  ;;  %v7630_v4 = vadd.f32 %v7310_v48, %v3945_v13 }
 0x2f7   : > { %4508 = vst.msk [vmem:[%s7526_s7 + $0x18] sm:$0xf] %vm4501_vm3, %v5035_v28  ;;  %v5036_v31 = vpack.c.bf16 %v4348_v37, %v4348_v37  ;;  %v4345_v1 = vadd.f32 %v4254_v40, %v4185_v18  ;;  %v3988_v43 = vmax.f32 %v3954_v19, 0.0  ;;  %4305 = vrot.lane.b32.xlu1 %v3987_v41, %s5263_s29  ;;  %v7634_v44 = vmul.f32 %v7512_v39, %v3987_v41 }
 0x2f8   : > { %v4186_v38 = vmul.f32 %v7305_v45, %v7966_v11  ;;  %v4256_v53 = vpop.permute.xlu0 %4255  ;;  %v4203_v37 = vmul.f32 %v7457_v3, %v7967_v7  ;;  %v3985_v45 = vmax.f32 %v7621_v47, 0.0  ;;  %v7968_v39 = vmax.f32 %v7418_v57, 0.0 }
 0x2f9   : > { %4509 = vst.msk [vmem:[%s7526_s7 + $0x1c] sm:$0xf] %vm4501_vm3, %v5036_v31  ;;  %v5033_v27 = vpack.c.bf16 %v4345_v1, %v4345_v1  ;;  %4307 = vrot.lane.b32.xlu0 %v3988_v43, %s5263_s29  ;;  %v7644_v35 = vmul.f32 %v7514_v55, %v3988_v43  ;;  %v3986_v18 = vmax.f32 %v7630_v4, 0.0 }
 0x2fa   : > { %v4346_v6 = vadd.f32 %v4256_v53, %v4186_v38  ;;  %v4290_v48 = vpop.permute.xlu1 %4289  ;;  %v4204_v49 = vmul.f32 %v7466_v21, %v7968_v39  ;;  %v7973_v53 = vmax.f32 %v7461_v0, 0.0  ;;  %v7975_v39 = vmax.f32 %v7479_v29, 0.0 }
 0x2fb   : > { %4506 = vst.msk [vmem:[%s7526_s7 + $0x10] sm:$0xf] %vm4501_vm3, %v5033_v27  ;;  %v4363_v23 = vadd.f32 %v4290_v48, %v4203_v37  ;;  %4301 = vrot.lane.b32.xlu1 %v3985_v45, %s5263_s29 }
 0x2fc   : > { %v5034_v3 = vpack.c.bf16 %v4346_v6, %v4346_v6  ;;  %v4292_v41 = vpop.permute.xlu0 %4291 }
 0x2fd   : > { %v5051_v55 = vpack.c.bf16 %v4363_v23, %v4363_v23  ;;  %v4364_v19 = vadd.f32 %v4292_v41, %v4204_v49  ;;  %4303 = vrot.lane.b32.xlu0 %v3986_v18, %s5263_s29  ;;  %v7976_v23 = vmax.f32 %v7488_v54, 0.0 }
 0x2fe   : > { %4507 = vst.msk [vmem:[%s7526_s7 + $0x14] sm:$0xf] %vm4501_vm3, %v5034_v3  ;;  %v4286_v57 = vpop.permute.xlu1 %4285 }
 0x2ff   : > { %4524 = vst.msk [vmem:[%s7526_s7 + $0x58] sm:$0xf] %vm4501_vm3, %v5051_v55  ;;  %v5052_v21 = vpack.c.bf16 %v4364_v19, %v4364_v19  ;;  %v4361_v13 = vadd.f32 %v4286_v57, %v7423_v12  ;;  %4538 = vrot.lane.b32.xlu1 %v7528_v51, %s5264_s8  ;;  %v7969_v51 = vmax.f32 %v7441_v24, 0.0  ;;  %v4206_v41 = vmul.f32 %v7485_v2, %v7976_v23 }
 0x300   : > { %v4288_v40 = vpop.permute.xlu0 %4287 }
 0x301   : > { %4525 = vst.msk [vmem:[%s7526_s7 + $0x5c] sm:$0xf] %vm4501_vm3, %v5052_v21  ;;  %v5049_v1 = vpack.c.bf16 %v4361_v13, %v4361_v13  ;;  %v4362_v11 = vadd.f32 %v4288_v40, %v7429_v52  ;;  %4540 = vrot.lane.b32.xlu0 %v7533_v9, %s5264_s8  ;;  %v4191_v12 = vmul.f32 %v7347_v61, %v7969_v51  ;;  %v7978_v13 = vmax.f32 %v7590_v36, 0.0 }
 0x302   : > { %v7979_v51 = vmax.f32 %v7587_v16, 0.0  ;;  %v7980_v36 = vmax.f32 %v7594_v20, 0.0 }
 0x303   : > { %4522 = vst.msk [vmem:[%s7526_s7 + $0x50] sm:$0xf] %vm4501_vm3, %v5049_v1  ;;  %v5050_v38 = vpack.c.bf16 %v4362_v11, %v4362_v11  ;;  %4534 = vrot.lane.b32.xlu1 %v7542_v10, %s5264_s8  ;;  %v7970_v10 = vmax.f32 %v7448_v25, 0.0  ;;  %v7972_v25 = vmax.f32 %v7452_v8, 0.0  ;;  %v4196_v40 = vmul.f32 %v7380_v58, %v7978_v13 }
 0x304   : > { %v4194_v58 = vmul.f32 %v7373_v5, %v7980_v36 }
 0x305   : > { %4523 = vst.msk [vmem:[%s7526_s7 + $0x54] sm:$0xf] %vm4501_vm3, %v5050_v38  ;;  %4536 = vrot.lane.b32.xlu0 %v7551_v59, %s5264_s8  ;;  %v4192_v59 = vmul.f32 %v7354_v50, %v7970_v10  ;;  %v4190_v50 = vmul.f32 %v7333_v33, %v7972_v25 }
 0x307   : > { %4570 = vrot.lane.b32.xlu1 %v7556_v26, %s5264_s8 }
 0x309   : > { %4572 = vrot.lane.b32.xlu0 %v7564_v17, %s5264_s8 }
 0x30b   : > { %4566 = vrot.lane.b32.xlu1 %v7572_v63, %s5264_s8 }
 0x30d   : > { %4568 = vrot.lane.b32.xlu0 %v7577_v15, %s5264_s8  ;;  %v7971_v15 = vmax.f32 %v7445_v62, 0.0  ;;  %v4207_v62 = vmul.f32 %v7498_v60, %v7973_v53 }
 0x30f   : > { %4546 = vrot.lane.b32.xlu1 %v5035_v28, %s5264_s8  ;;  %v4189_v28 = vmul.f32 %v7325_v56, %v7971_v15 }
 0x311   : > { %4548 = vrot.lane.b32.xlu0 %v5036_v31, %s5264_s8 }
 0x313   : > { %4542 = vrot.lane.b32.xlu1 %v5033_v27, %s5264_s8  ;;  %v7974_v27 = vmax.f32 %v7470_v34, 0.0  ;;  %v4205_v34 = vmul.f32 %v7475_v14, %v7975_v39  ;;  %v7977_v14 = vmax.f32 %v7583_v42, 0.0 }
 0x315   : > { %4544 = vrot.lane.b32.xlu0 %v5034_v3, %s5264_s8  ;;  %v4208_v6 = vmul.f32 %v7503_v32, %v7974_v27  ;;  %v4195_v2 = vmul.f32 %v7378_v30, %v7977_v14 }
 0x317   : > { %4578 = vrot.lane.b32.xlu1 %v5051_v55, %s5264_s8 }
 0x319   : > { %4580 = vrot.lane.b32.xlu0 %v5052_v21, %s5264_s8 }
 0x31b   : > { %4574 = vrot.lane.b32.xlu1 %v5049_v1, %s5264_s8 }
 0x31d   : > { %4576 = vrot.lane.b32.xlu0 %v5050_v38, %s5264_s8 }
 0x328   : > { %v4266_v52 = vpop.permute.xlu1 %4265 }
 0x329   : > { %v4351_v9 = vadd.f32 %v4266_v52, %v4191_v12  ;;  %v4193_v12 = vmul.f32 %v7367_v22, %v7979_v51 }
 0x32a   : > { %v4268_v26 = vpop.permute.xlu0 %4267 }
 0x32b   : > { %v5039_v17 = vpack.c.bf16 %v4351_v9, %v4351_v9  ;;  %v4352_v63 = vadd.f32 %v4268_v26, %v4192_v59 }
 0x32c   : > { %v4262_v31 = vpop.permute.xlu1 %4261 }
 0x32d   : > { %4512 = vst.msk [vmem:[%s7526_s7 + $0x28] sm:$0xf] %vm4501_vm3, %v5039_v17  ;;  %v5040_v24 = vpack.c.bf16 %v4352_v63, %v4352_v63  ;;  %v4349_v61 = vadd.f32 %v4262_v31, %v4189_v28  ;;  %4554 = vrot.lane.b32.xlu1 %v5039_v17, %s5264_s8  ;;  %v4209_v63 = vmul.f32 %v7508_v46, %v3985_v45 }
 0x32e   : > { %v4264_v43 = vpop.permute.xlu0 %4263 }
 0x32f   : > { %4513 = vst.msk [vmem:[%s7526_s7 + $0x2c] sm:$0xf] %vm4501_vm3, %v5040_v24  ;;  %v5037_v56 = vpack.c.bf16 %v4349_v61, %v4349_v61  ;;  %v4350_v7 = vadd.f32 %v4264_v43, %v4190_v50  ;;  %4556 = vrot.lane.b32.xlu0 %v5040_v24, %s5264_s8  ;;  %v7981_v24 = vld [vmem:[#allocation11_spill] sm:$0xff] }
 0x330   : > { %v4298_v37 = vpop.permute.xlu1 %4297  ;;  %v4210_v61 = vmul.f32 %v7981_v24, %v3986_v18 }
 0x331   : > { %4510 = vst.msk [vmem:[%s7526_s7 + $0x20] sm:$0xf] %vm4501_vm3, %v5037_v56  ;;  %v5038_v33 = vpack.c.bf16 %v4350_v7, %v4350_v7  ;;  %v4367_v8 = vadd.f32 %v4298_v37, %v4207_v62  ;;  %4550 = vrot.lane.b32.xlu1 %v5037_v56, %s5264_s8 }
 0x332   : > { %v4300_v0 = vpop.permute.xlu0 %4299 }
 0x333   : > { %4511 = vst.msk [vmem:[%s7526_s7 + $0x24] sm:$0xf] %vm4501_vm3, %v5038_v33  ;;  %v5055_v60 = vpack.c.bf16 %v4367_v8, %v4367_v8  ;;  %v4368_v48 = vadd.f32 %v4300_v0, %v4208_v6  ;;  %4552 = vrot.lane.b32.xlu0 %v5038_v33, %s5264_s8 }
 0x334   : > { %v4294_v32 = vpop.permute.xlu1 %4293 }
 0x335   : > { %4528 = vst.msk [vmem:[%s7526_s7 + $0x68] sm:$0xf] %vm4501_vm3, %v5055_v60  ;;  %v5056_v49 = vpack.c.bf16 %v4368_v48, %v4368_v48  ;;  %v4365_v3 = vadd.f32 %v4294_v32, %v4205_v34  ;;  %4586 = vrot.lane.b32.xlu1 %v5055_v60, %s5264_s8 }
 0x336   : > { %v4296_v55 = vpop.permute.xlu0 %4295 }
 0x337   : > { %4529 = vst.msk [vmem:[%s7526_s7 + $0x6c] sm:$0xf] %vm4501_vm3, %v5056_v49  ;;  %v5053_v19 = vpack.c.bf16 %v4365_v3, %v4365_v3  ;;  %v4366_v57 = vadd.f32 %v4296_v55, %v4206_v41  ;;  %4588 = vrot.lane.b32.xlu0 %v5056_v49, %s5264_s8 }
 0x339   : > { %4526 = vst.msk [vmem:[%s7526_s7 + $0x60] sm:$0xf] %vm4501_vm3, %v5053_v19  ;;  %v5054_v29 = vpack.c.bf16 %v4366_v57, %v4366_v57  ;;  %4582 = vrot.lane.b32.xlu1 %v5053_v19, %s5264_s8 }
 0x33b   : > { %4527 = vst.msk [vmem:[%s7526_s7 + $0x64] sm:$0xf] %vm4501_vm3, %v5054_v29  ;;  %4584 = vrot.lane.b32.xlu0 %v5054_v29, %s5264_s8 }
 0x35c   : > { %v4274_v54 = vpop.permute.xlu1 %4273 }
 0x35d   : > { %v4355_v21 = vadd.f32 %v4274_v54, %v4195_v2 }
 0x35e   : > { %v4276_v1 = vpop.permute.xlu0 %4275 }
 0x35f   : > { %v5043_v11 = vpack.c.bf16 %v4355_v21, %v4355_v21  ;;  %v4356_v38 = vadd.f32 %v4276_v1, %v4196_v40 }
 0x360   : > { %v4270_v52 = vpop.permute.xlu1 %4269 }
 0x361   : > { %4516 = vst.msk [vmem:[%s7526_s7 + $0x38] sm:$0xf] %vm4501_vm3, %v5043_v11  ;;  %v5044_v42 = vpack.c.bf16 %v4356_v38, %v4356_v38  ;;  %v4353_v30 = vadd.f32 %v4270_v52, %v4193_v12  ;;  %4562 = vrot.lane.b32.xlu1 %v5043_v11, %s5264_s8 }
 0x362   : > { %v4272_v9 = vpop.permute.xlu0 %4271 }
 0x363   : > { %4517 = vst.msk [vmem:[%s7526_s7 + $0x3c] sm:$0xf] %vm4501_vm3, %v5044_v42  ;;  %v5041_v10 = vpack.c.bf16 %v4353_v30, %v4353_v30  ;;  %v4354_v16 = vadd.f32 %v4272_v9, %v4194_v58  ;;  %4564 = vrot.lane.b32.xlu0 %v5044_v42, %s5264_s8 }
 0x365   : > { %4514 = vst.msk [vmem:[%s7526_s7 + $0x30] sm:$0xf] %vm4501_vm3, %v5041_v10  ;;  %v5042_v22 = vpack.c.bf16 %v4354_v16, %v4354_v16  ;;  %4558 = vrot.lane.b32.xlu1 %v5041_v10, %s5264_s8 }
 0x367   : > { %4515 = vst.msk [vmem:[%s7526_s7 + $0x34] sm:$0xf] %vm4501_vm3, %v5042_v22  ;;  %4560 = vrot.lane.b32.xlu0 %v5042_v22, %s5264_s8 }
 0x369   : > { %v4306_v5 = vpop.permute.xlu1 %4305 }
 0x36a   : > { %v4371_v20 = vadd.f32 %v4306_v5, %v7634_v44 }
 0x36b   : > { %v4308_v59 = vpop.permute.xlu0 %4307 }
 0x36c   : > { %v5059_v26 = vpack.c.bf16 %v4371_v20, %v4371_v20  ;;  %v4372_v17 = vadd.f32 %v4308_v59, %v7644_v35 }
 0x36d   : > { %v4302_v15 = vpop.permute.xlu1 %4301 }
 0x36e   : > { %4532 = vst.msk [vmem:[%s7526_s7 + $0x78] sm:$0xf] %vm4501_vm3, %v5059_v26  ;;  %v5060_v28 = vpack.c.bf16 %v4372_v17, %v4372_v17  ;;  %v4369_v31 = vadd.f32 %v4302_v15, %v4209_v63 }
 0x36f   : > { %v4304_v44 = vpop.permute.xlu0 %4303 }
 0x370   : > { %4533 = vst.msk [vmem:[%s7526_s7 + $0x7c] sm:$0xf] %vm4501_vm3, %v5060_v28  ;;  %v5057_v46 = vpack.c.bf16 %v4369_v31, %v4369_v31  ;;  %v4370_v47 = vadd.f32 %v4304_v44, %v4210_v61 }
 0x371   : > { %v4539_v45 = vpop.permute.xlu1 %4538 }
 0x372   : > { %4530 = vst.msk [vmem:[%s7526_s7 + $0x70] sm:$0xf] %vm4501_vm3, %v5057_v46  ;;  %v5058_v4 = vpack.c.bf16 %v4370_v47, %v4370_v47  ;;  %4632 = vst.msk [vmem:[%s7780_s11 + $0x8] sm:$0xf] %vm4501_vm3, %v4539_v45  ;;  %4590 = vrot.lane.b32.xlu1 %v5057_v46, %s5264_s8 }
 0x373   : > { %v4541_v35 = vpop.permute.xlu0 %4540 }
 0x374   : > { %4531 = vst.msk [vmem:[%s7526_s7 + $0x74] sm:$0xf] %vm4501_vm3, %v5058_v4  ;;  %4633 = vst.msk [vmem:[%s7780_s11 + $0xc] sm:$0xf] %vm4501_vm3, %v4541_v35  ;;  %4592 = vrot.lane.b32.xlu0 %v5058_v4, %s5264_s8 }
 0x375   : > { %v4535_v18 = vpop.permute.xlu1 %4534 }
 0x376   : > { %4630 = vst.msk [vmem:[%s7780_s11] sm:$0xf] %vm4501_vm3, %v4535_v18  ;;  %4594 = vrot.lane.b32.xlu1 %v5059_v26, %s5264_s8 }
 0x377   : > { %v4537_v25 = vpop.permute.xlu0 %4536 }
 0x378   : > { %4631 = vst.msk [vmem:[%s7780_s11 + $0x4] sm:$0xf] %vm4501_vm3, %v4537_v25  ;;  %4596 = vrot.lane.b32.xlu0 %v5060_v28, %s5264_s8 }
 0x379   : > { %v4571_v50 = vpop.permute.xlu1 %4570 }
 0x37a   : > { %4648 = vst.msk [vmem:[%s7780_s11 + $0x48] sm:$0xf] %vm4501_vm3, %v4571_v50 }
 0x37b   : > { %v4573_v43 = vpop.permute.xlu0 %4572 }
 0x37c   : > { %4649 = vst.msk [vmem:[%s7780_s11 + $0x4c] sm:$0xf] %vm4501_vm3, %v4573_v43 }
 0x37d   : > { %v4567_v53 = vpop.permute.xlu1 %4566 }
 0x37e   : > { %4646 = vst.msk [vmem:[%s7780_s11 + $0x40] sm:$0xf] %vm4501_vm3, %v4567_v53 }
 0x37f   : > { %v4569_v62 = vpop.permute.xlu0 %4568 }
 0x380   : > { %4647 = vst.msk [vmem:[%s7780_s11 + $0x44] sm:$0xf] %vm4501_vm3, %v4569_v62 }
 0x381   : > { %v4547_v56 = vpop.permute.xlu1 %4546 }
 0x382   : > { %4636 = vst.msk [vmem:[%s7780_s11 + $0x18] sm:$0xf] %vm4501_vm3, %v4547_v56 }
 0x383   : > { %v4549_v7 = vpop.permute.xlu0 %4548 }
 0x384   : > { %4637 = vst.msk [vmem:[%s7780_s11 + $0x1c] sm:$0xf] %vm4501_vm3, %v4549_v7 }
 0x385   : > { %v4543_v37 = vpop.permute.xlu1 %4542 }
 0x386   : > { %4634 = vst.msk [vmem:[%s7780_s11 + $0x10] sm:$0xf] %vm4501_vm3, %v4543_v37 }
 0x387   : > { %v4545_v27 = vpop.permute.xlu0 %4544 }
 0x388   : > { %4635 = vst.msk [vmem:[%s7780_s11 + $0x14] sm:$0xf] %vm4501_vm3, %v4545_v27 }
 0x389   : > { %v4579_v6 = vpop.permute.xlu1 %4578 }
 0x38a   : > { %4652 = vst.msk [vmem:[%s7780_s11 + $0x58] sm:$0xf] %vm4501_vm3, %v4579_v6 }
 0x38b   : > { %v4581_v33 = vpop.permute.xlu0 %4580 }
 0x38c   : > { %4653 = vst.msk [vmem:[%s7780_s11 + $0x5c] sm:$0xf] %vm4501_vm3, %v4581_v33 }
 0x38d   : > { %v4575_v8 = vpop.permute.xlu1 %4574 }
 0x38e   : > { %4650 = vst.msk [vmem:[%s7780_s11 + $0x50] sm:$0xf] %vm4501_vm3, %v4575_v8 }
 0x38f   : > { %v4577_v0 = vpop.permute.xlu0 %4576 }
 0x390   : > { %4651 = vst.msk [vmem:[%s7780_s11 + $0x54] sm:$0xf] %vm4501_vm3, %v4577_v0 }
 0x39f   : > { %v4555_v60 = vpop.permute.xlu1 %4554 }
 0x3a0   : > { %4640 = vst.msk [vmem:[%s7780_s11 + $0x28] sm:$0xf] %vm4501_vm3, %v4555_v60 }
 0x3a1   : > { %v4557_v48 = vpop.permute.xlu0 %4556 }
 0x3a2   : > { %4641 = vst.msk [vmem:[%s7780_s11 + $0x2c] sm:$0xf] %vm4501_vm3, %v4557_v48 }
 0x3a3   : > { %v4551_v39 = vpop.permute.xlu1 %4550 }
 0x3a4   : > { %4638 = vst.msk [vmem:[%s7780_s11 + $0x20] sm:$0xf] %vm4501_vm3, %v4551_v39 }
 0x3a5   : > { %v4553_v34 = vpop.permute.xlu0 %4552 }
 0x3a6   : > { %4639 = vst.msk [vmem:[%s7780_s11 + $0x24] sm:$0xf] %vm4501_vm3, %v4553_v34 }
 0x3a7   : > { %v4587_v32 = vpop.permute.xlu1 %4586 }
 0x3a8   : > { %4656 = vst.msk [vmem:[%s7780_s11 + $0x68] sm:$0xf] %vm4501_vm3, %v4587_v32 }
 0x3a9   : > { %v4589_v49 = vpop.permute.xlu0 %4588 }
 0x3aa   : > { %4657 = vst.msk [vmem:[%s7780_s11 + $0x6c] sm:$0xf] %vm4501_vm3, %v4589_v49 }
 0x3ab   : > { %v4583_v3 = vpop.permute.xlu1 %4582 }
 0x3ac   : > { %4654 = vst.msk [vmem:[%s7780_s11 + $0x60] sm:$0xf] %vm4501_vm3, %v4583_v3 }
 0x3ad   : > { %v4585_v23 = vpop.permute.xlu0 %4584 }
 0x3ae   : > { %4655 = vst.msk [vmem:[%s7780_s11 + $0x64] sm:$0xf] %vm4501_vm3, %v4585_v23 }
 0x3d3   : > { %v4563_v41 = vpop.permute.xlu1 %4562 }
 0x3d4   : > { %4644 = vst.msk [vmem:[%s7780_s11 + $0x38] sm:$0xf] %vm4501_vm3, %v4563_v41 }
 0x3d5   : > { %v4565_v55 = vpop.permute.xlu0 %4564 }
 0x3d6   : > { %4645 = vst.msk [vmem:[%s7780_s11 + $0x3c] sm:$0xf] %vm4501_vm3, %v4565_v55 }
 0x3d7   : > { %v4559_v19 = vpop.permute.xlu1 %4558 }
 0x3d8   : > { %4642 = vst.msk [vmem:[%s7780_s11 + $0x30] sm:$0xf] %vm4501_vm3, %v4559_v19 }
 0x3d9   : > { %v4561_v57 = vpop.permute.xlu0 %4560 }
 0x3da   : > { %4643 = vst.msk [vmem:[%s7780_s11 + $0x34] sm:$0xf] %vm4501_vm3, %v4561_v57 }
 0x3e4   : > { %v4591_v29 = vpop.permute.xlu1 %4590 }
 0x3e5   : > { %4658 = vst.msk [vmem:[%s7780_s11 + $0x70] sm:$0xf] %vm4501_vm3, %v4591_v29 }
 0x3e6   : > { %v4593_v14 = vpop.permute.xlu0 %4592 }
 0x3e7   : > { %4659 = vst.msk [vmem:[%s7780_s11 + $0x74] sm:$0xf] %vm4501_vm3, %v4593_v14 }
 0x3e8   : > { %v4595_v2 = vpop.permute.xlu1 %4594 }
 0x3e9   : > { %4660 = vst.msk [vmem:[%s7780_s11 + $0x78] sm:$0xf] %vm4501_vm3, %v4595_v2 }
 0x3ea   : > { %v4597_v54 = vpop.permute.xlu0 %4596 }
 0x3eb   : > { %4661 = vst.msk [vmem:[%s7780_s11 + $0x7c] sm:$0xf] %vm4501_vm3, %v4597_v54 }
 0x3ec PF: > { %s16_s18 = sadd.s32 1, %s5252_s18  }
 0x3ed   : > { %p13_p4 = scmp.ge.s32.totalorder %s16_s18, 4  }
 0x3ef   :  { %15 = sbr.rel (!%p13_p4) target bundleno = 1 (0x1), region = 84 }

</bundles_post_ra>
